<compile_context>
chip_gen: v7x
topology: tpu7x:2x2x1
jax: 0.10.0
libtpu: 0.0.40
codegen_flags: <defaults>
</compile_context>

<pallas_src>
import functools

import jax
import jax.numpy as jnp
from jax.experimental import pallas as pl
from jax.experimental.pallas import tpu as pltpu


def _round_up(n, m):
    return ((n + m - 1) // m) * m


# ----------------------------------------------------------------------------
# Fused Fire_invert kernel (one batch element per grid step)
# ----------------------------------------------------------------------------
def _fire_invert_kernel(x_ref, wsq_ref, bsq_ref, wall_ref, ball_ref,
                        o_ref, spad_ref, col_ref, *, H, W, apron):
    """Fused Fire_invert; negation already folded into all weights/biases.

    x_ref    : (H*W, Cin)                 bf16 activations (NHWC, flattened)
    wsq_ref  : (Cin, Csq)                 bf16  (= -W_squeeze)
    bsq_ref  : (1, Csq)                   f32   (= -b_squeeze)
    wall_ref : (9*Csq, E1+E3)             bf16 merged expand weight:
                 rows [t*Csq:(t+1)*Csq], cols [E1:]  = -W_expand3x3[tap t]
                 rows [4*Csq:5*Csq],     cols [:E1]  = -W_expand1x1 (center tap)
    ball_ref : (1, E1+E3)                 f32   (= [-b_e1 | -b_e3])
    o_ref    : (H*W, E1+E3)               bf16 output, channels laid out [e1|e3]
    spad_ref : (apron + H*W + apron, Csq) bf16 scratch: squeeze activation with
                                          a 16-row-aligned zero apron (3x3 halo)
    col_ref  : (H*W, 9*Csq)               bf16 im2col scratch (taps along lanes)
    """
    HW = H * W
    Csq = wsq_ref.shape[1]
    cdt = x_ref.dtype                    # MXU compute dtype (bf16)
    P0 = apron

    # ---- squeeze 1x1 + bias + ReLU (stays on-chip) --------------------------
    s = jnp.dot(x_ref[...], wsq_ref[...], preferred_element_type=jnp.float32)
    s = jnp.maximum(s + bsq_ref[...], 0.0).astype(cdt)

    # ---- padded squeeze activation in VMEM (zero apron = conv zero padding) -
    zero_apron = jnp.zeros((P0, Csq), cdt)
    spad_ref[0:P0, :] = zero_apron
    spad_ref[P0 + HW:P0 + HW + P0, :] = zero_apron
    spad_ref[P0:P0 + HW, :] = s

    # ---- horizontal wrap masks (flattened row shift) ------------------------
    pix = jax.lax.broadcasted_iota(jnp.int32, (HW, Csq), 0)
    w_idx = (pix & (W - 1)) if (W & (W - 1)) == 0 else (pix % W)
    left_ok = w_idx >= 1          # tap reads pixel (h+di, w-1)
    right_ok = w_idx <= W - 2     # tap reads pixel (h+di, w+1)
    zero_tap = jnp.zeros((HW, Csq), cdt)

    # ---- im2col: pack the 9 shifted taps along lanes ------------------------
    col_ref[:, 4 * Csq:5 * Csq] = s                 # center tap: no shift/mask
    for ki in range(3):
        for kj in range(3):
            t = 3 * ki + kj
            if t == 4:
                continue
            di, dj = ki - 1, kj - 1
            shift = di * W + dj
            tap = spad_ref[P0 + shift:P0 + shift + HW, :]
            if dj == -1:
                tap = jnp.where(left_ok, tap, zero_tap)
            elif dj == 1:
                tap = jnp.where(right_ok, tap, zero_tap)
            col_ref[:, t * Csq:(t + 1) * Csq] = tap

    # ---- one MXU dot: (HW, 9*Csq) @ (9*Csq, E1+E3) + bias + ReLU ------------
    out = jnp.dot(col_ref[...], wall_ref[...],
                  preferred_element_type=jnp.float32)
    out = jnp.maximum(out + ball_ref[...], 0.0)
    o_ref[...] = out.astype(o_ref.dtype)            # ONE full-width store


# ----------------------------------------------------------------------------
# Parameter prep + wrappers
# ----------------------------------------------------------------------------
def prepare_fire_params(params, compute_dtype=jnp.bfloat16):
    """One-time prep: fold the 'flip' negation into weights/biases, merge the
    expand1x1 weights into the 3x3 center tap of one im2col weight matrix."""
    wsq, bsq = params["squeeze"]          # (Cin, Csq), (Csq,)
    we1, be1 = params["expand1x1"]        # (Csq, E1), (E1,)
    we3, be3 = params["expand3x3"]        # (3, 3, Csq, E3) HWIO, (E3,)
    Csq, E1 = we1.shape
    E3 = we3.shape[-1]
    wall = jnp.zeros((9 * Csq, E1 + E3), jnp.float32)
    wall = wall.at[:, E1:].set((-we3).reshape(9 * Csq, E3))      # all 9 taps
    wall = wall.at[4 * Csq:5 * Csq, :E1].set(-we1)               # center tap
    ball = jnp.concatenate([-be1, -be3]).reshape(1, E1 + E3)
    return {
        "wsq": (-wsq).astype(compute_dtype),
        "bsq": (-bsq).reshape(1, -1).astype(jnp.float32),
        "wall": wall.astype(compute_dtype),
        "ball": ball.astype(jnp.float32),
    }


@functools.partial(jax.jit, static_argnames=("out_dtype",))
def fire_invert_forward_nhwc(x_nhwc, kparams, *, out_dtype=jnp.bfloat16):
    """Fire_invert.forward (flip=True): NHWC in -> NHWC out (kernel-native)."""
    N, H, W, Cin = x_nhwc.shape
    HW = H * W
    cdt = kparams["wsq"].dtype
    Csq = kparams["wsq"].shape[1]
    K = kparams["wall"].shape[0]                    # 9 * Csq
    Cout = kparams["wall"].shape[1]                 # E1 + E3
    apron = _round_up(W + 1, 16)                    # sublane-aligned conv halo

    x = x_nhwc.reshape(N, HW, Cin).astype(cdt)

    lane = lambda c: _round_up(c, 128)
    out_bytes = jnp.dtype(out_dtype).itemsize
    vmem_est = (2 * HW * lane(Cin) * 2              # x block (double-buffered)
                + 2 * HW * lane(Cout) * out_bytes   # output block
                + 2 * (Cin * lane(Csq) + K * lane(Cout) + 2 * lane(Cout)) * 4
                + (2 * apron + HW) * lane(Csq) * 2  # spad scratch
                + HW * lane(K) * 2)                 # im2col scratch
    vmem_limit = int(min(64 * 1024 * 1024,
                         max(32 * 1024 * 1024, 2 * vmem_est)))

    cost = pl.CostEstimate(
        flops=2 * N * HW * (Cin * Csq + K * Cout),
        transcendentals=0,
        bytes_accessed=(N * HW * Cin * 2 + (Cin * Csq + K * Cout) * 2
                        + N * HW * Cout * out_bytes))

    out = pl.pallas_call(
        functools.partial(_fire_invert_kernel, H=H, W=W, apron=apron),
        out_shape=jax.ShapeDtypeStruct((N, HW, Cout), out_dtype),
        grid=(N,),
        in_specs=[
            pl.BlockSpec((None, HW, Cin), lambda n: (n, 0, 0)),
            pl.BlockSpec((Cin, Csq), lambda n: (0, 0)),
            pl.BlockSpec((1, Csq), lambda n: (0, 0)),
            pl.BlockSpec((K, Cout), lambda n: (0, 0)),
            pl.BlockSpec((1, Cout), lambda n: (0, 0)),
        ],
        out_specs=pl.BlockSpec((None, HW, Cout), lambda n: (n, 0, 0)),
        scratch_shapes=[
            pltpu.VMEM((2 * apron + HW, Csq), cdt),     # padded squeeze act
            pltpu.VMEM((HW, K), cdt),                   # im2col buffer
        ],
        compiler_params=pltpu.CompilerParams(
            dimension_semantics=("parallel",),
            vmem_limit_bytes=vmem_limit),
        cost_estimate=cost,
    )(x, kparams["wsq"], kparams["bsq"], kparams["wall"], kparams["ball"])

    # TODO(synk): for N == 1 on v7x (2 TensorCores) add a second "parallel"
    # grid axis (row blocks sharing the halo), and for tiny images on
    # v5e/v6e fold several batch images into one grid step to amortize the
    # ~0.35us/step pipeline overhead.
    return out.reshape(N, H, W, Cout)


@functools.partial(jax.jit, static_argnames=("out_dtype",))
def fire_invert_forward(x_nchw, kparams, *, out_dtype=jnp.bfloat16):
    """NCHW-in / NCHW-out wrapper matching the PyTorch module's layout.
    Prefer fire_invert_forward_nhwc when chaining layers (no HBM transposes)."""
    y = fire_invert_forward_nhwc(jnp.transpose(x_nchw, (0, 2, 3, 1)),
                                 kparams, out_dtype=out_dtype)
    return jnp.transpose(y, (0, 3, 1, 2))


# ----------------------------------------------------------------------------
# Synthetic parameters + pure-JAX reference (for correctness checking)
# ----------------------------------------------------------------------------
def init_fire_params(key, inplanes, squeeze_planes, expand1x1_planes,
                     expand3x3_planes):
    ks = jax.random.split(key, 6)
    wsq = jax.random.normal(ks[0], (inplanes, squeeze_planes),
                            jnp.float32) * inplanes ** -0.5
    bsq = 0.05 * jax.random.normal(ks[1], (squeeze_planes,), jnp.float32)
    we1 = (jax.random.normal(ks[2], (squeeze_planes, expand1x1_planes),
                             jnp.float32) * squeeze_planes ** -0.5)
    be1 = 0.05 * jax.random.normal(ks[3], (expand1x1_planes,), jnp.float32)
    we3 = (jax.random.normal(ks[4], (3, 3, squeeze_planes, expand3x3_planes),
                             jnp.float32) * (9 * squeeze_planes) ** -0.5)
    be3 = 0.05 * jax.random.normal(ks[5], (expand3x3_planes,), jnp.float32)
    return {"squeeze": (wsq, bsq), "expand1x1": (we1, be1),
            "expand3x3": (we3, be3)}


def fire_invert_reference(x_nchw, params):
    """Pure-JAX f32 reference matching PyTorch Fire_invert.forward (flip=True)."""
    hi = jax.lax.Precision.HIGHEST
    x = jnp.transpose(x_nchw, (0, 2, 3, 1)).astype(jnp.float32)   # NHWC
    wsq, bsq = params["squeeze"]
    we1, be1 = params["expand1x1"]
    we3, be3 = params["expand3x3"]
    s = jax.nn.relu(-(jnp.einsum("nhwc,cd->nhwd", x, wsq, precision=hi) + bsq))
    e1 = jax.nn.relu(-(jnp.einsum("nhwc,cd->nhwd", s, we1, precision=hi) + be1))
    c3 = jax.lax.conv_general_dilated(
        s, we3, window_strides=(1, 1), padding=((1, 1), (1, 1)),
        dimension_numbers=("NHWC", "HWIO", "NHWC"), precision=hi)
    e3 = jax.nn.relu(-(c3 + be3))
    out = jnp.concatenate([e1, e3], axis=-1)
    return jnp.transpose(out, (0, 3, 1, 2))


if __name__ == "__main__":
    key = jax.random.PRNGKey(0)

    # (N, Cin, H, W, Csq, E1, E3) -- small configs consistent with SqueezeNet Fires.
    configs = [
        (2, 64, 16, 16, 16, 64, 64),      # Fire(64, 16, 64, 64)
        (2, 128, 8, 8, 32, 128, 128),     # Fire(128, 32, 128, 128)
    ]
    for (N, Cin, H, W, Csq, E1, E3) in configs:
        key, kx, kp = jax.random.split(key, 3)
        x = jax.random.normal(kx, (N, Cin, H, W), jnp.float32)
        params = init_fire_params(kp, Cin, Csq, E1, E3)
        kparams = prepare_fire_params(params, compute_dtype=jnp.bfloat16)

        out = jax.block_until_ready(fire_invert_forward(x, kparams))
        assert out.shape == (N, E1 + E3, H, W), out.shape

        out32 = out.astype(jnp.float32)
        assert bool(jnp.all(jnp.isfinite(out32)))
        assert bool(jnp.all(out32 >= 0.0))                     # ReLU outputs

        ref = fire_invert_reference(x, params)
        max_err = float(jnp.max(jnp.abs(out32 - ref)))
        mean_err = float(jnp.mean(jnp.abs(out32 - ref)))
        assert max_err < 1e-1, max_err     # bf16 matmuls + bf16 out, f32 accum
        assert mean_err < 2e-2, mean_err

    print("KERNEL_OK")
</pallas_src>

<mosaic_0001>
module attributes {stable_mosaic.version = 11 : i64} {
  func.func @_fire_invert_kernel(%arg0: i32, %arg1: memref<1x256x64xbf16, #tpu.memory_space<vmem>>, %arg2: memref<64x16xbf16, #tpu.memory_space<vmem>>, %arg3: memref<1x16xf32, #tpu.memory_space<vmem>>, %arg4: memref<144x128xbf16, #tpu.memory_space<vmem>>, %arg5: memref<1x128xf32, #tpu.memory_space<vmem>>, %arg6: memref<1x256x128xbf16, #tpu.memory_space<vmem>>, %arg7: memref<320x16xbf16, #tpu.memory_space<vmem>>, %arg8: memref<256x144xbf16, #tpu.memory_space<vmem>>) attributes {dimension_semantics = [#tpu.dimension_semantics<parallel>], iteration_bounds = array<i64: 2>, scalar_prefetch = 0 : i64, scratch_operands = 2 : i64, tpu.core_type = #tpu.core_type<tc>, window_params = [{transform_indices = @transform_0, window_bounds = array<i64: 1, 256, 64>}, {pipeline_mode = #tpu.pipeline_mode<synchronous>, transform_indices = @transform_1, window_bounds = array<i64: 64, 16>}, {pipeline_mode = #tpu.pipeline_mode<synchronous>, transform_indices = @transform_2, window_bounds = array<i64: 1, 16>}, {pipeline_mode = #tpu.pipeline_mode<synchronous>, transform_indices = @transform_3, window_bounds = array<i64: 144, 128>}, {pipeline_mode = #tpu.pipeline_mode<synchronous>, transform_indices = @transform_4, window_bounds = array<i64: 1, 128>}, {transform_indices = @transform_5, window_bounds = array<i64: 1, 256, 128>}]} {
    %c0 = arith.constant 0 : index
    %c0_0 = arith.constant 0 : index
    %c0_1 = arith.constant 0 : index
    %0 = vector.load %arg1[%c0, %c0_0, %c0_1] : memref<1x256x64xbf16, #tpu.memory_space<vmem>>, vector<1x256x64xbf16>
    %1 = vector.shape_cast %0 : vector<1x256x64xbf16> to vector<256x64xbf16>
    %c0_2 = arith.constant 0 : index
    %c0_3 = arith.constant 0 : index
    %2 = vector.load %arg2[%c0_2, %c0_3] : memref<64x16xbf16, #tpu.memory_space<vmem>>, vector<64x16xbf16>
    %cst = arith.constant dense<0.000000e+00> : vector<256x16xf32>
    %3 = tpu.matmul %1, %2, %cst {dimension_numbers = #tpu.dot_dimension_numbers<[1], [0], [0], [1], [0, 0, 1, 1], [], []>} : vector<256x64xbf16>, vector<64x16xbf16>, vector<256x16xf32> -> vector<256x16xf32>
    %c0_4 = arith.constant 0 : index
    %c0_5 = arith.constant 0 : index
    %4 = vector.load %arg3[%c0_4, %c0_5] : memref<1x16xf32, #tpu.memory_space<vmem>>, vector<1x16xf32>
    %5 = vector.broadcast %4 : vector<1x16xf32> to vector<256x16xf32>
    %6 = arith.addf %3, %5 : vector<256x16xf32>
    %cst_6 = arith.constant 0.000000e+00 : f32
    %7 = vector.broadcast %cst_6 : f32 to vector<256x16xf32>
    %8 = arith.maximumf %6, %7 : vector<256x16xf32>
    %9 = arith.truncf %8 : vector<256x16xf32> to vector<256x16xbf16>
    %cst_7 = arith.constant 0.000000e+00 : bf16
    %10 = vector.broadcast %cst_7 : bf16 to vector<32x16xbf16>
    %c0_8 = arith.constant 0 : index
    %c0_9 = arith.constant 0 : index
    %11 = vector.load %arg7[%c0_8, %c0_9] : memref<320x16xbf16, #tpu.memory_space<vmem>>, vector<32x16xbf16>
    tpu.vector_store %arg7[%c0_8, %c0_9], %10 {strides = array<i32>} : memref<320x16xbf16, #tpu.memory_space<vmem>>, vector<32x16xbf16>,
    %c288 = arith.constant 288 : index
    %c0_10 = arith.constant 0 : index
    %12 = vector.load %arg7[%c288, %c0_10] : memref<320x16xbf16, #tpu.memory_space<vmem>>, vector<32x16xbf16>
    tpu.vector_store %arg7[%c288, %c0_10], %10 {strides = array<i32>} : memref<320x16xbf16, #tpu.memory_space<vmem>>, vector<32x16xbf16>,
    %c32 = arith.constant 32 : index
    %c0_11 = arith.constant 0 : index
    %13 = vector.load %arg7[%c32, %c0_11] : memref<320x16xbf16, #tpu.memory_space<vmem>>, vector<256x16xbf16>
    tpu.vector_store %arg7[%c32, %c0_11], %9 {strides = array<i32>} : memref<320x16xbf16, #tpu.memory_space<vmem>>, vector<256x16xbf16>,
    %14 = tpu.iota {dimensions = array<i32: 0>} : vector<256x16xi32>
    %c15_i32 = arith.constant 15 : i32
    %15 = vector.broadcast %c15_i32 : i32 to vector<256x16xi32>
    %16 = arith.andi %14, %15 : vector<256x16xi32>
    %c1_i32 = arith.constant 1 : i32
    %17 = vector.broadcast %c1_i32 : i32 to vector<256x16xi32>
    %18 = arith.cmpi sge, %16, %17 : vector<256x16xi32>
    %c14_i32 = arith.constant 14 : i32
    %19 = vector.broadcast %c14_i32 : i32 to vector<256x16xi32>
    %20 = arith.cmpi sle, %16, %19 : vector<256x16xi32>
    %cst_12 = arith.constant 0.000000e+00 : bf16
    %21 = vector.broadcast %cst_12 : bf16 to vector<256x16xbf16>
    %c0_13 = arith.constant 0 : index
    %c64 = arith.constant 64 : index
    %22 = vector.load %arg8[%c0_13, %c64] : memref<256x144xbf16, #tpu.memory_space<vmem>>, vector<256x16xbf16>
    tpu.vector_store %arg8[%c0_13, %c64], %9 {strides = array<i32>} : memref<256x144xbf16, #tpu.memory_space<vmem>>, vector<256x16xbf16>,
    %c15 = arith.constant 15 : index
    %c0_14 = arith.constant 0 : index
    %23 = vector.load %arg7[%c15, %c0_14] : memref<320x16xbf16, #tpu.memory_space<vmem>>, vector<256x16xbf16>
    %24 = arith.select %18, %23, %21 : vector<256x16xi1>, vector<256x16xbf16>
    %c0_15 = arith.constant 0 : index
    %c0_16 = arith.constant 0 : index
    %25 = vector.load %arg8[%c0_15, %c0_16] : memref<256x144xbf16, #tpu.memory_space<vmem>>, vector<256x16xbf16>
    tpu.vector_store %arg8[%c0_15, %c0_16], %24 {strides = array<i32>} : memref<256x144xbf16, #tpu.memory_space<vmem>>, vector<256x16xbf16>,
    %c16 = arith.constant 16 : index
    %c0_17 = arith.constant 0 : index
    %26 = vector.load %arg7[%c16, %c0_17] : memref<320x16xbf16, #tpu.memory_space<vmem>>, vector<256x16xbf16>
    %c0_18 = arith.constant 0 : index
    %c16_19 = arith.constant 16 : index
    %27 = vector.load %arg8[%c0_18, %c16_19] : memref<256x144xbf16, #tpu.memory_space<vmem>>, vector<256x16xbf16>
    tpu.vector_store %arg8[%c0_18, %c16_19], %26 {strides = array<i32>} : memref<256x144xbf16, #tpu.memory_space<vmem>>, vector<256x16xbf16>,
    %c17 = arith.constant 17 : index
    %c0_20 = arith.constant 0 : index
    %28 = vector.load %arg7[%c17, %c0_20] : memref<320x16xbf16, #tpu.memory_space<vmem>>, vector<256x16xbf16>
    %29 = arith.select %20, %28, %21 : vector<256x16xi1>, vector<256x16xbf16>
    %c0_21 = arith.constant 0 : index
    %c32_22 = arith.constant 32 : index
    %30 = vector.load %arg8[%c0_21, %c32_22] : memref<256x144xbf16, #tpu.memory_space<vmem>>, vector<256x16xbf16>
    tpu.vector_store %arg8[%c0_21, %c32_22], %29 {strides = array<i32>} : memref<256x144xbf16, #tpu.memory_space<vmem>>, vector<256x16xbf16>,
    %c31 = arith.constant 31 : index
    %c0_23 = arith.constant 0 : index
    %31 = vector.load %arg7[%c31, %c0_23] : memref<320x16xbf16, #tpu.memory_space<vmem>>, vector<256x16xbf16>
    %32 = arith.select %18, %31, %21 : vector<256x16xi1>, vector<256x16xbf16>
    %c0_24 = arith.constant 0 : index
    %c48 = arith.constant 48 : index
    %33 = vector.load %arg8[%c0_24, %c48] : memref<256x144xbf16, #tpu.memory_space<vmem>>, vector<256x16xbf16>
    tpu.vector_store %arg8[%c0_24, %c48], %32 {strides = array<i32>} : memref<256x144xbf16, #tpu.memory_space<vmem>>, vector<256x16xbf16>,
    %c33 = arith.constant 33 : index
    %c0_25 = arith.constant 0 : index
    %34 = vector.load %arg7[%c33, %c0_25] : memref<320x16xbf16, #tpu.memory_space<vmem>>, vector<256x16xbf16>
    %35 = arith.select %20, %34, %21 : vector<256x16xi1>, vector<256x16xbf16>
    %c0_26 = arith.constant 0 : index
    %c80 = arith.constant 80 : index
    %36 = vector.load %arg8[%c0_26, %c80] : memref<256x144xbf16, #tpu.memory_space<vmem>>, vector<256x16xbf16>
    tpu.vector_store %arg8[%c0_26, %c80], %35 {strides = array<i32>} : memref<256x144xbf16, #tpu.memory_space<vmem>>, vector<256x16xbf16>,
    %c47 = arith.constant 47 : index
    %c0_27 = arith.constant 0 : index
    %37 = vector.load %arg7[%c47, %c0_27] : memref<320x16xbf16, #tpu.memory_space<vmem>>, vector<256x16xbf16>
    %38 = arith.select %18, %37, %21 : vector<256x16xi1>, vector<256x16xbf16>
    %c0_28 = arith.constant 0 : index
    %c96 = arith.constant 96 : index
    %39 = vector.load %arg8[%c0_28, %c96] : memref<256x144xbf16, #tpu.memory_space<vmem>>, vector<256x16xbf16>
    tpu.vector_store %arg8[%c0_28, %c96], %38 {strides = array<i32>} : memref<256x144xbf16, #tpu.memory_space<vmem>>, vector<256x16xbf16>,
    %c48_29 = arith.constant 48 : index
    %c0_30 = arith.constant 0 : index
    %40 = vector.load %arg7[%c48_29, %c0_30] : memref<320x16xbf16, #tpu.memory_space<vmem>>, vector<256x16xbf16>
    %c0_31 = arith.constant 0 : index
    %c112 = arith.constant 112 : index
    %41 = vector.load %arg8[%c0_31, %c112] : memref<256x144xbf16, #tpu.memory_space<vmem>>, vector<256x16xbf16>
    tpu.vector_store %arg8[%c0_31, %c112], %40 {strides = array<i32>} : memref<256x144xbf16, #tpu.memory_space<vmem>>, vector<256x16xbf16>,
    %c49 = arith.constant 49 : index
    %c0_32 = arith.constant 0 : index
    %42 = vector.load %arg7[%c49, %c0_32] : memref<320x16xbf16, #tpu.memory_space<vmem>>, vector<256x16xbf16>
    %43 = arith.select %20, %42, %21 : vector<256x16xi1>, vector<256x16xbf16>
    %c0_33 = arith.constant 0 : index
    %c128 = arith.constant 128 : index
    %44 = vector.load %arg8[%c0_33, %c128] : memref<256x144xbf16, #tpu.memory_space<vmem>>, vector<256x16xbf16>
    tpu.vector_store %arg8[%c0_33, %c128], %43 {strides = array<i32>} : memref<256x144xbf16, #tpu.memory_space<vmem>>, vector<256x16xbf16>,
    %c0_34 = arith.constant 0 : index
    %c0_35 = arith.constant 0 : index
    %45 = vector.load %arg8[%c0_34, %c0_35] : memref<256x144xbf16, #tpu.memory_space<vmem>>, vector<256x144xbf16>
    %c0_36 = arith.constant 0 : index
    %c0_37 = arith.constant 0 : index
    %46 = vector.load %arg4[%c0_36, %c0_37] : memref<144x128xbf16, #tpu.memory_space<vmem>>, vector<144x128xbf16>
    %cst_38 = arith.constant dense<0.000000e+00> : vector<256x128xf32>
    %47 = tpu.matmul %45, %46, %cst_38 {dimension_numbers = #tpu.dot_dimension_numbers<[1], [0], [0], [1], [0, 0, 1, 1], [], []>} : vector<256x144xbf16>, vector<144x128xbf16>, vector<256x128xf32> -> vector<256x128xf32>
    %c0_39 = arith.constant 0 : index
    %c0_40 = arith.constant 0 : index
    %48 = vector.load %arg5[%c0_39, %c0_40] : memref<1x128xf32, #tpu.memory_space<vmem>>, vector<1x128xf32>
    %49 = vector.broadcast %48 : vector<1x128xf32> to vector<256x128xf32>
    %50 = arith.addf %47, %49 : vector<256x128xf32>
    %cst_41 = arith.constant 0.000000e+00 : f32
    %51 = vector.broadcast %cst_41 : f32 to vector<256x128xf32>
    %52 = arith.maximumf %50, %51 : vector<256x128xf32>
    %53 = arith.truncf %52 : vector<256x128xf32> to vector<256x128xbf16>
    %c0_42 = arith.constant 0 : index
    %c0_43 = arith.constant 0 : index
    %c0_44 = arith.constant 0 : index
    %54 = vector.load %arg6[%c0_42, %c0_43, %c0_44] : memref<1x256x128xbf16, #tpu.memory_space<vmem>>, vector<1x256x128xbf16>
    %55 = vector.shape_cast %54 : vector<1x256x128xbf16> to vector<256x128xbf16>
    %56 = vector.shape_cast %53 : vector<256x128xbf16> to vector<1x256x128xbf16>
    tpu.vector_store %arg6[%c0_42, %c0_43, %c0_44], %56 {strides = array<i32>} : memref<1x256x128xbf16, #tpu.memory_space<vmem>>, vector<1x256x128xbf16>,
    return
  }
  func.func @transform_0(%arg0: i32) -> (i32, i32, i32) {
    %c0_i32 = arith.constant 0 : i32
    %c0_i32_0 = arith.constant 0 : i32
    %c0_i32_1 = arith.constant 0 : i32
    return %arg0, %c0_i32, %c0_i32_0 : i32, i32, i32
  }
  func.func @transform_1(%arg0: i32) -> (i32, i32) {
    %c0_i32 = arith.constant 0 : i32
    %c0_i32_0 = arith.constant 0 : i32
    %c0_i32_1 = arith.constant 0 : i32
    return %c0_i32, %c0_i32_0 : i32, i32
  }
  func.func @transform_2(%arg0: i32) -> (i32, i32) {
    %c0_i32 = arith.constant 0 : i32
    %c0_i32_0 = arith.constant 0 : i32
    %c0_i32_1 = arith.constant 0 : i32
    return %c0_i32, %c0_i32_0 : i32, i32
  }
  func.func @transform_3(%arg0: i32) -> (i32, i32) {
    %c0_i32 = arith.constant 0 : i32
    %c0_i32_0 = arith.constant 0 : i32
    %c0_i32_1 = arith.constant 0 : i32
    return %c0_i32, %c0_i32_0 : i32, i32
  }
  func.func @transform_4(%arg0: i32) -> (i32, i32) {
    %c0_i32 = arith.constant 0 : i32
    %c0_i32_0 = arith.constant 0 : i32
    %c0_i32_1 = arith.constant 0 : i32
    return %c0_i32, %c0_i32_0 : i32, i32
  }
  func.func @transform_5(%arg0: i32) -> (i32, i32, i32) {
    %c0_i32 = arith.constant 0 : i32
    %c0_i32_0 = arith.constant 0 : i32
    %c0_i32_1 = arith.constant 0 : i32
    return %arg0, %c0_i32, %c0_i32_0 : i32, i32, i32
  }
}

</mosaic_0001>

<bundles_post_ra>
// kernel: fire_invert_forward_nhwc.1
= control target key start
LH: loop header
LB: loop body
LE: loop exit
PB: predicated region body
PF: predicated region fallthrough
CT: control target
= control target key end

     0   :  { %10 = vsyncpa [#allocation5], 0  ;;  %s6379_s0 = inlined_call_operand.vmem [shape: bf16[2,256,64], index: 0, kind: input, shape index: {}]   ;;  %s6380_s1 = inlined_call_operand.vmem [shape: bf16[64,16], index: 1, kind: input, shape index: {}]   ;;  %s6381_s2 = inlined_call_operand.vmem [shape: f32[1,16], index: 2, kind: input, shape index: {}]   ;;  %s6382_s3 = inlined_call_operand.vmem [shape: bf16[144,128], index: 3, kind: input, shape index: {}]   ;;  %s6383_s4 = inlined_call_operand.vmem [shape: f32[1,128], index: 4, kind: input, shape index: {}]   ;;  %s6384_s5 = inlined_call_operand.hbm [shape: bf16[2,256,128], index: 5, kind: output, shape index: {}]  }
   0x1   :  { %12 = vsyncpa [#allocation5 + $0x1], 0  ;;  %s4013_s18 = smov 0   ;;  %s4015_s19 = smov 0  }
   0x2   :  { %s4017_s20 = smov 0   ;;  %s4019_s21 = smov 0  }
   0x3 LB: > { %s4034_s22 = sadd.s32 4294967295, %s3970_s21   ;;  %s3482_s23 = sadd.s32 4294967294, %s3970_s21   ;;  %s3970_s21 = sphi %s4019_s21, %s6615_s21   ;;  %s3966_s20 = sphi %s4017_s20, %s6614_s20   ;;  %s3962_s19 = sphi %s4015_s19, %s6613_s19   ;;  %s3958_s18 = sphi %s4013_s18, %s6612_s18  }
   0x4   : > { %s4038_s24 = sadd.s32 1, %s3970_s21   ;;  %s135_s25 = sadd.s32 1, %s3966_s20 }
   0x5   : > { %s132_s26 = ssub.s32 %s3970_s21, %s4038_s24  ;;  %p145_p0 = scmp.ne.s32.totalorder %s3966_s20, %s3962_s19 }
   0x6   : > { %p133_p1 = scmp.eq.s32.totalorder %s132_s26, 0  ;;  %p146_p2 = scmp.eq.s32.totalorder %s4034_s22, 1 }
   0x7   : > { %p151_p3 = scmp.ne.s32.totalorder %s3962_s19, %s3958_s18  ;;  %p152_p4 = scmp.eq.s32.totalorder %s3482_s23, 1 }
   0x8   : > { %s4049_s27 = scalar_select %p133_p1, %s3966_s20, %s135_s25  }
   0x9   : > { %p4051_p5 = por %p146_p2, %p145_p0  ;;  %p4055_p6 = por %p152_p4, %p151_p3 }
   0xa   : > { %p3485_p7 = scmp.ge.s32.totalorder %s3970_s21, 1  ;;  %p190_p8 = scmp.lt.s32.totalorder %s3970_s21, 3 }
   0xc   : > { %p191_p9 = pnand %p3485_p7, %p190_p8 }
   0xe   : > { %194 = sbr.rel (%p191_p9) target bundleno = 865 (0x361), region = 40 }
  0x15   : > { %v3877_v0 = vld [vmem:[%s6380_s1] sm:$0xff]   ;;  %p218_p10 = scmp.lt.s32.totalorder %s4034_s22, 1  ;;  %v3878_v1 = vld [vmem:[%s6380_s1 + $0x8] sm:$0xff]   ;;  %vm377_vm0 = vcmask 523264   ;;  %v3879_v2 = vld [vmem:[%s6380_s1 + $0x10] sm:$0xff]   ;;  %vm635_vm1 = vcmask 130048   ;;  %v656_v22 = vlaneseq }
  0x16   : > { %3770 = vmatprep.subr.bf16.mxu0 %v3877_v0  ;;  %v3880_v4 = vld [vmem:[%s6380_s1 + $0x18] sm:$0xff]   ;;  %v6391_v20 = vmov 0   ;;  %s3973_s23 = smov 16   ;;  %vm3974_vm3 = vmmov 1   ;;  %s3975_s30 = smov 64  }
  0x17   : > { %s219_s9 = scalar_select %p218_p10, %s4034_s22, 1  ;;  %3771 = vmatpush3.bf16.msra.mxu0 %v3877_v0  ;;  %637 = vst.msk [vmem:[#allocation2 + $0x8] sm:$0xff] %vm635_vm1, %v6391_v20  ;;  %636 = vst.msk [vmem:[#allocation2] sm:$0xff] %vm635_vm1, %v6391_v20  ;;  %3810 = vmatprep.subr.bf16.mxu1 %v6391_v20  ;;  %v4123_v23 = vshrl.u32 %v656_v22, 7 }
  0x18   : > { %3772 = vmatprep.subr.bf16.mxu0 %v3878_v1  ;;  %638 = vst.msk [vmem:[#allocation2 + $0x90] sm:$0xff] %vm635_vm1, %v6391_v20  ;;  %639 = vst.msk [vmem:[#allocation2 + $0x98] sm:$0xff] %vm635_vm1, %v6391_v20  ;;  %s3976_s6 = smov 112   ;;  %s3978_s25 = smov 48  }
  0x19   : > { %s3621_s12 = sshll.u32 %s219_s9, 7  ;;  %6443 = vst [vmem:[#allocation7_spill] sm:$0xff] %v4123_v23  ;;  %v658_v24 = vadd.s32 8, %v4123_v23  ;;  %v660_v26 = vadd.s32 24, %v4123_v23  ;;  %vm884_vm4 = vmpackc.low %vm3974_vm3, %vm3974_vm3  ;;  %v689_v30 = vand.u32 15, %v4123_v23  ;;  %v659_v32 = vadd.s32 16, %v4123_v23 }
  0x1a   : > { %s4075_s15 = scalar_lea.vmem %s6379_s0, %s3621_s12  ;;  %v4128_v28 = vsel %vm884_vm4, 65537, %v6391_v20  ;;  %v665_v33 = vadd.s32 64, %v4123_v23  ;;  %v667_v34 = vadd.s32 80, %v4123_v23  ;;  %v661_v44 = vadd.s32 32, %v4123_v23  ;;  %s3979_s8 = smov 96  }
  0x1b   : > { %v3881_v3 = vld [vmem:[%s4075_s15] sm:$0xff]   ;;  %3773 = vmatpush3.bf16.msra.mxu0 %v3878_v1  ;;  %v3882_v5 = vld [vmem:[%s4075_s15 + $0x8] sm:$0xff]   ;;  %v3883_v6 = vld [vmem:[%s4075_s15 + $0x10] sm:$0xff]   ;;  %v690_v25 = vand.u32 15, %v658_v24  ;;  %v692_v27 = vand.u32 15, %v660_v26  ;;  %vm721_vm7 = vcmp.ge.s32.totalorder %v689_v30, 1 }
  0x1c   : > { %3774 = vmatprep.subr.bf16.mxu0 %v3879_v2  ;;  %3778 = vmatprep.mubr.msk.bf16.mxu0 %vm377_vm0, %v3881_v3  ;;  %v3884_v7 = vld [vmem:[%s4075_s15 + $0x18] sm:$0xff]   ;;  %v3885_v8 = vld [vmem:[%s4075_s15 + $0x20] sm:$0xff]   ;;  %v3886_v9 = vld [vmem:[%s4075_s15 + $0x28] sm:$0xff]   ;;  %v691_v36 = vand.u32 15, %v659_v32  ;;  %v697_v37 = vand.u32 15, %v665_v33  ;;  %v699_v39 = vand.u32 15, %v667_v34 }
  0x1d   : > { %v3887_v10 = vld [vmem:[%s4075_s15 + $0x30] sm:$0xff]   ;;  %v3888_v11 = vld [vmem:[%s4075_s15 + $0x38] sm:$0xff]   ;;  %v3889_v12 = vld [vmem:[%s4075_s15 + $0x40] sm:$0xff]   ;;  %vm754_vm2 = vcmp.le.s32.totalorder %v690_v25, 14  ;;  %vm756_vm6 = vcmp.le.s32.totalorder %v692_v27, 14  ;;  %v668_v50 = vadd.s32 88, %v4123_v23 }
  0x1e   : > { %v3890_v13 = vld [vmem:[%s4075_s15 + $0x48] sm:$0xff]   ;;  %v3891_v14 = vld [vmem:[%s4075_s15 + $0x50] sm:$0xff]   ;;  %v3892_v15 = vld [vmem:[%s4075_s15 + $0x58] sm:$0xff]   ;;  %vm4140_vm10 = vcmp.ge.s32.totalorder %v691_v36, 1  ;;  %vm4146_vm11 = vcmp.ge.s32.totalorder %v697_v37, 1  ;;  %vm4150_vm12 = vcmp.ge.s32.totalorder %v699_v39, 1 }
  0x1f   : > { %3775 = vmatpush3.bf16.msra.mxu0 %v3879_v2  ;;  %v3893_v16 = vld [vmem:[%s4075_s15 + $0x60] sm:$0xff]   ;;  %v3894_v17 = vld [vmem:[%s4075_s15 + $0x68] sm:$0xff]   ;;  %v3895_v18 = vld [vmem:[%s4075_s15 + $0x70] sm:$0xff]   ;;  %v669_v51 = vadd.s32 96, %v4123_v23  ;;  %v693_v52 = vand.u32 15, %v661_v44  ;;  %v670_v54 = vadd.s32 104, %v4123_v23 }
  0x20   : > { %3776 = vmatprep.subr.bf16.mxu0 %v3880_v4  ;;  %v3896_v19 = vld [vmem:[%s4075_s15 + $0x78] sm:$0xff]   ;;  %v1322_v21 = vld [vmem:[#allocation2 + $0x8] sm:$0xff]  ;;  %vm1437_vm5 = vmpackc.low %vm754_vm2, %vm754_vm2  ;;  %v662_v57 = vadd.s32 40, %v4123_v23  ;;  %v700_v59 = vand.u32 15, %v668_v50  ;;  %v672_v60 = vadd.s32 120, %v4123_v23  ;;  %v666_v63 = vadd.s32 72, %v4123_v23 }
  0x21   : > { %1354 = vrot.lane.b32.xlu0 %v1322_v21, %s3973_s23  ;;  %v1469_v29 = vsel %vm1437_vm5, 65537, %v6391_v20  ;;  %vm1439_vm8 = vmpackc.low %vm756_vm6, %vm756_vm6  ;;  %v701_v61 = vand.u32 15, %v669_v51  ;;  %vm4177_vm2 = vcmp.ge.s32.totalorder %v693_v52, 1  ;;  %v671_v27 = vadd.s32 112, %v4123_v23  ;;  %s3977_s15 = smov 32   ;;  %s3980_s16 = smov 80  }
  0x22   : > { %v3542_v31 = vcombine.low %v4128_v28, %v1469_v29  ;;  %vm883_vm9 = vmpackc.low %vm721_vm7, %vm721_vm7  ;;  %v1471_v38 = vsel %vm1439_vm8, 65537, %v6391_v20  ;;  %vm4196_vm3 = vcmp.le.s32.totalorder %v700_v59, 14  ;;  %v675_v25 = vadd.s32 144, %v4123_v23  ;;  %s3654_s26 = sshll.u32 %s4034_s22, 11  ;;  %s3981_s22 = smov [#allocation4]  }
  0x23   : > { %3777 = vmatpush3.bf16.msra.mxu0 %v3880_v4  ;;  %v915_v42 = vsel %vm883_vm9, 65537, %v6391_v20  ;;  %v3543_v45 = vcombine.low %v4128_v28, %v1471_v38  ;;  %vm885_vm13 = vmpackc.low %vm4140_vm10, %vm4140_vm10  ;;  %v702_v4 = vand.u32 15, %v670_v54  ;;  %vm4200_vm4 = vcmp.ge.s32.totalorder %v701_v61, 1  ;;  %s6329_s10 = scalar_lea.hbm %s6384_s5, %s3654_s26  ;;  %s3912_s13 = sshll.u32 %s3981_s22, 4  ;;  %s3913_s13 = int_to_ptr.vmem [resolvable:$false] %s3912_s13 }
  0x24   : > { %3053 = vmatprep.subr.bf16.mxu0 %v6391_v20  ;;  %v1549_v35 = vshrl.u32 %v3542_v31, 16  ;;  %v1552_v41 = vshll.u32 %v3542_v31, 16  ;;  %v3526_v48 = vcombine.low %v915_v42, %v4128_v28  ;;  %vm891_vm14 = vmpackc.low %vm4146_vm11, %vm4146_vm11  ;;  %v917_v55 = vsel %vm885_vm13, 65537, %v6391_v20  ;;  %v1906_v42 = vld [vmem:[#allocation2 + $0x8] sm:$0x80]  ;;  %s3914_s14 = scalar_lea.vmem %s3913_s13, 4096 }
  0x25   : > { %v1556_v53 = vshrl.u32 %v3543_v45, 16  ;;  %vm893_vm15 = vmpackc.low %vm4150_vm12, %vm4150_vm12  ;;  %v923_v58 = vsel %vm891_vm14, 65537, %v6391_v20  ;;  %v1559_v2 = vshll.u32 %v3543_v45, 16  ;;  %v4184_v3 = vcombine.low %v917_v55, %v4128_v28 }
  0x26   : > { %3779 = vmatmul.mubr.msk.bf16.vlgmr.msra.gmra.mrb[0].mxu0 %vm377_vm0, %v3882_v5  ;;  %v4137_v40 = vrot.slane %v1549_v35, 7  ;;  %v997_v56 = vshll.u32 %v3526_v48, 16  ;;  %v925_v62 = vsel %vm893_vm15, 65537, %v6391_v20  ;;  %vm4205_vm5 = vcmp.le.s32.totalorder %v702_v4, 14  ;;  %vm887_vm6 = vmpackc.low %vm4177_vm2, %vm4177_vm2 }
  0x27   : > { %3782 = vmatprep.mubr.msk.bf16.mxu0 %vm377_vm0, %v3883_v6  ;;  %v4181_v1 = vrot.slane %v1556_v53, 7  ;;  %v4189_v6 = vcombine.low %v923_v58, %v4128_v28  ;;  %vm1447_vm7 = vmpackc.low %vm4196_vm3, %vm4196_vm3  ;;  %vm1157_vm9 = vsmask.f32 256  ;;  %vm995_vm12 = vsmask.f32 7424 }
  0x28   : > { %v4156_v49 = vor.u32 %v1552_v41, %v4137_v40  ;;  %vm895_vm10 = vmpackc.low %vm4200_vm4, %vm4200_vm4  ;;  %v1479_v32 = vsel %vm1447_vm7, 65537, %v6391_v20  ;;  %v919_v39 = vsel %vm887_vm6, 65537, %v6391_v20  ;;  %v703_v43 = vand.u32 15, %v671_v27 }
  0x29   : > { %vm1449_vm14 = vmpackc.low %vm4205_vm5, %vm4205_vm5  ;;  %v927_v34 = vsel %vm895_vm10, 65537, %v6391_v20  ;;  %v1032_v36 = vshrl.u32 %v4189_v6, 16  ;;  %v3547_v41 = vcombine.low %v4128_v28, %v1479_v32  ;;  %v4283_v51 = vcombine.low %v919_v39, %v4128_v28 }
  0x2a   : > { %v4277_v46 = vcombine.low %v927_v34, %v4128_v28  ;;  %v1008_v52 = vshrl.u32 %v4184_v3, 16  ;;  %v673_v53 = vadd.s32 128, %v4123_v23  ;;  %vm4293_vm2 = vcmp.ge.s32.totalorder %v703_v43, 1 }
  0x2b   : > { %v1588_v58 = vshrl.u32 %v3547_v41, 16  ;;  %v674_v61 = vadd.s32 136, %v4123_v23  ;;  %vm897_vm5 = vmpackc.low %vm4293_vm2, %vm4293_vm2 }
  0x2e   : > { %3783 = vmatmul.mubr.msk.bf16.gmra.mrb[4].mxu0 %vm377_vm0, %v3884_v7  ;;  %v1000_v7 = vshrl.u32 %v3526_v48, 16  ;;  %v664_v48 = vadd.s32 56, %v4123_v23 }
  0x2f   : > { %3786 = vmatprep.mubr.msk.bf16.mxu0 %vm377_vm0, %v3885_v8  ;;  %v694_v8 = vand.u32 15, %v662_v57  ;;  %v663_v57 = vadd.s32 48, %v4123_v23 }
  0x31   : > { %vm4217_vm8 = vcmp.le.s32.totalorder %v694_v8, 14  ;;  %v1012_v8 = vshll.u32 %v4283_v51, 16 }
  0x32   : > { %vm1441_vm15 = vmpackc.low %vm4217_vm8, %vm4217_vm8 }
  0x33   : > { %v1473_v44 = vsel %vm1441_vm15, 65537, %v6391_v20 }
  0x36   : > { %3787 = vmatmul.mubr.msk.bf16.gmra.mrb[8].mxu0 %vm377_vm0, %v3886_v9  ;;  %v4192_v9 = vcombine.low %v925_v62, %v4128_v28 }
  0x37   : > { %3790 = vmatprep.mubr.msk.bf16.mxu0 %vm377_vm0, %v3887_v10  ;;  %v4194_v10 = vrot.slane %v997_v56, 1  ;;  %v3544_v56 = vcombine.low %v4128_v28, %v1473_v44  ;;  %v4346_v44 = vrot.slane %v1012_v8, 1 }
  0x38   : > { %v1036_v22 = vshll.u32 %v4192_v9, 16 }
  0x39   : > { %6452 = vst [vmem:[#allocation8_spill] sm:$0xff] %v4194_v10  ;;  %v1002_v24 = vor.u32 %v1000_v7, %v4194_v10  ;;  %vm6409_vm4 = vcmp.ne.s16.totalorder %v4194_v10, 0 }
  0x3a   : > { %v1038_v37 = vrot.slane %v1036_v22, 1  ;;  %v1923_v55 = vsel %vm6409_vm4, %v1906_v42, 0 }
  0x3e   : > { %3791 = vmatmul.mubr.msk.bf16.gmra.mrb[12].mxu0 %vm377_vm0, %v3888_v11  ;;  %v1564_v11 = vshrl.u32 %v3544_v56, 16 }
  0x3f   : > { %3794 = vmatprep.mubr.msk.bf16.mxu0 %vm377_vm0, %v3889_v12  ;;  %v704_v12 = vand.u32 15, %v672_v60 }
  0x40   : > { %v4320_v27 = vrot.slane %v1564_v11, 7 }
  0x41   : > { %vm4226_vm11 = vcmp.le.s32.totalorder %v704_v12, 14  ;;  %v695_v12 = vand.u32 15, %v663_v57 }
  0x42   : > { %vm1451_vm3 = vmpackc.low %vm4226_vm11, %vm4226_vm11 }
  0x43   : > { %v1483_v47 = vsel %vm1451_vm3, 65537, %v6391_v20  ;;  %vm4322_vm10 = vcmp.ge.s32.totalorder %v695_v12, 1  ;;  %v677_v12 = vadd.s32 160, %v4123_v23 }
  0x44   : > { %v3549_v59 = vcombine.low %v4128_v28, %v1483_v47  ;;  %vm889_vm15 = vmpackc.low %vm4322_vm10, %vm4322_vm10 }
  0x46   : > { %3795 = vmatmul.mubr.msk.bf16.gmra.mrb[16].mxu0 %vm377_vm0, %v3890_v13  ;;  %v1590_v13 = vrot.slane %v1588_v58, 7  ;;  %v1607_v34 = vshll.u32 %v3549_v59, 16  ;;  %v1048_v58 = vshrl.u32 %v4277_v46, 16 }
  0x47   : > { %3798 = vmatprep.mubr.msk.bf16.mxu0 %vm377_vm0, %v3891_v14  ;;  %v698_v14 = vand.u32 15, %v666_v63  ;;  %v1040_v63 = vshrl.u32 %v4192_v9, 16  ;;  %v1591_v9 = vshll.u32 %v3547_v41, 16 }
  0x49   : > { %vm4230_vm13 = vcmp.le.s32.totalorder %v698_v14, 14  ;;  %v1604_v14 = vshrl.u32 %v3549_v59, 16 }
  0x4a   : > { %vm1445_vm7 = vmpackc.low %vm4230_vm13, %vm4230_vm13 }
  0x4b   : > { %v1477_v50 = vsel %vm1445_vm7, 65537, %v6391_v20  ;;  %v4326_v32 = vrot.slane %v1604_v14, 7 }
  0x4c   : > { %v4301_v0 = vcombine.low %v4128_v28, %v1477_v50 }
  0x4d   : > { %v1609_v57 = vor.u32 %v1607_v34, %v4326_v32 }
  0x4e   : > { %3799 = vmatmul.mubr.msk.bf16.gmra.mrb[20].mxu0 %vm377_vm0, %v3892_v15 }
  0x4f   : > { %3802 = vmatprep.mubr.msk.bf16.mxu0 %vm377_vm0, %v3893_v16  ;;  %v1004_v16 = vshll.u32 %v4184_v3, 16  ;;  %v1044_v3 = vshll.u32 %v4277_v46, 16  ;;  %v921_v46 = vsel %vm889_vm15, 65537, %v6391_v20 }
  0x51   : > { %v1006_v31 = vrot.slane %v1004_v16, 1  ;;  %v1042_v16 = vor.u32 %v1040_v63, %v1038_v37 }
  0x53   : > { %v4254_v38 = vsel %vm995_vm12, %v1002_v24, %v1006_v31  ;;  %v1010_v4 = vor.u32 %v1008_v52, %v1006_v31  ;;  %v929_v24 = vsel %vm897_vm5, 65537, %v6391_v20  ;;  %v1593_v31 = vor.u32 %v1591_v9, %v1590_v13 }
  0x54   : > { %6466 = vst [vmem:[#allocation10_spill] sm:$0xff] %v4254_v38  ;;  %v4342_v41 = vcombine.low %v929_v24, %v4128_v28 }
  0x56   : > { %3803 = vmatmul.mubr.msk.bf16.gmra.mrb[24].mxu0 %vm377_vm0, %v3894_v17  ;;  %v1580_v17 = vshrl.u32 %v4301_v0, 16  ;;  %v1056_v24 = vshrl.u32 %v4342_v41, 16 }
  0x57   : > { %3806 = vmatprep.mubr.msk.bf16.mxu0 %vm377_vm0, %v3895_v18  ;;  %v1561_v18 = vor.u32 %v1559_v2, %v4181_v1  ;;  %v696_v2 = vand.u32 15, %v664_v48  ;;  %v4356_v48 = vld [vmem:[%s6381_s2] ss:$0 sm:$0xff] }
  0x58   : > { %v4344_v43 = vrot.slane %v1580_v17, 7 }
  0x59   : > { %v4244_v33 = vsel %vm1157_vm9, %v4137_v40, %v1561_v18  ;;  %v1481_v40 = vsel %vm1449_vm14, 65537, %v6391_v20  ;;  %vm4309_vm6 = vcmp.le.s32.totalorder %v696_v2, 14 }
  0x5a   : > { %v3548_v54 = vcombine.low %v4128_v28, %v1481_v40  ;;  %vm1443_vm11 = vmpackc.low %vm4309_vm6, %vm4309_vm6  ;;  %v1046_v40 = vrot.slane %v1044_v3, 1 }
  0x5c   : > { %v1596_v7 = vshrl.u32 %v3548_v54, 16  ;;  %v4359_v50 = vsel %vm995_vm12, %v1042_v16, %v1046_v40  ;;  %v1050_v16 = vor.u32 %v1048_v58, %v1046_v40 }
  0x5d   : > { %6478 = vst [vmem:[#allocation12_spill] sm:$0xff] %v4359_v50  ;;  %vm6423_vm15 = vcmp.ne.s16.totalorder %v4359_v50, 0 }
  0x5e   : > { %3807 = vmatmul.mubr.msk.bf16.gmra.mrb[28].mxu0 %vm377_vm0, %v3896_v19  ;;  %vm1675_vm0 = vcmp.ne.s16.totalorder %v4156_v49, 0  ;;  %v1028_v19 = vshll.u32 %v4189_v6, 16  ;;  %v705_v6 = vand.u32 15, %v673_v53  ;;  %v1598_v26 = vrot.slane %v1596_v7, 7 }
  0x5f   : > { %v1692_v5 = vsel %vm1675_vm0, %v1322_v21, 0  ;;  %v1599_v21 = vshll.u32 %v3548_v54, 16  ;;  %v1475_v54 = vsel %vm1443_vm11, 65537, %v6391_v20  ;;  %vm1124_vm11 = vcmp.ne.s16.totalorder %v4254_v38, 0 }
  0x60   : > { %v1712_v15 = vshll.u32 %v1692_v5, 16  ;;  %v1710_v29 = vshrl.u32 %v1692_v5, 16  ;;  %v4247_v35 = vrot.slane %v1028_v19, 1  ;;  %v1941_v5 = vshrl.u32 %v1923_v55, 16 }
  0x61   : > { %v676_v19 = vadd.s32 152, %v4123_v23  ;;  %vm4314_vm8 = vcmp.ge.s32.totalorder %v705_v6, 1  ;;  %v1601_v52 = vor.u32 %v1599_v21, %v1598_v26  ;;  %v4373_v55 = vsel %vm1157_vm9, %v4344_v43, %v1593_v31 }
  0x62   : > { %v1714_v30 = vrot.slane %v1712_v15, 1  ;;  %6465 = vst [vmem:[#allocation9_spill] sm:$0xff] %v4247_v35  ;;  %v1034_v62 = vor.u32 %v1032_v36, %v4247_v35  ;;  %v706_v15 = vand.u32 15, %v674_v61  ;;  %vm899_vm14 = vmpackc.low %vm4314_vm8, %vm4314_vm8  ;;  %v4348_v47 = vrot.slane %v1941_v5, 7 }
  0x63   : > { %v708_v42 = vand.u32 15, %v676_v19  ;;  %6479 = vst [vmem:[#allocation13_spill] sm:$0xff] %v4373_v55  ;;  %v931_v60 = vsel %vm899_vm14, 65537, %v6391_v20  ;;  %v1052_v61 = vshll.u32 %v4342_v41, 16  ;;  %v4400_v3 = vcombine.low %v4128_v28, %v1475_v54 }
  0x64   : > { %v4274_v45 = vor.u32 %v1714_v30, %v1710_v29  ;;  %v1567_v29 = vshll.u32 %v3544_v56, 16  ;;  %vm4331_vm13 = vcmp.le.s32.totalorder %v706_v15, 14  ;;  %v4336_v39 = vsel %vm995_vm12, %v1034_v62, %v1038_v37 }
  0x65   : > { %6477 = vst [vmem:[#allocation11_spill] sm:$0xff] %v4336_v39  ;;  %v707_v37 = vand.u32 15, %v675_v25  ;;  %vm1453_vm3 = vmpackc.low %vm4331_vm13, %vm4331_vm13  ;;  %v4377_v56 = vsel %vm995_vm12, %v1010_v4, %v4346_v44  ;;  %vm4388_vm7 = vcmp.le.s32.totalorder %v708_v42, 14  ;;  %v4409_v8 = vsel %vm1157_vm9, %v1590_v13, %v1601_v52 }
  0x66   : > { %v1569_v53 = vor.u32 %v1567_v29, %v4320_v27  ;;  %v1485_v4 = vsel %vm1453_vm3, 65537, %v6391_v20  ;;  %v4418_v15 = vsel %vm1157_vm9, %v1598_v26, %v1609_v57  ;;  %vm1455_vm5 = vmpackc.low %vm4388_vm7, %vm4388_vm7  ;;  %v4424_v13 = vcombine.low %v921_v46, %v4128_v28 }
  0x67   : > { %vm4403_vm2 = vcmp.ge.s32.totalorder %v707_v37, 1  ;;  %v1054_v18 = vrot.slane %v1052_v61, 1  ;;  %v4431_v19 = vcombine.low %v4128_v28, %v1485_v4  ;;  %v1572_v25 = vshrl.u32 %v4400_v3, 16 }
  0x68   : > { %v4413_v11 = vsel %vm1157_vm9, %v4181_v1, %v1569_v53  ;;  %6484 = vst [vmem:[#allocation14_spill] sm:$0xff] %v4424_v13  ;;  %v4428_v1 = vcombine.low %v931_v60, %v4128_v28  ;;  %vm901_vm6 = vmpackc.low %vm4403_vm2, %vm4403_vm2  ;;  %v1487_v30 = vsel %vm1455_vm5, 65537, %v6391_v20  ;;  %v709_v31 = vand.u32 15, %v677_v12 }
  0x69   : > { %v1016_v36 = vshrl.u32 %v4283_v51, 16  ;;  %v1020_v40 = vshll.u32 %v4424_v13, 16  ;;  %v933_v42 = vsel %vm901_vm6, 65537, %v6391_v20  ;;  %v4443_v53 = vsel %vm995_vm12, %v1050_v16, %v1054_v18 }
  0x6a   : > { %6485 = vst [vmem:[#allocation15_spill] sm:$0xff] %v4443_v53  ;;  %v1060_v41 = vshll.u32 %v4428_v1, 16  ;;  %v1612_v54 = vshrl.u32 %v4431_v19, 16  ;;  %v1574_v58 = vrot.slane %v1572_v25, 7  ;;  %v4452_v60 = vcombine.low %v4128_v28, %v1487_v30 }
  0x6b   : > { %vm1676_vm8 = vcmp.ne.s16.totalorder %v4244_v33, 0  ;;  %v1058_v46 = vor.u32 %v1056_v24, %v1054_v18  ;;  %vm4457_vm10 = vcmp.ge.s32.totalorder %v709_v31, 1  ;;  %v1018_v5 = vor.u32 %v1016_v36, %v4346_v44 }
  0x6c   : > { %v1615_v16 = vshll.u32 %v4431_v19, 16  ;;  %vm903_vm13 = vmpackc.low %vm4457_vm10, %vm4457_vm10  ;;  %v1064_v24 = vshrl.u32 %v4428_v1, 16  ;;  %vm1125_vm14 = vcmp.ne.s16.totalorder %v4377_v56, 0  ;;  %vm6410_vm3 = vcmp.ne.s16.totalorder %v4443_v53, 0 }
  0x6d   : > { %vm6422_vm2 = vcmp.ne.s16.totalorder %v4336_v39, 0  ;;  %vm6408_vm5 = vcmp.ne.s16.totalorder %v4373_v55, 0  ;;  %vm1681_vm10 = vcmp.ne.s16.totalorder %v4409_v8, 0 }
  0xf9   : > { %v3780_v59 = vpop.f32.mrb[0].mxu0 }
  0xfa   : > { %v469_v63 = vadd.f32 %v3780_v59, %v4356_v48  ;;  %v460_v2 = vpop.f32.mrb[1].mxu0  ;;  %v1575_v59 = vshll.u32 %v4400_v3, 16 }
  0xfb   : > { %v461_v6 = vadd.f32 %v4356_v48, %v460_v2  ;;  %v3781_v7 = vpop.f32.mrb[2].mxu0  ;;  %v4462_v2 = vcombine.low %v933_v42, %v4128_v28  ;;  %v678_v42 = vadd.s32 168, %v4123_v23 }
  0xfc   : > { %v472_v9 = vadd.f32 %v3781_v7, %v4356_v48  ;;  %v463_v14 = vpop.f32.mrb[3].mxu0  ;;  %v589_v21 = vmax.f32 %v469_v63, 0.0  ;;  %v1583_v7 = vshll.u32 %v4301_v0, 16 }
  0xfd   : > { %v464_v17 = vadd.f32 %v4356_v48, %v463_v14  ;;  %v587_v26 = vmax.f32 %v461_v6, 0.0  ;;  %v4467_v6 = vrot.slane %v1020_v40, 1  ;;  %v4471_v14 = vrot.slane %v1612_v54, 7 }
  0xfe   : > { %v590_v22 = vmax.f32 %v472_v9, 0.0  ;;  %v1062_v9 = vrot.slane %v1060_v41, 1  ;;  %v1068_v25 = vshll.u32 %v4462_v2, 16  ;;  %v1585_v30 = vor.u32 %v1583_v7, %v4344_v43 }
  0xff   : > { %v588_v29 = vmax.f32 %v464_v17, 0.0  ;;  %6488 = vst [vmem:[#allocation16_spill] sm:$0xff] %v4467_v6  ;;  %v1617_v1 = vor.u32 %v1615_v16, %v4471_v14  ;;  %v935_v40 = vsel %vm903_vm13, 65537, %v6391_v20  ;;  %v1623_v54 = vshll.u32 %v4452_v60, 16 }
 0x100   : > { %v620_v34 = vpack.c.bf16 %v590_v22, %v589_v21  ;;  %v1577_v21 = vor.u32 %v1575_v59, %v1574_v58  ;;  %v1620_v22 = vshrl.u32 %v4452_v60, 16  ;;  %v4482_v19 = vsel %vm995_vm12, %v1058_v46, %v1062_v9 }
 0x101   : > { %v619_v37 = vpack.c.bf16 %v588_v29, %v587_v26  ;;  %v3784_v52 = vpop.f32.mrb[4].mxu0  ;;  %6489 = vst [vmem:[#allocation17_spill] sm:$0xff] %v4482_v19  ;;  %v4486_v29 = vsel %vm995_vm12, %v1018_v5, %v4467_v6  ;;  %v1070_v46 = vrot.slane %v1068_v25, 1  ;;  %v1072_v60 = vshrl.u32 %v4462_v2, 16 }
 0x102   : > { %641 = vst.msk [vmem:[#allocation2 + $0x18] sm:$0xff] %vm635_vm1, %v620_v34  ;;  %v485_v57 = vadd.f32 %v3784_v52, %v4356_v48  ;;  %803 = vrot.lane.b32.xlu0 %v620_v34, %s3975_s30  ;;  %v476_v51 = vpop.f32.mrb[5].mxu0  ;;  %v4506_v41 = vrot.slane %v1620_v22, 7  ;;  %v4524_v5 = vsel %vm1157_vm9, %v1574_v58, %v1585_v30  ;;  %vm1682_vm13 = vcmp.ne.s16.totalorder %v4418_v15, 0 }
 0x103   : > { %640 = vst.msk [vmem:[#allocation2 + $0x10] sm:$0xff] %vm635_vm1, %v619_v37  ;;  %v477_v61 = vadd.f32 %v4356_v48, %v476_v51  ;;  %v3785_v62 = vpop.f32.mrb[6].mxu0  ;;  %v4557_v30 = vor.u32 %v1072_v60, %v1070_v46 }
 0x104   : > { %v488_v3 = vadd.f32 %v3785_v62, %v4356_v48  ;;  %v479_v4 = vpop.f32.mrb[7].mxu0  ;;  %v593_v17 = vmax.f32 %v485_v57, 0.0  ;;  %v1066_v62 = vor.u32 %v1064_v24, %v1062_v9  ;;  %v710_v9 = vand.u32 15, %v678_v42 }
 0x105   : > { %v480_v12 = vadd.f32 %v4356_v48, %v479_v4  ;;  %v591_v44 = vmax.f32 %v477_v61, 0.0  ;;  %v4516_v61 = vsel %vm1157_vm9, %v4320_v27, %v1577_v21  ;;  %v4520_v4 = vcombine.low %v935_v40, %v4128_v28 }
 0x106   : > { %v594_v18 = vmax.f32 %v488_v3, 0.0  ;;  %801 = vrot.lane.b32.xlu0 %v619_v37, %s3975_s30  ;;  %v4530_v27 = vsel %vm1157_vm9, %v4326_v32, %v1617_v1  ;;  %v1625_v2 = vor.u32 %v1623_v54, %v4506_v41  ;;  %vm4563_vm7 = vcmp.le.s32.totalorder %v710_v9, 14 }
 0x107   : > { %v592_v0 = vmax.f32 %v480_v12, 0.0  ;;  %vm1457_vm6 = vmpackc.low %vm4563_vm7, %vm4563_vm7  ;;  %vm1131_vm7 = vcmp.ne.s16.totalorder %v4482_v19, 0 }
 0x108   : > { %v622_v26 = vpack.c.bf16 %v594_v18, %v593_v17 }
 0x109   : > { %v4489_v31 = vpack.c.bf16 %v592_v0, %v591_v44  ;;  %v3788_v34 = vpop.f32.mrb[8].mxu0  ;;  %v4491_v36 = vld [vmem:[#allocation2 + $0x18] sm:$0xff]  ;;  %v4548_v44 = vsel %vm995_vm12, %v1066_v62, %v1070_v46  ;;  %v3897_v0 = vld [vmem:[%s6382_s3] sm:$0xff]   ;;  %v4578_v46 = vsel %vm1157_vm9, %v4471_v14, %v1625_v2 }
 0x10a   : > { %643 = vst.msk [vmem:[#allocation2 + $0x28] sm:$0xff] %vm635_vm1, %v622_v26  ;;  %v501_v37 = vadd.f32 %v3788_v34, %v4356_v48  ;;  %v492_v52 = vpop.f32.mrb[9].mxu0  ;;  %2631 = vrot.lane.b32.xlu0 %v4491_v36, %s3976_s6  ;;  %v4504_v43 = vsel %vm1675_vm0, %v4491_v36, 0  ;;  %v4512_v59 = vld [vmem:[#allocation2 + $0x10] sm:$0xff]  ;;  %v4544_v32 = vsel %vm1124_vm11, %v4491_v36, 0  ;;  %3054 = vmatpush1.bf16.msra.mxu0 %v3897_v0  ;;  %v4602_v2 = vsel %vm1125_vm14, %v4491_v36, 0 }
 0x10b   : > { %642 = vst.msk [vmem:[#allocation2 + $0x20] sm:$0xff] %vm635_vm1, %v4489_v31  ;;  %v493_v57 = vadd.f32 %v4356_v48, %v492_v52  ;;  %v3789_v51 = vpop.f32.mrb[10].mxu0  ;;  %v2733_v12 = vshll.u32 %v4504_v43, 16  ;;  %v2368_v16 = vld [vmem:[#allocation2 + $0x10] sm:$0x80]  ;;  %v4537_v58 = vsel %vm1676_vm8, %v4512_v59, 0  ;;  %3819 = vmatpush1.bf16.msra.mxu1 %v3897_v0  ;;  %3055 = vmatprep.subr.bf16.mxu0 %v6391_v20 }
 0x10c   : > { %v504_v63 = vadd.f32 %v3789_v51, %v4356_v48  ;;  %v495_v3 = vpop.f32.mrb[11].mxu0  ;;  %v597_v17 = vmax.f32 %v501_v37, 0.0  ;;  %v2385_v25 = vsel %vm6409_vm4, %v2368_v16, 0  ;;  %v1717_v42 = vshll.u32 %v4537_v58, 16  ;;  %3811 = vmatprep.subr.bf16.mxu1 %v6391_v20 }
 0x10d   : > { %v496_v7 = vadd.f32 %v4356_v48, %v495_v3  ;;  %v595_v21 = vmax.f32 %v493_v57, 0.0  ;;  %v2735_v37 = vrot.slane %v2733_v12, 1  ;;  %v2407_v62 = vshrl.u32 %v4544_v32, 16 }
 0x10e   : > { %v598_v18 = vmax.f32 %v504_v63, 0.0  ;;  %1358 = vrot.lane.b32.xlu0 %v4491_v36, %s3973_s23  ;;  %v4581_v63 = vadd.s32 184, %v4123_v23  ;;  %v2403_v12 = vshrl.u32 %v2385_v25, 16 }
 0x10f   : > { %v596_v22 = vmax.f32 %v496_v7, 0.0  ;;  %v2731_v7 = vshrl.u32 %v4504_v43, 16 }
 0x110   : > { %v4553_v24 = vpack.c.bf16 %v598_v18, %v597_v17 }
 0x111   : > { %v4560_v1 = vpack.c.bf16 %v596_v22, %v595_v21  ;;  %v3792_v40 = vpop.f32.mrb[12].mxu0  ;;  %v4608_v22 = vrot.slane %v1717_v42, 1  ;;  %v2736_v0 = vor.u32 %v2735_v37, %v2731_v7  ;;  %v3899_v42 = vld [vmem:[%s6382_s3 + $0x10] sm:$0xff]  }
 0x112   : > { %645 = vst.msk [vmem:[#allocation2 + $0x38] sm:$0xff] %vm635_vm1, %v4553_v24  ;;  %v517_v54 = vadd.f32 %v3792_v40, %v4356_v48  ;;  %v508_v57 = vpop.f32.mrb[13].mxu0  ;;  %807 = vrot.lane.b32.xlu0 %v622_v26, %s3975_s30  ;;  %v4571_v51 = vld [vmem:[#allocation2 + $0x20] sm:$0xff]  ;;  %v3898_v26 = vld [vmem:[%s6382_s3 + $0x8] sm:$0xff]  }
 0x113   : > { %6490 = vst [vmem:[#allocation18_spill] sm:$0xff] %v4560_v1  ;;  %644 = vst.msk [vmem:[#allocation2 + $0x30] sm:$0xff] %vm635_vm1, %v4560_v1  ;;  %v509_v3 = vadd.f32 %v4356_v48, %v508_v57  ;;  %v3793_v60 = vpop.f32.mrb[14].mxu0  ;;  %v4593_v14 = vsel %vm1676_vm8, %v4571_v51, 0  ;;  %3056 = vmatpush1.bf16.msra.mxu0 %v3898_v26  ;;  %3820 = vmatpush1.bf16.msra.mxu1 %v3898_v26  ;;  %v4620_v57 = vsel %vm1124_vm11, %v4512_v59, 0  ;;  %v1953_v26 = vshrl.u32 %v4602_v2, 16 }
 0x114   : > { %v601_v16 = vmax.f32 %v517_v54, 0.0  ;;  %v520_v9 = vadd.f32 %v3793_v60, %v4356_v48  ;;  %v511_v17 = vpop.f32.mrb[15].mxu0  ;;  %v2738_v18 = vshll.u32 %v4593_v14, 16  ;;  %v4615_v54 = vrot.slane %v2407_v62, 7  ;;  %3057 = vmatprep.subr.bf16.mxu0 %v6391_v20  ;;  %3812 = vmatprep.subr.bf16.mxu1 %v6391_v20 }
 0x115   : > { %v599_v21 = vmax.f32 %v509_v3, 0.0  ;;  %v512_v43 = vadd.f32 %v4356_v48, %v511_v17  ;;  %v4634_v62 = vsel %vm1457_vm6, 65537, %v6391_v20  ;;  %v2410_v17 = vshll.u32 %v4544_v32, 16 }
 0x116   : > { %v602_v25 = vmax.f32 %v520_v9, 0.0  ;;  %1356 = vrot.lane.b32.xlu0 %v4512_v59, %s3973_s23  ;;  %v4613_v40 = vrot.slane %v2738_v18, 1  ;;  %6493 = vst [vmem:[#allocation19_spill] sm:$0xff] %v4615_v54  ;;  %v2405_v9 = vrot.slane %v2403_v12, 7  ;;  %v1720_v34 = vsel %vm995_vm12, %v4274_v45, %v4608_v22 }
 0x117   : > { %v600_v37 = vmax.f32 %v512_v43, 0.0  ;;  %v1945_v3 = vshrl.u32 %v4620_v57, 16  ;;  %3058 = vmatpush1.bf16.msra.mxu0 %v3899_v42  ;;  %3821 = vmatpush1.bf16.msra.mxu1 %v3899_v42  ;;  %vm1677_vm6 = vcmp.ne.s16.totalorder %v4413_v11, 0 }
 0x118   : > { %v4637_v60 = vpack.c.bf16 %v602_v25, %v601_v16  ;;  %v2741_v7 = vsel %vm995_vm12, %v2736_v0, %v4613_v40  ;;  %v1956_v16 = vshll.u32 %v4602_v2, 16  ;;  %v2412_v0 = vor.u32 %v2410_v17, %v4615_v54  ;;  %3059 = vmatprep.subr.bf16.mxu0 %v6391_v20  ;;  %v3900_v17 = vld [vmem:[%s6382_s3 + $0x18] sm:$0xff]   ;;  %3813 = vmatprep.subr.bf16.mxu1 %v6391_v20 }
 0x119   : > { %v3796_v18 = vpop.f32.mrb[16].mxu0  ;;  %v625_v43 = vpack.c.bf16 %v600_v37, %v599_v21  ;;  %2878 = vst.msk [vmem:[#allocation3 + $0x8] sm:$0xff] %vm635_vm1, %v2741_v7  ;;  %v4646_v52 = vld [vmem:[#allocation2 + $0x38] sm:$0xff]  ;;  %v4675_v7 = vrot.slane %v1953_v26, 7  ;;  %v1947_v20 = vrot.slane %v1945_v3, 7  ;;  %v4973_v39 = vsel %vm1677_vm6, %v4571_v51, 0 }
 0x11a   : > { %6494 = vst [vmem:[#allocation20_spill] sm:$0xff] %v4637_v60  ;;  %647 = vst.msk [vmem:[#allocation2 + $0x48] sm:$0xff] %vm635_vm1, %v4637_v60  ;;  %v533_v32 = vadd.f32 %v3796_v18, %v4356_v48  ;;  %v524_v12 = vpop.f32.mrb[17].mxu0  ;;  %805 = vrot.lane.b32.xlu0 %v4489_v31, %s3975_s30  ;;  %v4655_v45 = vld [vmem:[#allocation2 + $0x30] sm:$0xff]  ;;  %v1929_v21 = vsel %vm6423_vm15, %v4646_v52, 0  ;;  %v4664_v2 = vsel %vm6410_vm3, %v4646_v52, 0 }
 0x11b   : > { %6495 = vst [vmem:[#allocation21_spill] sm:$0xff] %v4664_v2  ;;  %v525_v25 = vadd.f32 %v4356_v48, %v524_v12  ;;  %v3797_v42 = vpop.f32.mrb[18].mxu0  ;;  %813 = vrot.lane.b32.xlu1 %v625_v43, %s3975_s30  ;;  %646 = vst.msk [vmem:[#allocation2 + $0x40] sm:$0xff] %vm635_vm1, %v625_v43  ;;  %v4673_v31 = vsel %vm6422_vm2, %v4655_v45, 0  ;;  %v1985_v37 = vshrl.u32 %v1929_v21, 16  ;;  %v1988_v2 = vshll.u32 %v1929_v21, 16  ;;  %3060 = vmatpush1.bf16.msra.mxu0 %v3900_v17 }
 0x11c   : > { %6496 = vst [vmem:[#allocation22_spill] sm:$0xff] %v4673_v31  ;;  %6497 = vst [vmem:[#allocation23_spill] sm:$0xff] %v4675_v7  ;;  %v605_v18 = vmax.f32 %v533_v32, 0.0  ;;  %v536_v12 = vadd.f32 %v3797_v42, %v4356_v48  ;;  %v527_v1 = vpop.f32.mrb[19].mxu0  ;;  %v1977_v43 = vshrl.u32 %v4673_v31, 16  ;;  %v1697_v26 = vsel %vm6408_vm5, %v4655_v45, 0  ;;  %3822 = vmatpush1.bf16.msra.mxu1 %v3900_v17 }
 0x11d   : > { %v603_v35 = vmax.f32 %v525_v25, 0.0  ;;  %v528_v6 = vadd.f32 %v4356_v48, %v527_v1  ;;  %v4684_v13 = vrot.slane %v1985_v37, 7  ;;  %v1749_v42 = vshll.u32 %v1697_v26, 16  ;;  %v3901_v1 = vld [vmem:[%s6382_s3 + $0x20] sm:$0xff]  }
 0x11e   : > { %v606_v10 = vmax.f32 %v536_v12, 0.0  ;;  %1841 = vrot.lane.b32.xlu0 %v1720_v34, %s3977_s15  ;;  %v4690_v32 = vrot.slane %v1977_v43, 7  ;;  %v6500_v21 = vmov 0   ;;  %v1948_v17 = vshll.u32 %v4620_v57, 16 }
 0x11f   : > { %6498 = vst [vmem:[#allocation24_spill] sm:$0xff] %v4684_v13  ;;  %3061 = vmatprep.subr.bf16.mxu0 %v6500_v21  ;;  %v604_v25 = vmax.f32 %v528_v6, 0.0  ;;  %v1990_v37 = vor.u32 %v1988_v2, %v4684_v13  ;;  %v4702_v34 = vsel %vm1675_vm0, %v4512_v59, 0  ;;  %3814 = vmatprep.subr.bf16.mxu1 %v6500_v21  ;;  %v2742_v12 = vshrl.u32 %v4593_v14, 16 }
 0x120   : > { %6499 = vst [vmem:[#allocation25_spill] sm:$0xff] %v4690_v32  ;;  %v4706_v3 = vpack.c.bf16 %v606_v10, %v605_v18  ;;  %v2895_v43 = vld [vmem:[#allocation3 + $0x8] sm:$0xff]  ;;  %v2413_v6 = vsel %vm1157_vm9, %v2405_v9, %v2412_v0  ;;  %v4713_v57 = vsel %vm1681_vm10, %v4646_v52, 0  ;;  %v4723_v14 = vrot.slane %v1749_v42, 1  ;;  %3062 = vmatpush1.bf16.msra.mxu0 %v3901_v1  ;;  %3823 = vmatpush1.bf16.msra.mxu1 %v3901_v1 }
 0x121   : > { %v4716_v49 = vpack.c.bf16 %v604_v25, %v603_v35  ;;  %3568 = vmatprep.mubr.msk.bf16.mxu0 %vm635_vm1, %v2895_v43  ;;  %v1991_v10 = vsel %vm1157_vm9, %v4690_v32, %v1990_v37  ;;  %v3800_v59 = vpop.f32.mrb[20].mxu0  ;;  %v4721_v2 = vld [vmem:[#allocation2 + $0x48] sm:$0xff]  ;;  %v1958_v9 = vor.u32 %v1956_v16, %v4675_v7  ;;  %v1950_v16 = vor.u32 %v1948_v17, %v1947_v20 }
 0x122   : > { %6501 = vst [vmem:[#allocation26_spill] sm:$0xff] %v4706_v3  ;;  %6502 = vst [vmem:[#allocation27_spill] sm:$0xff] %v4723_v14  ;;  %2082 = vrot.lane.b32.xlu1 %v1991_v10, %s3978_s25  ;;  %811 = vrot.lane.b32.xlu0 %v4553_v24, %s3975_s30  ;;  %v549_v35 = vadd.f32 %v3800_v59, %v4356_v48  ;;  %v540_v0 = vpop.f32.mrb[21].mxu0  ;;  %v4732_v18 = vld [vmem:[#allocation2 + $0x40] sm:$0xff]  ;;  %v4737_v42 = vsel %vm1681_vm10, %v4721_v2, 0  ;;  %v4742_v25 = vsel %vm1676_vm8, %v4491_v36, 0 }
 0x123   : > { %649 = vst.msk [vmem:[#allocation2 + $0x58] sm:$0xff] %vm635_vm1, %v4706_v3  ;;  %6503 = vst [vmem:[#allocation28_spill] sm:$0xff] %v4732_v18  ;;  %v3902_v24 = vld [vmem:[%s6382_s3 + $0x28] sm:$0xff]   ;;  %v541_v37 = vadd.f32 %v4356_v48, %v540_v0  ;;  %v3801_v43 = vpop.f32.mrb[22].mxu0  ;;  %v1753_v10 = vshrl.u32 %v1697_v26, 16  ;;  %v1757_v59 = vshll.u32 %v4713_v57, 16  ;;  %3063 = vmatprep.subr.bf16.mxu0 %v6500_v21  ;;  %3815 = vmatprep.subr.bf16.mxu1 %v6500_v21 }
 0x124   : > { %648 = vst.msk [vmem:[#allocation2 + $0x50] sm:$0xff] %vm635_vm1, %v4716_v49  ;;  %v2718_v17 = vsel %vm6408_vm5, %v4732_v18, 0  ;;  %v609_v33 = vmax.f32 %v549_v35, 0.0  ;;  %v552_v32 = vadd.f32 %v3801_v43, %v4356_v48  ;;  %v543_v31 = vpop.f32.mrb[23].mxu0  ;;  %v2778_v7 = vshll.u32 %v4737_v42, 16  ;;  %3064 = vmatpush1.bf16.msra.mxu0 %v3902_v24  ;;  %3824 = vmatpush1.bf16.msra.mxu1 %v3902_v24 }
 0x125   : > { %v2770_v3 = vshll.u32 %v2718_v17, 16  ;;  %v607_v0 = vmax.f32 %v541_v37, 0.0  ;;  %v544_v26 = vadd.f32 %v4356_v48, %v543_v31  ;;  %v1755_v13 = vor.u32 %v1753_v10, %v4723_v14  ;;  %3065 = vmatprep.subr.bf16.mxu0 %v6500_v21  ;;  %3816 = vmatprep.subr.bf16.mxu1 %v6500_v21 }
 0x126   : > { %v2174_v55 = vshll.u32 %v4702_v34, 16  ;;  %v610_v38 = vmax.f32 %v552_v32, 0.0  ;;  %2643 = vrot.lane.b32.xlu1 %v4721_v2, %s3976_s6  ;;  %2534 = vrot.lane.b32.xlu0 %v2413_v6, %s3979_s8  ;;  %v2774_v35 = vshrl.u32 %v2718_v17, 16  ;;  %v1959_v43 = vsel %vm1157_vm9, %v1947_v20, %v1958_v9  ;;  %v3903_v32 = vld [vmem:[%s6382_s3 + $0x30] sm:$0xff]  }
 0x127   : > { %v4764_v1 = vrot.slane %v2770_v3, 1  ;;  %v6505_v37 = vand.u32 15, %v4581_v63  ;;  %v4777_v10 = vor.u32 %v2742_v12, %v4613_v40  ;;  %v608_v14 = vmax.f32 %v544_v26, 0.0 }
 0x128   : > { %v4779_v6 = vrot.slane %v1757_v59, 1  ;;  %v2172_v3 = vshrl.u32 %v4702_v34, 16  ;;  %v4783_v20 = vpack.c.bf16 %v610_v38, %v609_v33  ;;  %v2780_v9 = vrot.slane %v2778_v7, 1  ;;  %3066 = vmatpush1.bf16.msra.mxu0 %v3903_v32  ;;  %3825 = vmatpush1.bf16.msra.mxu1 %v3903_v32 }
 0x129   : > { %6504 = vst [vmem:[#allocation29_spill] sm:$0xff] %v4764_v1  ;;  %vm4769_vm0 = vcmp.le.s32.totalorder %v6505_v37, 14  ;;  %v2776_v63 = vor.u32 %v2774_v35, %v4764_v1  ;;  %v4788_v17 = vsel %vm1157_vm9, %v4348_v47, %v1950_v16  ;;  %v4791_v40 = vpack.c.bf16 %v608_v14, %v607_v0  ;;  %v3804_v34 = vpop.f32.mrb[24].mxu0  ;;  %3067 = vmatprep.subr.bf16.mxu0 %v6500_v21 }
 0x12a   : > { %v1760_v12 = vsel %vm995_vm12, %v1755_v13, %v4779_v6  ;;  %v4798_v38 = vsel %vm1682_vm13, %v4732_v18, 0  ;;  %v2176_v24 = vrot.slane %v2174_v55, 1  ;;  %651 = vst.msk [vmem:[#allocation2 + $0x68] sm:$0xff] %vm635_vm1, %v4783_v20  ;;  %v2782_v7 = vshrl.u32 %v4737_v42, 16  ;;  %2074 = vrot.lane.b32.xlu0 %v1959_v43, %s3978_s25  ;;  %v556_v14 = vpop.f32.mrb[25].mxu0  ;;  %v4817_v42 = vld [vmem:[#allocation2 + $0x28] sm:$0xff]  ;;  %3817 = vmatprep.subr.bf16.mxu1 %v6500_v21  ;;  %vm1459_vm4 = vmpackc.low %vm4769_vm0, %vm4769_vm0 }
 0x12b   : > { %6508 = vst [vmem:[#allocation30_spill] sm:$0xff] %v4798_v38  ;;  %v2781_v47 = vsel %vm995_vm12, %v2776_v63, %v2780_v9  ;;  %1851 = vrot.lane.b32.xlu1 %v1760_v12, %s3977_s15  ;;  %v565_v13 = vadd.f32 %v3804_v34, %v4356_v48  ;;  %v4807_v16 = vld [vmem:[#allocation2 + $0x50] sm:$0xff]  ;;  %v4812_v55 = vsel %vm1131_vm7, %v4721_v2, 0  ;;  %650 = vst.msk [vmem:[#allocation2 + $0x60] sm:$0xff] %vm635_vm1, %v4791_v40  ;;  %v3805_v33 = vpop.f32.mrb[26].mxu0  ;;  %v2179_v26 = vshll.u32 %v4742_v25, 16 }
 0x12c   : > { %2883 = vst.msk [vmem:[#allocation3 + $0x58] sm:$0xff] %vm635_vm1, %v2781_v47  ;;  %v557_v59 = vadd.f32 %v4356_v48, %v556_v14  ;;  %v4823_v0 = vsel %vm1682_vm13, %v4807_v16, 0  ;;  %v4829_v35 = vsel %vm1677_vm6, %v4491_v36, 0  ;;  %v3904_v43 = vld [vmem:[%s6382_s3 + $0x38] sm:$0xff]   ;;  %v568_v63 = vadd.f32 %v3805_v33, %v4356_v48  ;;  %v559_v47 = vpop.f32.mrb[27].mxu0 }
 0x12d   : > { %v613_v37 = vmax.f32 %v565_v13, 0.0  ;;  %v1765_v12 = vshll.u32 %v4798_v38, 16  ;;  %v2786_v34 = vshll.u32 %v4823_v0, 16  ;;  %v560_v36 = vadd.f32 %v4356_v48, %v559_v47  ;;  %3068 = vmatpush1.bf16.msra.mxu0 %v3904_v43  ;;  %3826 = vmatpush1.bf16.msra.mxu1 %v3904_v43 }
 0x12e   : > { %v611_v14 = vmax.f32 %v557_v59, 0.0  ;;  %v4843_v54 = vsel %vm6410_vm3, %v4732_v18, 0  ;;  %v2001_v32 = vshrl.u32 %v4812_v55, 16  ;;  %v2784_v13 = vor.u32 %v2782_v7, %v2780_v9  ;;  %2635 = vrot.lane.b32.xlu0 %v4817_v42, %s3976_s6  ;;  %v3905_v9 = vld [vmem:[%s6382_s3 + $0x40] sm:$0xff]   ;;  %3069 = vmatprep.subr.bf16.mxu0 %v6500_v21 }
 0x12f   : > { %1368 = vrot.lane.b32.xlu1 %v4732_v18, %s3973_s23  ;;  %v614_v33 = vmax.f32 %v568_v63, 0.0  ;;  %v4850_v38 = vrot.slane %v2786_v34, 1  ;;  %v4855_v59 = vsel %vm1677_vm6, %v4817_v42, 0  ;;  %vm1678_vm8 = vcmp.ne.s16.totalorder %v4516_v61, 0  ;;  %3818 = vmatprep.subr.bf16.mxu1 %v6500_v21 }
 0x130   : > { %v1761_v7 = vshrl.u32 %v4713_v57, 16  ;;  %v2177_v47 = vor.u32 %v2176_v24, %v2172_v3  ;;  %v612_v53 = vmax.f32 %v560_v36, 0.0  ;;  %v2746_v19 = vshll.u32 %v4855_v59, 16 }
 0x131   : > { %v4864_v63 = vpack.c.bf16 %v614_v33, %v613_v37  ;;  %v4866_v34 = vrot.slane %v1765_v12, 1  ;;  %v2789_v1 = vsel %vm995_vm12, %v2784_v13, %v4850_v38  ;;  %v1993_v60 = vshrl.u32 %v4843_v54, 16  ;;  %v4879_v37 = vpop.f32.mrb[28].mxu0  ;;  %3070 = vmatpush1.bf16.msra.mxu0 %v3905_v9  ;;  %3827 = vmatpush1.bf16.msra.mxu1 %v3905_v9 }
 0x132   : > { %2884 = vst.msk [vmem:[#allocation3 + $0x68] sm:$0xff] %vm635_vm1, %v2789_v1  ;;  %v4873_v57 = vpack.c.bf16 %v612_v53, %v611_v14  ;;  %v4875_v3 = vrot.slane %v2001_v32, 7  ;;  %v2004_v24 = vshll.u32 %v4812_v55, 16  ;;  %v2748_v43 = vrot.slane %v2746_v19, 1  ;;  %2072 = vrot.lane.b32.xlu0 %v4788_v17, %s3978_s25  ;;  %v4911_v36 = vpop.f32.mrb[29].mxu0 }
 0x133   : > { %vm1683_vm5 = vcmp.ne.s16.totalorder %v4530_v27, 0  ;;  %817 = vrot.lane.b32.xlu1 %v4716_v49, %s3975_s30  ;;  %v2905_v53 = vld [vmem:[#allocation3 + $0x58] sm:$0xff]  ;;  %653 = vst.msk [vmem:[#allocation2 + $0x78] sm:$0xff] %vm635_vm1, %v4864_v63  ;;  %v4890_v19 = vrot.slane %v2179_v26, 1  ;;  %v1721_v1 = vshrl.u32 %v4537_v58, 16  ;;  %v6511_v55 = vshll.u32 %v4520_v4, 16 }
 0x134   : > { %6509 = vst [vmem:[#allocation31_spill] sm:$0xff] %v4873_v57  ;;  %6510 = vst [vmem:[#allocation32_spill] sm:$0xff] %v4875_v3  ;;  %v4899_v14 = vcombine.low %v4128_v28, %v4634_v62  ;;  %3573 = vmatprep.mubr.msk.bf16.mxu1 %vm635_vm1, %v2905_v53  ;;  %v1763_v49 = vor.u32 %v1761_v7, %v4779_v6  ;;  %v1725_v17 = vshll.u32 %v4829_v35, 16  ;;  %v2391_v26 = vsel %vm6423_vm15, %v4732_v18, 0  ;;  %v4917_v6 = vpop.f32.mrb[30].mxu0 }
 0x135   : > { %v4895_v12 = vrot.slane %v6511_v55, 1  ;;  %652 = vst.msk [vmem:[#allocation2 + $0x70] sm:$0xff] %vm635_vm1, %v4873_v57  ;;  %v2749_v58 = vsel %vm995_vm12, %v4777_v10, %v2748_v43  ;;  %v2182_v62 = vsel %vm995_vm12, %v2177_v47, %v4890_v19  ;;  %vm1684_vm3 = vcmp.ne.s16.totalorder %v4578_v46, 0  ;;  %v4932_v47 = vpop.f32.mrb[31].mxu0 }
 0x136   : > { %2879 = vst.msk [vmem:[#allocation3 + $0x18] sm:$0xff] %vm635_vm1, %v2749_v58  ;;  %v1491_v10 = vsel %vm1459_vm4, 65537, %v6500_v21  ;;  %v679_v32 = vadd.s32 176, %v4123_v23  ;;  %v1768_v13 = vsel %vm995_vm12, %v1763_v49, %v4866_v34  ;;  %v4928_v33 = vrot.slane %v1993_v60, 7  ;;  %2303 = vrot.lane.b32.xlu0 %v2182_v62, %s3980_s16  ;;  %v4949_v49 = vld [vmem:[#allocation2 + $0x58] sm:$0xff] }
 0x137   : > { %v2006_v9 = vor.u32 %v2004_v24, %v4875_v3  ;;  %v1723_v7 = vor.u32 %v1721_v1, %v4608_v22  ;;  %1853 = vrot.lane.b32.xlu1 %v1768_v13, %s3977_s15  ;;  %v2447_v31 = vshrl.u32 %v2391_v26, 16  ;;  %v4939_v53 = vsel %vm995_vm12, %v4557_v30, %v4895_v12 }
 0x138   : > { %6512 = vst [vmem:[#allocation33_spill] sm:$0xff] %v4939_v53  ;;  %v1628_v60 = vshrl.u32 %v4899_v14, 16  ;;  %v4943_v55 = vadd.s32 192, %v4123_v23  ;;  %v2790_v22 = vshrl.u32 %v4823_v0, 16  ;;  %v4946_v24 = vrot.slane %v1725_v17, 1 }
 0x139   : > { %v2750_v1 = vshrl.u32 %v4855_v59, 16  ;;  %v4954_v58 = vsel %vm1678_vm8, %v4655_v45, 0  ;;  %v4959_v30 = vsel %vm6422_vm2, %v4646_v52, 0  ;;  %vm6426_vm4 = vcmp.ne.s16.totalorder %v4548_v44, 0 }
 0x13a   : > { %6513 = vst [vmem:[#allocation34_spill] sm:$0xff] %v4959_v30  ;;  %v2754_v62 = vshll.u32 %v4954_v58, 16  ;;  %v4964_v0 = vcombine.low %v4128_v28, %v1491_v10  ;;  %v711_v59 = vand.u32 15, %v679_v32  ;;  %v2007_v17 = vsel %vm1157_vm9, %v4928_v33, %v2006_v9 }
 0x13b   : > { %v1728_v13 = vsel %vm995_vm12, %v1723_v7, %v4946_v24  ;;  %v2752_v50 = vor.u32 %v2750_v1, %v2748_v43  ;;  %2086 = vrot.lane.b32.xlu1 %v2007_v17, %s3978_s25  ;;  %v4977_v57 = vrot.slane %v2447_v31, 7  ;;  %v2160_v10 = vsel %vm1681_vm10, %v4732_v18, 0  ;;  %v4989_v7 = vld [vmem:[#allocation2 + $0x60] sm:$0xff] }
 0x13c   : > { %1843 = vrot.lane.b32.xlu0 %v1728_v13, %s3977_s15  ;;  %v4982_v32 = vrot.slane %v2754_v62, 1  ;;  %v2721_v43 = vsel %vm1683_vm5, %v4949_v49, 0  ;;  %v2792_v11 = vor.u32 %v2790_v22, %v4850_v38  ;;  %v2439_v9 = vshrl.u32 %v4959_v30, 16  ;;  %6515 = vst [vmem:[#allocation36_spill] sm:$0xff] %v4989_v7 }
 0x13d   : > { %6514 = vst [vmem:[#allocation35_spill] sm:$0xff] %v4977_v57  ;;  %v4991_v1 = vrot.slane %v1628_v60, 7  ;;  %v2450_v17 = vshll.u32 %v2391_v26, 16  ;;  %v2187_v8 = vshll.u32 %v4973_v39, 16  ;;  %v5000_v13 = vsel %vm1684_vm3, %v4989_v7, 0 }
 0x13e   : > { %v2757_v62 = vsel %vm995_vm12, %v2752_v50, %v4982_v32  ;;  %vm1126_vm10 = vcmp.ne.s16.totalorder %v4486_v29, 0  ;;  %v2219_v38 = vshll.u32 %v2160_v10, 16  ;;  %v2794_v60 = vshll.u32 %v2721_v43, 16 }
 0x13f   : > { %2880 = vst.msk [vmem:[#allocation3 + $0x28] sm:$0xff] %vm635_vm1, %v2757_v62  ;;  %v2798_v22 = vshrl.u32 %v2721_v43, 16  ;;  %v2802_v31 = vshll.u32 %v5000_v13, 16  ;;  %2647 = vrot.lane.b32.xlu1 %v4949_v49, %s3976_s6  ;;  %v2452_v50 = vor.u32 %v2450_v17, %v4977_v57  ;;  %v2183_v26 = vshrl.u32 %v4742_v25, 16 }
 0x140   : > { %2633 = vrot.lane.b32.xlu0 %v4571_v51, %s3976_s6  ;;  %v5014_v30 = vsel %vm1678_vm8, %v4571_v51, 0  ;;  %v1636_v62 = vshrl.u32 %v4964_v0, 16  ;;  %v5017_v43 = vrot.slane %v2439_v9, 7  ;;  %v5022_v18 = vsel %vm1682_vm13, %v4721_v2, 0 }
 0x141   : > { %v2796_v3 = vrot.slane %v2794_v60, 1  ;;  %v5024_v7 = vrot.slane %v2802_v31, 1  ;;  %vm5026_vm6 = vcmp.ge.s32.totalorder %v711_v59, 1  ;;  %v2185_v25 = vor.u32 %v2183_v26, %v4890_v19 }
 0x142   : > { %6516 = vst [vmem:[#allocation37_spill] sm:$0xff] %v5017_v43  ;;  %v5031_v57 = vrot.slane %v2187_v8, 1  ;;  %v581_v9 = vadd.f32 %v4879_v37, %v4356_v48  ;;  %v573_v23 = vadd.f32 %v4356_v48, %v4911_v36  ;;  %v5037_v15 = vrot.slane %v2219_v38, 1  ;;  %vm905_vm0 = vmpackc.low %vm5026_vm6, %vm5026_vm6 }
 0x143   : > { %v1733_v60 = vshll.u32 %v5014_v30, 16  ;;  %v2797_v31 = vsel %vm995_vm12, %v2792_v11, %v2796_v3  ;;  %v2800_v59 = vor.u32 %v2798_v22, %v2796_v3  ;;  %823 = vrot.lane.b32.xlu1 %v4783_v20, %s3975_s30  ;;  %v2453_v19 = vsel %vm1157_vm9, %v5017_v43, %v2452_v50 }
 0x144   : > { %1360 = vrot.lane.b32.xlu0 %v4571_v51, %s3973_s23  ;;  %v2223_v37 = vshrl.u32 %v2160_v10, 16  ;;  %v2227_v8 = vshll.u32 %v5022_v18, 16  ;;  %v1729_v36 = vshrl.u32 %v4829_v35, 16  ;;  %2885 = vst.msk [vmem:[#allocation3 + $0x78] sm:$0xff] %vm635_vm1, %v2797_v31  ;;  %v617_v3 = vmax.f32 %v581_v9, 0.0 }
 0x145   : > { %v2805_v11 = vsel %vm995_vm12, %v2800_v59, %v5024_v7  ;;  %v584_v20 = vadd.f32 %v4917_v6, %v4356_v48  ;;  %v5057_v38 = vsel %vm6426_vm4, %v4721_v2, 0  ;;  %v2190_v10 = vsel %vm995_vm12, %v2185_v25, %v5031_v57 }
 0x146   : > { %6519 = vst [vmem:[#allocation38_spill] sm:$0xff] %v5057_v38  ;;  %v1700_v35 = vsel %vm1683_vm5, %v4721_v2, 0  ;;  %2886 = vst.msk [vmem:[#allocation3 + $0x88] sm:$0xff] %vm635_vm1, %v2805_v11  ;;  %v615_v22 = vmax.f32 %v573_v23, 0.0  ;;  %v576_v50 = vadd.f32 %v4356_v48, %v4932_v47  ;;  %v2225_v6 = vor.u32 %v2223_v37, %v5037_v15 }
 0x147   : > { %v5068_v26 = vrot.slane %v1733_v60, 1  ;;  %v2388_v9 = vsel %vm1126_vm10, %v4817_v42, 0  ;;  %v618_v31 = vmax.f32 %v584_v20, 0.0  ;;  %2544 = vrot.lane.b32.xlu1 %v2453_v19, %s3979_s8  ;;  %v5075_v25 = vrot.slane %v2227_v8, 1 }
 0x148   : > { %2305 = vrot.lane.b32.xlu0 %v2190_v10, %s3980_s16  ;;  %v616_v59 = vmax.f32 %v576_v50, 0.0  ;;  %v5077_v23 = vrot.slane %v1636_v62, 7  ;;  %v1639_v48 = vshll.u32 %v4964_v0, 16  ;;  %v1731_v47 = vor.u32 %v1729_v36, %v4946_v24  ;;  %v5120_v50 = vld [vmem:[#allocation2 + $0x38] sm:$0xff] }
 0x149   : > { %v5084_v60 = vsel %vm1684_vm3, %v4807_v16, 0  ;;  %v1773_v37 = vshll.u32 %v1700_v35, 16  ;;  %v5086_v11 = vpack.c.bf16 %v618_v31, %v617_v3  ;;  %v2423_v19 = vshrl.u32 %v2388_v9, 16 }
 0x14a   : > { %vm6437_vm13 = vcmp.ne.s16.totalorder %v4939_v53, 0  ;;  %v5089_v8 = vpack.c.bf16 %v616_v59, %v615_v22  ;;  %v713_v62 = vand.u32 15, %v4943_v55  ;;  %v2230_v0 = vsel %vm995_vm12, %v2225_v6, %v5075_v25 }
 0x14b   : > { %v1736_v24 = vsel %vm995_vm12, %v1731_v47, %v5068_v26  ;;  %v5099_v36 = vsel %vm1125_vm14, %v4571_v51, 0  ;;  %655 = vst.msk [vmem:[#allocation2 + $0x88] sm:$0xff] %vm635_vm1, %v5086_v11  ;;  %v6521_v3 = vshll.u32 %v4899_v14, 16  ;;  %2315 = vrot.lane.b32.xlu1 %v2230_v0, %s3980_s16  ;;  %v1781_v55 = vshll.u32 %v5084_v60, 16 }
 0x14c   : > { %6520 = vst [vmem:[#allocation39_spill] sm:$0xff] %v5089_v8  ;;  %1845 = vrot.lane.b32.xlu0 %v1736_v24, %s3977_s15  ;;  %v1933_v10 = vsel %vm6437_vm13, %v4949_v49, 0  ;;  %654 = vst.msk [vmem:[#allocation2 + $0x80] sm:$0xff] %vm635_vm1, %v5089_v8  ;;  %v1641_v51 = vor.u32 %v1639_v48, %v5077_v23  ;;  %v5118_v14 = vrot.slane %v1773_v37, 1  ;;  %v1777_v22 = vshrl.u32 %v1700_v35, 16 }
 0x14d   : > { %v1633_v20 = vor.u32 %v6521_v3, %v4991_v1  ;;  %v2415_v6 = vshrl.u32 %v5099_v36, 16  ;;  %v5123_v31 = vrot.slane %v2423_v19, 7  ;;  %vm1679_vm2 = vcmp.ne.s16.totalorder %v4524_v5, 0 }
 0x14e   : > { %vm5126_vm15 = vcmp.ge.s32.totalorder %v713_v62, 1  ;;  %v2758_v48 = vshrl.u32 %v4954_v58, 16  ;;  %v2017_v17 = vshrl.u32 %v1933_v10, 16  ;;  %v937_v35 = vsel %vm905_vm0, 65537, %v6500_v21  ;;  %v1909_v62 = vld [vmem:[#allocation2 + $0x20] sm:$0xff] }
 0x14f   : > { %6522 = vst [vmem:[#allocation40_spill] sm:$0xff] %v5123_v31  ;;  %v5133_v47 = vsel %vm1157_vm9, %v4506_v41, %v1633_v20  ;;  %1372 = vrot.lane.b32.xlu1 %v4807_v16, %s3973_s23  ;;  %v5140_v37 = vrot.slane %v1781_v55, 1  ;;  %v2426_v19 = vshll.u32 %v2388_v9, 16  ;;  %v2717_v58 = vsel %vm1679_vm2, %v5120_v50, 0 }
 0x150   : > { %1366 = vrot.lane.b32.xlu0 %v4646_v52, %s3973_s23  ;;  %v5147_v41 = vsel %vm1157_vm9, %v4991_v1, %v1641_v51  ;;  %v2760_v0 = vor.u32 %v2758_v48, %v4982_v32  ;;  %v1779_v24 = vor.u32 %v1777_v22, %v5118_v14  ;;  %v2806_v3 = vshrl.u32 %v5000_v13, 16  ;;  %v5160_v1 = vld [vmem:[#allocation2 + $0x68] sm:$0xff] }
 0x151   : > { %v2762_v20 = vshll.u32 %v2717_v58, 16  ;;  %v2417_v52 = vrot.slane %v2415_v6, 7  ;;  %v2428_v55 = vor.u32 %v2426_v19, %v5123_v31  ;;  %v5156_v9 = vsel %vm6426_vm4, %v4807_v16, 0  ;;  %v6526_v13 = vld [vmem:[#allocation20_spill] sm:$0xff]  ;;  %vm907_vm4 = vmpackc.low %vm5126_vm15, %vm5126_vm15 }
 0x152   : > { %v2020_v43 = vshll.u32 %v1933_v10, 16  ;;  %v5158_v8 = vrot.slane %v2017_v17, 7  ;;  %v1926_v32 = vsel %vm1126_vm10, %v1909_v62, 0  ;;  %v2766_v22 = vshrl.u32 %v2717_v58, 16 }
 0x153   : > { %v2764_v51 = vrot.slane %v2762_v20, 1  ;;  %821 = vrot.lane.b32.xlu1 %v4791_v40, %s3975_s30  ;;  %v1784_v6 = vsel %vm995_vm12, %v1779_v24, %v5140_v37  ;;  %vm1685_vm6 = vcmp.ne.s16.totalorder %v5133_v47, 0  ;;  %vm1686_vm0 = vcmp.ne.s16.totalorder %v5147_v41, 0  ;;  %v5176_v40 = vld [vmem:[#allocation2 + $0x70] sm:$0xff] }
 0x154   : > { %6525 = vst [vmem:[#allocation41_spill] sm:$0xff] %v5158_v8  ;;  %815 = vrot.lane.b32.xlu0 %v6526_v13, %s3975_s30  ;;  %v3537_v10 = vcombine.low %v937_v35, %v4128_v28  ;;  %v2808_v48 = vor.u32 %v2806_v3, %v5024_v7  ;;  %v2009_v17 = vshrl.u32 %v5156_v9, 16  ;;  %v2429_v58 = vsel %vm1157_vm9, %v2417_v52, %v2428_v55  ;;  %v6555_v47 = vld [vmem:[#allocation9_spill] sm:$0xff] }
 0x155   : > { %v2765_v19 = vsel %vm995_vm12, %v2760_v0, %v2764_v51  ;;  %v2768_v62 = vor.u32 %v2766_v22, %v2764_v51  ;;  %v1961_v20 = vshrl.u32 %v1926_v32, 16  ;;  %v2723_v24 = vsel %vm1685_vm6, %v5160_v1, 0  ;;  %v6527_v0 = vld [vmem:[#allocation29_spill] sm:$0xff] }
 0x156   : > { %2881 = vst.msk [vmem:[#allocation3 + $0x38] sm:$0xff] %vm635_vm1, %v2765_v19  ;;  %v5186_v7 = vsel %vm1686_vm0, %v5176_v40, 0  ;;  %v2022_v35 = vor.u32 %v2020_v43, %v5158_v8  ;;  %v2810_v55 = vshll.u32 %v2723_v24, 16  ;;  %v2814_v51 = vshrl.u32 %v2723_v24, 16 }
 0x157   : > { %v2773_v3 = vsel %vm995_vm12, %v2768_v62, %v6527_v0  ;;  %1857 = vrot.lane.b32.xlu1 %v1784_v6, %s3977_s15  ;;  %v2418_v22 = vshll.u32 %v5099_v36, 16  ;;  %v2818_v13 = vshll.u32 %v5186_v7, 16  ;;  %v5199_v59 = vrot.slane %v2009_v17, 7 }
 0x158   : > { %2538 = vrot.lane.b32.xlu0 %v2429_v58, %s3979_s8  ;;  %2882 = vst.msk [vmem:[#allocation3 + $0x48] sm:$0xff] %vm635_vm1, %v2773_v3  ;;  %v2812_v19 = vrot.slane %v2810_v55, 1  ;;  %v939_v43 = vsel %vm907_vm4, 65537, %v6500_v21  ;;  %v1084_v62 = vshll.u32 %v3537_v10, 16  ;;  %v5206_v24 = vrot.slane %v1961_v20, 7  ;;  %v867_v20 = vld [vmem:[#allocation2 + $0x8] sm:$0xff] }
 0x159   : > { %v2420_v31 = vor.u32 %v2418_v22, %v2417_v52  ;;  %v5202_v8 = vrot.slane %v2818_v13, 1  ;;  %v2023_v6 = vsel %vm1157_vm9, %v5199_v59, %v2022_v35  ;;  %v2393_v52 = vsel %vm1131_vm7, %v4807_v16, 0  ;;  %v6530_v22 = vld [vmem:[#allocation19_spill] sm:$0xff] }
 0x15a   : > { %6528 = vst [vmem:[#allocation20_spill] sm:$0xff] %v5206_v24  ;;  %v2813_v36 = vsel %vm995_vm12, %v2808_v48, %v2812_v19  ;;  %v2816_v58 = vor.u32 %v2814_v51, %v2812_v19  ;;  %v5217_v0 = vcombine.low %v939_v43, %v4128_v28  ;;  %v1964_v35 = vshll.u32 %v1926_v32, 16 }
 0x15b   : > { %2090 = vrot.lane.b32.xlu1 %v2023_v6, %s3978_s25  ;;  %2887 = vst.msk [vmem:[#allocation3 + $0x98] sm:$0xff] %vm635_vm1, %v2813_v36  ;;  %v1996_v3 = vshll.u32 %v4843_v54, 16  ;;  %v1086_v55 = vrot.slane %v1084_v62, 1  ;;  %v1088_v51 = vshrl.u32 %v3537_v10, 16  ;;  %v2421_v13 = vsel %vm1157_vm9, %v6530_v22, %v2420_v31  ;;  %v6533_v36 = vld [vmem:[#allocation24_spill] sm:$0xff]  ;;  %v6537_v22 = vld [vmem:[#allocation23_spill] sm:$0xff] }
 0x15c   : > { %1364 = vrot.lane.b32.xlu0 %v4655_v45, %s3973_s23  ;;  %v2821_v48 = vsel %vm995_vm12, %v2816_v58, %v5202_v8  ;;  %v5225_v45 = vsel %vm1678_vm8, %v4817_v42, 0  ;;  %v1966_v32 = vor.u32 %v1964_v35, %v5206_v24  ;;  %v2463_v19 = vshrl.u32 %v2393_v52, 16  ;;  %v6534_v35 = vld [vmem:[#allocation15_spill] sm:$0xff] }
 0x15d   : > { %2888 = vst.msk [vmem:[#allocation3 + $0xa8] sm:$0xff] %vm635_vm1, %v2821_v48  ;;  %v1998_v43 = vor.u32 %v1996_v3, %v4928_v33  ;;  %v5237_v54 = vsel %vm1124_vm11, %v867_v20, 0  ;;  %v1080_v62 = vshrl.u32 %v4520_v4, 16  ;;  %v1092_v10 = vshll.u32 %v5217_v0, 16  ;;  %v6536_v48 = vld [vmem:[#allocation30_spill] sm:$0xff] }
 0x15e   : > { %v2191_v31 = vshrl.u32 %v4973_v39, 16  ;;  %v2195_v6 = vshll.u32 %v5225_v45, 16  ;;  %v5246_v33 = vsel %vm1679_vm2, %v4817_v42, 0  ;;  %vm6535_vm11 = vcmp.ne.s16.totalorder %v6534_v35, 0 }
 0x15f   : > { %2651 = vrot.lane.b32.xlu1 %v5160_v1, %s3976_s6  ;;  %6532 = vst [vmem:[#allocation29_spill] sm:$0xff] %v5246_v33  ;;  %v5250_v58 = vsel %vm1157_vm9, %v6533_v36, %v1998_v43  ;;  %v5255_v20 = vsel %vm6535_vm11, %v4721_v2, 0  ;;  %v2162_v39 = vsel %vm1683_vm5, %v4807_v16, 0  ;;  %v1090_v4 = vor.u32 %v1088_v51, %v1086_v55 }
 0x160   : > { %2536 = vrot.lane.b32.xlu0 %v2421_v13, %s3979_s8  ;;  %v1769_v3 = vshrl.u32 %v6536_v48, 16  ;;  %v1967_v42 = vsel %vm1157_vm9, %v6537_v22, %v1966_v32  ;;  %v2193_v13 = vor.u32 %v2191_v31, %v5031_v57  ;;  %v5264_v61 = vrot.slane %v2463_v19, 7  ;;  %v866_v48 = vld [vmem:[#allocation2] sm:$0x80] }
 0x161   : > { %v2466_v43 = vshll.u32 %v2393_v52, 16  ;;  %v1737_v2 = vshrl.u32 %v5014_v30, 16  ;;  %v1741_v27 = vshll.u32 %v5246_v33, 16  ;;  %v5271_v16 = vrot.slane %v1092_v10, 1  ;;  %v868_v52 = vld [vmem:[#allocation2 + $0x10] sm:$0xff] }
 0x162   : > { %v5274_v51 = vor.u32 %v1769_v3, %v4866_v34  ;;  %v5276_v32 = vrot.slane %v2195_v6, 1  ;;  %v2455_v57 = vshrl.u32 %v5255_v20, 16  ;;  %v2235_v19 = vshll.u32 %v2162_v39, 16 }
 0x163   : > { %1378 = vrot.lane.b32.xlu1 %v5160_v1, %s3973_s23  ;;  %v1739_v31 = vor.u32 %v1737_v2, %v5068_v26  ;;  %v5283_v36 = vsel %vm1684_vm3, %v4949_v49, 0  ;;  %v1082_v30 = vor.u32 %v1080_v62, %v4895_v12  ;;  %v2231_v10 = vshrl.u32 %v5022_v18, 16 }
 0x164   : > { %2076 = vrot.lane.b32.xlu0 %v1967_v42, %s3978_s25  ;;  %v2198_v34 = vsel %vm995_vm12, %v2193_v13, %v5276_v32  ;;  %v2468_v6 = vor.u32 %v2466_v43, %v5264_v61  ;;  %v2239_v35 = vshrl.u32 %v2162_v39, 16  ;;  %v1163_v3 = vshrl.u32 %v5237_v54, 16  ;;  %v6539_v42 = vld [vmem:[#allocation8_spill] sm:$0xff] }
 0x165   : > { %v5294_v46 = vrot.slane %v1741_v27, 1  ;;  %v5298_v12 = vsel %vm995_vm12, %v1090_v4, %v5271_v16  ;;  %v1142_v18 = vsel %vm1125_vm14, %v868_v52, 0  ;;  %v5303_v26 = vor.u32 %v2231_v10, %v5075_v25  ;;  %v6541_v25 = vld [vmem:[#allocation7_spill] sm:$0xff] }
 0x166   : > { %v5305_v62 = vrot.slane %v2455_v57, 7  ;;  %v5307_v39 = vrot.slane %v2235_v19, 1  ;;  %v1702_v22 = vsel %vm1685_vm6, %v4949_v49, 0  ;;  %vm6540_vm15 = vcmp.ne.s16.totalorder %v6539_v42, 0 }
 0x167   : > { %827 = vrot.lane.b32.xlu1 %v4864_v63, %s3975_s30  ;;  %6538 = vst [vmem:[#allocation19_spill] sm:$0xff] %v5294_v46  ;;  %v2243_v63 = vshll.u32 %v5283_v36, 16  ;;  %v1744_v4 = vsel %vm995_vm12, %v1739_v31, %v5294_v46  ;;  %v1140_v56 = vsel %vm6540_vm15, %v866_v48, 0  ;;  %v5318_v13 = vsel %vm995_vm12, %v1082_v30, %v1086_v55  ;;  %v6543_v48 = vld [vmem:[#allocation13_spill] sm:$0xff] }
 0x168   : > { %2307 = vrot.lane.b32.xlu0 %v2198_v34, %s3980_s16  ;;  %v682_v43 = vadd.s32 200, %v6541_v25  ;;  %v2469_v2 = vsel %vm1157_vm9, %v5305_v62, %v2468_v6  ;;  %v2241_v27 = vor.u32 %v2239_v35, %v5307_v39  ;;  %v1171_v57 = vshrl.u32 %v1142_v18, 16  ;;  %v6542_v34 = vld [vmem:[#allocation36_spill] sm:$0xff] }
 0x169   : > { %v2012_v19 = vshll.u32 %v5156_v9, 16  ;;  %v1789_v52 = vshll.u32 %v1702_v22, 16  ;;  %vm1135_vm14 = vcmp.ne.s16.totalorder %v5298_v12, 0  ;;  %v1785_v55 = vshrl.u32 %v5084_v60, 16 }
 0x16a   : > { %v714_v31 = vand.u32 15, %v682_v43  ;;  %v5329_v30 = vrot.slane %v2243_v63, 1  ;;  %v1166_v10 = vshll.u32 %v5237_v54, 16  ;;  %v5335_v6 = vsel %vm1686_vm0, %v6542_v34, 0  ;;  %v1330_v54 = vld [vmem:[#allocation2 + $0x48] sm:$0xff] }
 0x16b   : > { %2548 = vrot.lane.b32.xlu1 %v2469_v2, %s3979_s8  ;;  %v2014_v9 = vor.u32 %v2012_v19, %v5199_v59  ;;  %v1159_v35 = vshrl.u32 %v1140_v56, 16  ;;  %vm6544_vm3 = vcmp.ne.s16.totalorder %v6543_v48, 0  ;;  %v5342_v42 = vor.u32 %v1785_v55, %v5140_v37  ;;  %v6545_v59 = vld [vmem:[#allocation32_spill] sm:$0xff] }
 0x16c   : > { %1847 = vrot.lane.b32.xlu0 %v1744_v4, %s3977_s15  ;;  %v2159_v4 = vsel %vm6544_vm3, %v5120_v50, 0  ;;  %vm778_vm5 = vcmp.le.s32.totalorder %v714_v31, 14  ;;  %v2246_v60 = vsel %vm995_vm12, %v2241_v27, %v5329_v30  ;;  %v5349_v63 = vsel %vm1135_vm14, %v5160_v1, 0  ;;  %v5359_v50 = vpop.permute.xlu0 %1354 }
 0x16d   : > { %v5351_v43 = vrot.slane %v1171_v57, 7  ;;  %vm1461_vm8 = vmpackc.low %vm778_vm5, %vm778_vm5  ;;  %v5355_v56 = vsel %vm1157_vm9, %v6545_v59, %v2014_v9  ;;  %v5361_v37 = vrot.slane %v1789_v52, 1  ;;  %v1793_v2 = vshrl.u32 %v1702_v22, 16 }
 0x16e   : > { %v1797_v27 = vshll.u32 %v5335_v6, 16  ;;  %v1493_v19 = vsel %vm1461_vm8, 65537, %v6500_v21  ;;  %v2211_v57 = vshll.u32 %v2159_v4, 16  ;;  %v1174_v31 = vshll.u32 %v1142_v18, 16  ;;  %v6546_v18 = vld [vmem:[#allocation26_spill] sm:$0xff] }
 0x16f   : > { %2319 = vrot.lane.b32.xlu1 %v2246_v60, %s3980_s16  ;;  %v3554_v55 = vcombine.low %v4128_v28, %v1493_v19  ;;  %v684_v9 = vadd.s32 216, %v6541_v25  ;;  %vm849_vm4 = vcmask 654848   ;;  %v1165_v48 = vrot.slane %v1163_v3, 7 }
 0x170   : > { %1370 = vrot.lane.b32.xlu0 %v1330_v54, %s3973_s23  ;;  %vm1134_vm11 = vcmp.ne.s16.totalorder %v5318_v13, 0  ;;  %v2033_v60 = vshrl.u32 %v5349_v63, 16  ;;  %v1176_v52 = vor.u32 %v1174_v31, %v5351_v43  ;;  %v1161_v19 = vrot.slane %v1159_v35, 7 }
 0x171   : > { %v1644_v54 = vshrl.u32 %v3554_v55, 16  ;;  %v1647_v22 = vshll.u32 %v3554_v55, 16  ;;  %v716_v59 = vand.u32 15, %v684_v9  ;;  %v1168_v46 = vor.u32 %v1166_v10, %v1165_v48 }
 0x172   : > { %v1795_v33 = vor.u32 %v1793_v2, %v5361_v37  ;;  %v5375_v3 = vrot.slane %v1797_v27, 1  ;;  %v5377_v24 = vrot.slane %v2211_v57, 1  ;;  %v5382_v31 = vsel %vm1134_vm11, %v6542_v34, 0 }
 0x173   : > { %1376 = vrot.lane.b32.xlu1 %v6542_v34, %s3973_s23  ;;  %v5384_v55 = vrot.slane %v1644_v54, 7  ;;  %vm780_vm15 = vcmp.le.s32.totalorder %v716_v59, 14  ;;  %v2215_v38 = vshrl.u32 %v2159_v4, 16  ;;  %v2458_v10 = vshll.u32 %v5255_v20, 16  ;;  %v6548_v54 = vld [vmem:[#allocation31_spill] sm:$0xff]  ;;  %v6549_v4 = vld [vmem:[#allocation28_spill] sm:$0xff] }
 0x174   : > { %819 = vrot.lane.b32.xlu0 %v6546_v18, %s3975_s30  ;;  %v804_v9 = vpop.permute.xlu0 %803  ;;  %v2036_v18 = vshll.u32 %v5349_v63, 16  ;;  %vm1463_vm3 = vmpackc.low %vm780_vm15, %vm780_vm15  ;;  %v5389_v35 = vrot.slane %v2033_v60, 7  ;;  %v1177_v2 = vsel %vm1157_vm9, %v1165_v48, %v1176_v52  ;;  %v2822_v63 = vshrl.u32 %v5186_v7, 16  ;;  %v5400_v59 = vld [vmem:[#allocation2 + $0x78] sm:$0xff] }
 0x175   : > { %851 = vst.msk [vmem:[#allocation3 + $0x10] sm:$0xff] %vm849_vm4, %v804_v9  ;;  %v1649_v27 = vor.u32 %v1647_v22, %v5384_v55  ;;  %v1495_v57 = vsel %vm1463_vm3, 65537, %v6500_v21  ;;  %v2025_v20 = vshrl.u32 %v5382_v31, 16  ;;  %v6550_v60 = vld [vmem:[#allocation14_spill] sm:$0xff]  ;;  %v1169_v22 = vsel %vm1157_vm9, %v1161_v19, %v1168_v46 }
 0x176   : > { %6547 = vst [vmem:[#allocation10_spill] sm:$0xff] %v5389_v35  ;;  %1307 = vst.msk [vmem:[#allocation3 + $0x10] sm:$0xff] %vm635_vm1, %v1177_v2  ;;  %v3555_v48 = vcombine.low %v4128_v28, %v1495_v57  ;;  %v1024_v52 = vshrl.u32 %v6550_v60, 16  ;;  %v1800_v9 = vsel %vm995_vm12, %v1795_v33, %v5375_v3  ;;  %v2460_v17 = vor.u32 %v2458_v10, %v5305_v62  ;;  %v869_v57 = vld [vmem:[#allocation2 + $0x18] sm:$0xff] }
 0x177   : > { %825 = vrot.lane.b32.xlu1 %v6548_v54, %s3975_s30  ;;  %v2217_v54 = vor.u32 %v2215_v38, %v5377_v24  ;;  %v5411_v7 = vsel %vm1157_vm9, %v5077_v23, %v1649_v27  ;;  %v2395_v2 = vsel %vm6437_vm13, %v6542_v34, 0  ;;  %v2038_v33 = vor.u32 %v2036_v18, %v5389_v35 }
 0x178   : > { %2641 = vrot.lane.b32.xlu0 %v6549_v4, %s3976_s6  ;;  %v802_v4 = vpop.permute.xlu0 %801  ;;  %vm1687_vm5 = vcmp.ne.s16.totalorder %v5411_v7, 0  ;;  %v1652_v46 = vshrl.u32 %v3555_v48, 16  ;;  %v1655_v62 = vshll.u32 %v3555_v48, 16  ;;  %v2824_v19 = vor.u32 %v2822_v63, %v5202_v8 }
 0x179   : > { %850 = vst.msk [vmem:[#allocation3] sm:$0xff] %vm849_vm4, %v802_v4  ;;  %v2222_v38 = vsel %vm995_vm12, %v2217_v54, %v5037_v15  ;;  %v2725_v23 = vsel %vm1687_vm5, %v5400_v59, 0  ;;  %v5429_v10 = vrot.slane %v2025_v20, 7  ;;  %vm1402_vm8 = vcmask 261248  }
 0x17a   : > { %1306 = vst.msk [vmem:[#allocation3] sm:$0xff] %vm635_vm1, %v1169_v22  ;;  %v2826_v27 = vshll.u32 %v2725_v23, 16  ;;  %v2479_v15 = vshrl.u32 %v2395_v2, 16  ;;  %v1143_v18 = vsel %vm1126_vm10, %v869_v57, 0  ;;  %v5435_v48 = vrot.slane %v1652_v46, 7  ;;  %v6551_v22 = vld [vmem:[#allocation35_spill] sm:$0xff] }
 0x17b   : > { %1861 = vrot.lane.b32.xlu1 %v1800_v9, %s3977_s15  ;;  %1403 = vst.msk [vmem:[#allocation3] sm:$0xff] %vm1402_vm8, %v5359_v50  ;;  %v683_v60 = vadd.s32 208, %v6541_v25  ;;  %v2039_v20 = vsel %vm1157_vm9, %v5429_v10, %v2038_v33  ;;  %v2461_v9 = vsel %vm1157_vm9, %v6551_v22, %v2460_v17  ;;  %v6552_v50 = vld [vmem:[#allocation16_spill] sm:$0xff]  ;;  %vm6553_vm10 = vcmp.ne.s16.totalorder %v4548_v44, 0 }
 0x17c   : > { %2313 = vrot.lane.b32.xlu0 %v2222_v38, %s3980_s16  ;;  %v5438_v8 = vpop.permute.xlu0 %2631  ;;  %v2828_v63 = vrot.slane %v2826_v27, 1  ;;  %v1657_v54 = vor.u32 %v1655_v62, %v5435_v48  ;;  %v1026_v4 = vor.u32 %v1024_v52, %v6552_v50  ;;  %v5451_v29 = vsel %vm6553_vm10, %v4949_v49, 0  ;;  %v5456_v27 = vld [vmem:[#allocation2 + $0x30] sm:$0xff]  ;;  %v6556_v22 = vld [vmem:[#allocation12_spill] sm:$0xff] }
 0x17d   : > { %v1179_v57 = vshrl.u32 %v1143_v18, 16  ;;  %v2830_v38 = vshrl.u32 %v2725_v23, 16  ;;  %v5454_v33 = vrot.slane %v2479_v15, 7  ;;  %v2482_v17 = vshll.u32 %v2395_v2, 16  ;;  %v5474_v2 = vld [vmem:[#allocation2 + $0x80] sm:$0xff] }
 0x17e   : > { %v2829_v46 = vsel %vm995_vm12, %v2824_v19, %v2828_v63  ;;  %v5461_v52 = vsel %vm1157_vm9, %v5384_v55, %v1657_v54  ;;  %v715_v62 = vand.u32 15, %v683_v60  ;;  %v2164_v44 = vsel %vm1685_vm6, %v6542_v34, 0  ;;  %6554 = vst [vmem:[#allocation24_spill] sm:$0xff] %v5474_v2  ;;  %v5493_v60 = vld [vmem:[#allocation2 + $0x28] sm:$0xff] }
 0x17f   : > { %2094 = vrot.lane.b32.xlu1 %v2039_v20, %s3978_s25  ;;  %2889 = vst.msk [vmem:[#allocation3 + $0xb8] sm:$0xff] %vm635_vm1, %v2829_v46  ;;  %v5471_v23 = vsel %vm1686_vm0, %v5160_v1, 0  ;;  %vm6439_vm15 = vcmp.ne.s16.totalorder %v5461_v52, 0  ;;  %v685_v19 = vadd.s32 224, %v6541_v25  ;;  %v2471_v55 = vshrl.u32 %v5451_v29, 16 }
 0x180   : > { %2546 = vrot.lane.b32.xlu0 %v2461_v9, %s3979_s8  ;;  %v5463_v20 = vpop.permute.xlu0 %1358  ;;  %v5481_v15 = vsel %vm6439_vm15, %v5474_v2, 0  ;;  %v5485_v34 = vsel %vm995_vm12, %v1026_v4, %v6555_v47  ;;  %v5491_v41 = vrot.slane %v1179_v57, 7  ;;  %vm6557_vm6 = vcmp.ne.s16.totalorder %v6556_v22, 0 }
 0x181   : > { %v1146_v9 = vsel %vm6557_vm6, %v5456_v27, 0  ;;  %v2832_v54 = vor.u32 %v2830_v38, %v2828_v63  ;;  %v2834_v50 = vshll.u32 %v5481_v15, 16  ;;  %v2484_v4 = vor.u32 %v2482_v17, %v5454_v33  ;;  %v6560_v63 = vld [vmem:[#allocation11_spill] sm:$0xff] }
 0x182   : > { %v2251_v46 = vshll.u32 %v2164_v44, 16  ;;  %v2259_v47 = vshll.u32 %v5471_v23, 16  ;;  %vm5501_vm0 = vcmp.ge.s32.totalorder %v715_v62, 1  ;;  %v1182_v57 = vshll.u32 %v1143_v18, 16  ;;  %v870_v62 = vld [vmem:[#allocation2 + $0x20] sm:$0xff] }
 0x183   : > { %2655 = vrot.lane.b32.xlu1 %v5400_v59, %s3976_s6  ;;  %v5505_v35 = vrot.slane %v2834_v50, 1  ;;  %v717_v53 = vand.u32 15, %v685_v19  ;;  %v2473_v22 = vrot.slane %v2471_v55, 7  ;;  %vm6561_vm3 = vcmp.ne.s16.totalorder %v6560_v63, 0 }
 0x184   : > { %1374 = vrot.lane.b32.xlu0 %v4949_v49, %s3973_s23  ;;  %v808_v49 = vpop.permute.xlu0 %807  ;;  %v5511_v38 = vsel %vm6561_vm3, %v5493_v60, 0  ;;  %v1203_v17 = vshrl.u32 %v1146_v9, 16  ;;  %vm1127_vm10 = vcmp.ne.s16.totalorder %v5485_v34, 0  ;;  %v1184_v18 = vor.u32 %v1182_v57, %v5491_v41  ;;  %vm909_vm3 = vmpackc.low %vm5501_vm0, %vm5501_vm0 }
 0x185   : > { %853 = vst.msk [vmem:[#allocation3 + $0x30] sm:$0xff] %vm849_vm4, %v808_v49  ;;  %6562 = vst [vmem:[#allocation15_spill] sm:$0xff] %v5511_v38  ;;  %vm1889_vm6 = vcmask 392448   ;;  %v2255_v19 = vshrl.u32 %v2164_v44, 16  ;;  %v2837_v55 = vsel %vm995_vm12, %v2832_v54, %v5505_v35  ;;  %v2485_v50 = vsel %vm1157_vm9, %v2473_v22, %v2484_v4 }
 0x186   : > { %v1776_v49 = vsel %vm995_vm12, %v5274_v51, %v5118_v14  ;;  %v5528_v63 = vrot.slane %v2251_v46, 1  ;;  %2890 = vst.msk [vmem:[#allocation3 + $0xc8] sm:$0xff] %vm635_vm1, %v2837_v55  ;;  %v1195_v57 = vshrl.u32 %v5511_v38, 16  ;;  %vm5534_vm13 = vcmp.ge.s32.totalorder %v717_v53, 1 }
 0x187   : > { %1382 = vrot.lane.b32.xlu1 %v5400_v59, %s3973_s23  ;;  %v1144_v2 = vsel %vm1127_vm10, %v870_v62, 0  ;;  %v5543_v14 = vsel %vm1679_vm2, %v5456_v27, 0  ;;  %v5546_v51 = vrot.slane %v1203_v17, 7  ;;  %v941_v4 = vsel %vm909_vm3, 65537, %v6500_v21  ;;  %vm911_vm2 = vmpackc.low %vm5534_vm13, %vm5534_vm13 }
 0x188   : > { %2084 = vrot.lane.b32.xlu0 %v5250_v58, %s3978_s25  ;;  %v5530_v58 = vrot.slane %v2259_v47, 1  ;;  %v1357_v44 = vpop.permute.xlu0 %1356  ;;  %v1187_v46 = vshrl.u32 %v1144_v2, 16  ;;  %v2199_v53 = vshrl.u32 %v5225_v45, 16  ;;  %v1185_v47 = vsel %vm1157_vm9, %v5351_v43, %v1184_v18 }
 0x189   : > { %1404 = vst.msk [vmem:[#allocation3 + $0x10] sm:$0xff] %vm1402_vm8, %v1357_v44  ;;  %v2257_v5 = vor.u32 %v2255_v19, %v5528_v63  ;;  %v1206_v62 = vshll.u32 %v1146_v9, 16  ;;  %v2203_v55 = vshll.u32 %v5543_v14, 16  ;;  %v2474_v17 = vshll.u32 %v5451_v29, 16 }
 0x18a   : > { %v5560_v44 = vrot.slane %v1187_v46, 7  ;;  %v1190_v45 = vshll.u32 %v1144_v2, 16  ;;  %v5566_v43 = vsel %vm1687_vm5, %v5160_v1, 0  ;;  %v5571_v9 = vsel %vm1134_vm11, %v5160_v1, 0 }
 0x18b   : > { %2552 = vrot.lane.b32.xlu1 %v2485_v50, %s3979_s8  ;;  %v2201_v50 = vor.u32 %v2199_v53, %v5276_v32  ;;  %v5574_v29 = vcombine.low %v941_v4, %v4128_v28  ;;  %v5576_v18 = vrot.slane %v2203_v55, 1  ;;  %v5579_v32 = vld [vmem:[#allocation2 + $0x50] sm:$0xff]  ;;  %v5581_v2 = vrot.slane %v1195_v57, 7 }
 0x18c   : > { %1855 = vrot.lane.b32.xlu0 %v1776_v49, %s3977_s15  ;;  %v806_v49 = vpop.permute.xlu0 %805  ;;  %v1208_v46 = vor.u32 %v1206_v62, %v5546_v51  ;;  %v1801_v53 = vshrl.u32 %v5335_v6, 16  ;;  %v1192_v38 = vor.u32 %v1190_v45, %v5560_v44  ;;  %v2247_v1 = vshrl.u32 %v5283_v36, 16  ;;  %v6565_v4 = vld [vmem:[#allocation21_spill] sm:$0xff] }
 0x18d   : > { %852 = vst.msk [vmem:[#allocation3 + $0x20] sm:$0xff] %vm849_vm4, %v806_v49  ;;  %v814_v19 = vpop.permute.xlu1 %813  ;;  %v943_v6 = vsel %vm911_vm2, 65537, %v6500_v21  ;;  %v5601_v57 = vsel %vm995_vm12, %v2201_v50, %v5576_v18  ;;  %v2476_v62 = vor.u32 %v2474_v17, %v2473_v22  ;;  %v2487_v36 = vshrl.u32 %v5571_v9, 16 }
 0x18e   : > { %1308 = vst.msk [vmem:[#allocation3 + $0x20] sm:$0xff] %vm635_vm1, %v1185_v47  ;;  %v1211_v47 = vshrl.u32 %v6565_v4, 16  ;;  %v1193_v55 = vsel %vm1157_vm9, %v5491_v41, %v1192_v38  ;;  %v1096_v45 = vshrl.u32 %v5217_v0, 16  ;;  %v1100_v49 = vshll.u32 %v5574_v29, 16 }
 0x18f   : > { %856 = vst.msk [vmem:[#allocation3 + $0x60] sm:$0xff] %vm849_vm4, %v814_v19  ;;  %831 = vrot.lane.b32.xlu1 %v5086_v11, %s3975_s30  ;;  %v1805_v11 = vshll.u32 %v5566_v43, 16  ;;  %v1214_v19 = vshll.u32 %v6565_v4, 16  ;;  %v2238_v41 = vsel %vm995_vm12, %v5303_v26, %v5307_v39  ;;  %v1803_v22 = vor.u32 %v1801_v53, %v5375_v3 }
 0x190   : > { %2645 = vrot.lane.b32.xlu0 %v5579_v32, %s3976_s6  ;;  %1405 = vst.msk [vmem:[#allocation3 + $0x20] sm:$0xff] %vm1402_vm8, %v5463_v20  ;;  %v1842_v54 = vpop.permute.xlu0 %1841  ;;  %v5613_v50 = vrot.slane %v1211_v47, 7  ;;  %v2262_v20 = vsel %vm995_vm12, %v2257_v5, %v5530_v58  ;;  %v5624_v0 = vcombine.low %v943_v6, %v4128_v28  ;;  %v1209_v38 = vsel %vm1157_vm9, %v5581_v2, %v1208_v46 }
 0x191   : > { %1309 = vst.msk [vmem:[#allocation3 + $0x30] sm:$0xff] %vm635_vm1, %v1193_v55  ;;  %v2263_v17 = vshrl.u32 %v5471_v23, 16  ;;  %v2249_v5 = vor.u32 %v2247_v1, %v5329_v30  ;;  %v5633_v47 = vrot.slane %v1805_v11, 1  ;;  %v2477_v26 = vsel %vm1157_vm9, %v5264_v61, %v2476_v62 }
 0x192   : > { %1890 = vst.msk [vmem:[#allocation3] sm:$0xff] %vm1889_vm6, %v1842_v54  ;;  %v1216_v4 = vor.u32 %v1214_v19, %v5613_v50  ;;  %v5637_v39 = vrot.slane %v2487_v36, 7  ;;  %v2490_v3 = vshll.u32 %v5571_v9, 16  ;;  %v1098_v46 = vor.u32 %v1096_v45, %v5271_v16  ;;  %v874_v45 = vld [vmem:[#allocation2 + $0x40] sm:$0xff] }
 0x193   : > { %2323 = vrot.lane.b32.xlu1 %v2262_v20, %s3980_s16  ;;  %v1102_v55 = vrot.slane %v1100_v49, 1  ;;  %v1104_v23 = vshrl.u32 %v5574_v29, 16  ;;  %v1808_v61 = vsel %vm995_vm12, %v1803_v22, %v5633_v47  ;;  %v1108_v1 = vshll.u32 %v5624_v0, 16 }
 0x194   : > { %2317 = vrot.lane.b32.xlu0 %v2238_v41, %s3980_s16  ;;  %v5640_v53 = vpop.permute.xlu1 %2082  ;;  %v812_v6 = vpop.permute.xlu0 %811  ;;  %v1217_v30 = vsel %vm1157_vm9, %v5546_v51, %v1216_v4  ;;  %v2207_v9 = vshrl.u32 %v5543_v14, 16  ;;  %v686_v11 = vadd.s32 232, %v6541_v25  ;;  %v1792_v16 = vsel %vm995_vm12, %v5342_v42, %v5361_v37 }
 0x195   : > { %6566 = vst [vmem:[#allocation30_spill] sm:$0xff] %v5640_v53  ;;  %855 = vst.msk [vmem:[#allocation3 + $0x50] sm:$0xff] %vm849_vm4, %v812_v6  ;;  %v5660_v51 = vor.u32 %v2263_v17, %v5530_v58  ;;  %v5664_v14 = vsel %vm995_vm12, %v2249_v5, %v5528_v63  ;;  %v5669_v29 = vsel %vm1687_vm5, %v5176_v40, 0  ;;  %v5674_v62 = vsel %vm1135_vm14, %v5176_v40, 0 }
 0x196   : > { %1312 = vst.msk [vmem:[#allocation3 + $0x60] sm:$0xff] %vm635_vm1, %v1217_v30  ;;  %1311 = vst.msk [vmem:[#allocation3 + $0x50] sm:$0xff] %vm635_vm1, %v1209_v38  ;;  %v718_v36 = vand.u32 15, %v686_v11  ;;  %v2209_v42 = vor.u32 %v2207_v9, %v5576_v18  ;;  %v2492_v63 = vor.u32 %v2490_v3, %v5637_v39  ;;  %v5683_v54 = vsel %vm995_vm12, %v1098_v46, %v1102_v55 }
 0x197   : > { %1863 = vrot.lane.b32.xlu1 %v1808_v61, %s3977_s15  ;;  %v2028_v7 = vshll.u32 %v5382_v31, 16  ;;  %v688_v49 = vadd.s32 248, %v6541_v25  ;;  %v1106_v19 = vor.u32 %v1104_v23, %v1102_v55  ;;  %v5687_v20 = vrot.slane %v1108_v1, 1 }
 0x198   : > { %2550 = vrot.lane.b32.xlu0 %v2477_v26, %s3979_s8  ;;  %v5677_v37 = vpop.permute.xlu1 %2643  ;;  %v5679_v58 = vpop.permute.xlu0 %2534  ;;  %vm782_vm13 = vcmp.le.s32.totalorder %v718_v36, 14  ;;  %v5691_v18 = vsel %vm995_vm12, %v2209_v42, %v5377_v24  ;;  %vm2120_vm5 = vcmask 523648   ;;  %v2267_v31 = vshll.u32 %v5669_v29, 16 }
 0x199   : > { %6567 = vst [vmem:[#allocation23_spill] sm:$0xff] %v5677_v37  ;;  %6568 = vst [vmem:[#allocation8_spill] sm:$0xff] %v5691_v18  ;;  %v5702_v22 = vsel %vm1127_vm10, %v5493_v60, 0  ;;  %v720_v38 = vand.u32 15, %v688_v49  ;;  %v1809_v24 = vshrl.u32 %v5566_v43, 16  ;;  %vm1136_vm3 = vcmp.ne.s16.totalorder %v5683_v54, 0 }
 0x19a   : > { %vm1465_vm0 = vmpackc.low %vm782_vm13, %vm782_vm13  ;;  %v5708_v5 = vsel %vm1131_vm7, %v874_v45, 0  ;;  %v5718_v3 = vsel %vm6439_vm15, %v5176_v40, 0  ;;  %v5723_v43 = vsel %vm1136_vm3, %v5400_v59, 0  ;;  %v5728_v46 = vsel %vm1157_vm9, %v5454_v33, %v2492_v63  ;;  %v6571_v49 = vld [vmem:[#allocation38_spill] sm:$0xff] }
 0x19b   : > { %2653 = vrot.lane.b32.xlu1 %v5176_v40, %s3976_s6  ;;  %vm784_vm7 = vcmp.le.s32.totalorder %v720_v38, 14  ;;  %v5731_v55 = vor.u32 %v2028_v7, %v5429_v10  ;;  %v5735_v23 = vsel %vm995_vm12, %v1106_v19, %v5687_v20  ;;  %v1969_v30 = vshrl.u32 %v5702_v22, 16 }
 0x19c   : > { %2088 = vrot.lane.b32.xlu0 %v5355_v56, %s3978_s25  ;;  %v1497_v56 = vsel %vm1465_vm0, 65537, %v6500_v21  ;;  %v5713_v26 = vpop.permute.xlu0 %2074  ;;  %vm1467_vm2 = vmpackc.low %vm784_vm7, %vm784_vm7  ;;  %vm2351_vm13 = vcmask 786048   ;;  %v1219_v61 = vshrl.u32 %v5708_v5, 16  ;;  %v5743_v9 = vrot.slane %v2267_v31, 1 }
 0x19d   : > { %v5711_v4 = vpop.permute.xlu1 %1851  ;;  %v3556_v6 = vcombine.low %v4128_v28, %v1497_v56  ;;  %v1499_v10 = vsel %vm1467_vm2, 65537, %v6500_v21  ;;  %vm2582_vm0 = vcmask 917248   ;;  %v1813_v11 = vshll.u32 %v5718_v3, 16 }
 0x19e   : > { %v2503_v36 = vshrl.u32 %v5723_v43, 16  ;;  %v3557_v42 = vcombine.low %v4128_v28, %v1499_v10  ;;  %vm6440_vm7 = vcmask 1048448   ;;  %vm1137_vm15 = vcmp.ne.s16.totalorder %v5735_v23, 0  ;;  %v3906_v10 = vld [vmem:[#allocation2 + $0x60] sm:$0xff] }
 0x19f   : > { %1380 = vrot.lane.b32.xlu1 %v5176_v40, %s3973_s23  ;;  %v1660_v33 = vshrl.u32 %v3556_v6, 16  ;;  %v1663_v1 = vshll.u32 %v3556_v6, 16  ;;  %v1227_v19 = vshrl.u32 %v6571_v49, 16  ;;  %v2506_v31 = vshll.u32 %v5723_v43, 16  ;;  %v6572_v6 = vld [vmem:[#allocation39_spill] sm:$0xff] }
 0x1a0   : > { %1859 = vrot.lane.b32.xlu0 %v1792_v16, %s3977_s15  ;;  %v5750_v7 = vpop.permute.xlu0 %2635  ;;  %v1811_v16 = vor.u32 %v1809_v24, %v5633_v47  ;;  %v5759_v38 = vsel %vm1137_vm15, %v5400_v59, 0  ;;  %v1668_v17 = vshrl.u32 %v3557_v42, 16  ;;  %v1671_v56 = vshll.u32 %v3557_v42, 16  ;;  %v878_v47 = vld [vmem:[#allocation2 + $0x60] sm:$0xff]  ;;  %v5774_v42 = vld [vmem:[#allocation2 + $0x88] sm:$0xff] }
 0x1a1   : > { %v5748_v63 = vpop.permute.xlu1 %1368  ;;  %6570 = vst [vmem:[#allocation7_spill] sm:$0xff] %v5750_v7  ;;  %v1662_v45 = vrot.slane %v1660_v33, 7  ;;  %v5764_v24 = vrot.slane %v1219_v61, 7  ;;  %v5766_v41 = vrot.slane %v1227_v19, 7  ;;  %v1230_v43 = vshll.u32 %v6571_v49, 16 }
 0x1a2   : > { %v5769_v37 = vrot.slane %v1813_v11, 1  ;;  %v2838_v7 = vshrl.u32 %v5481_v15, 16  ;;  %v5772_v18 = vrot.slane %v2503_v36, 7  ;;  %v2270_v61 = vsel %vm995_vm12, %v5660_v51, %v5743_v9 }
 0x1a3   : > { %829 = vrot.lane.b32.xlu1 %v6572_v6, %s3975_s30  ;;  %v1665_v33 = vor.u32 %v1663_v1, %v1662_v45  ;;  %v5776_v6 = vrot.slane %v1668_v17, 7  ;;  %v1972_v1 = vshll.u32 %v5702_v22, 16  ;;  %v1232_v15 = vor.u32 %v1230_v43, %v5766_v41 }
 0x1a4   : > { %2649 = vrot.lane.b32.xlu0 %v3906_v10, %s3976_s6  ;;  %v2073_v10 = vpop.permute.xlu0 %2072  ;;  %v2049_v36 = vshrl.u32 %v5759_v38, 16  ;;  %v1152_v49 = vsel %vm1135_vm14, %v878_v47, 0  ;;  %v1816_v19 = vsel %vm995_vm12, %v1811_v16, %v5769_v37  ;;  %v2840_v17 = vor.u32 %v2838_v7, %v5505_v35  ;;  %v5824_v7 = vld [vmem:[#allocation2 + $0x90] sm:$0xff] }
 0x1a5   : > { %v818_v53 = vpop.permute.xlu1 %817  ;;  %v5784_v11 = vsel %vm1157_vm9, %v5435_v48, %v1665_v33  ;;  %2121 = vst.msk [vmem:[#allocation3] sm:$0xff] %vm2120_vm5, %v2073_v10  ;;  %v1673_v51 = vor.u32 %v1671_v56, %v5776_v6  ;;  %v5800_v48 = vsel %vm1136_vm3, %v5176_v40, 0  ;;  %v1233_v22 = vsel %vm1157_vm9, %v5764_v24, %v1232_v15  ;;  %v877_v33 = vld [vmem:[#allocation2 + $0x58] sm:$0xff]  ;;  %v6574_v15 = vld [vmem:[#allocation41_spill] sm:$0xff] }
 0x1a6   : > { %858 = vst.msk [vmem:[#allocation3 + $0x80] sm:$0xff] %vm849_vm4, %v818_v53  ;;  %vm1689_vm2 = vcmp.ne.s16.totalorder %v5784_v11, 0  ;;  %v5802_v53 = vrot.slane %v1969_v30, 7  ;;  %v2052_v47 = vshll.u32 %v5759_v38, 16  ;;  %v1251_v43 = vshrl.u32 %v1152_v49, 16 }
 0x1a7   : > { %2325 = vrot.lane.b32.xlu1 %v2270_v61, %s3980_s16  ;;  %v2727_v12 = vsel %vm1689_vm2, %v5774_v42, 0  ;;  %1314 = vst.msk [vmem:[#allocation3 + $0x80] sm:$0xff] %vm635_vm1, %v1233_v22  ;;  %v5818_v61 = vsel %vm1157_vm9, %v1662_v45, %v1673_v51  ;;  %v5821_v16 = vrot.slane %v2049_v36, 7  ;;  %v6573_v45 = vshrl.u32 %v5674_v62, 16 }
 0x1a8   : > { %2321 = vrot.lane.b32.xlu0 %v5664_v14, %s3980_s16  ;;  %v2508_v14 = vor.u32 %v2506_v31, %v5772_v18  ;;  %v2842_v56 = vshll.u32 %v2727_v12, 16  ;;  %v2304_v30 = vpop.permute.xlu0 %2303  ;;  %v2846_v10 = vshrl.u32 %v2727_v12, 16  ;;  %vm1690_vm14 = vcmp.ne.s16.totalorder %v5818_v61, 0 }
 0x1a9   : > { %v5814_v40 = vpop.permute.xlu1 %1853  ;;  %2352 = vst.msk [vmem:[#allocation3] sm:$0xff] %vm2351_vm13, %v2304_v30  ;;  %v687_v31 = vadd.s32 240, %v6541_v25  ;;  %v2497_v38 = vrot.slane %v6573_v45, 7  ;;  %v2031_v36 = vsel %vm1157_vm9, %v6574_v15, %v5731_v55  ;;  %v2389_v51 = vsel %vm1127_vm10, %v5456_v27, 0  ;;  %v2712_v15 = vld [vmem:[#allocation2 + $0x98] sm:$0x1] }
 0x1aa   : > { %v2844_v35 = vrot.slane %v2842_v56, 1  ;;  %2583 = vst.msk [vmem:[#allocation3] sm:$0xff] %vm2582_vm0, %v5679_v58  ;;  %v2728_v25 = vsel %vm1690_vm14, %v5824_v7, 0  ;;  %v2041_v58 = vshrl.u32 %v5800_v48, 16  ;;  %v5849_v12 = vsel %vm1134_vm11, %v877_v33, 0 }
 0x1ab   : > { %1865 = vrot.lane.b32.xlu1 %v1816_v19, %s3977_s15  ;;  %2680 = vst.msk [vmem:[#allocation3] sm:$0xff] %vm6440_vm7, %v5438_v8  ;;  %v5854_v19 = vrot.slane %v1251_v43, 7  ;;  %v1254_v56 = vshll.u32 %v1152_v49, 16  ;;  %v2850_v8 = vshll.u32 %v2728_v25, 16  ;;  %v2054_v13 = vor.u32 %v2052_v47, %v5821_v16  ;;  %v6575_v43 = vld [vmem:[#allocation20_spill] sm:$0xff] }
 0x1ac   : > { %2554 = vrot.lane.b32.xlu0 %v5728_v46, %s3979_s8  ;;  %v1974_v46 = vor.u32 %v1972_v1, %v5802_v53  ;;  %v2845_v55 = vsel %vm995_vm12, %v2840_v17, %v2844_v35  ;;  %v2848_v30 = vor.u32 %v2846_v10, %v2844_v35  ;;  %v2509_v1 = vsel %vm1157_vm9, %v2497_v38, %v2508_v14 }
 0x1ad   : > { %v5852_v22 = vpop.permute.xlu1 %2086  ;;  %2891 = vst.msk [vmem:[#allocation3 + $0xd8] sm:$0xff] %vm635_vm1, %v2845_v55  ;;  %v2431_v33 = vshrl.u32 %v2389_v51, 16  ;;  %v719_v45 = vand.u32 15, %v687_v31  ;;  %v2852_v49 = vrot.slane %v2850_v8, 1  ;;  %v2043_v17 = vrot.slane %v2041_v58, 7 }
 0x1ae   : > { %v1844_v34 = vpop.permute.xlu0 %1843  ;;  %v1975_v10 = vsel %vm1157_vm9, %v6575_v43, %v1974_v46  ;;  %v1243_v35 = vshrl.u32 %v5849_v12, 16  ;;  %v1256_v31 = vor.u32 %v1254_v56, %v5854_v19  ;;  %vm1691_vm10 = vcmp.ne.s16.totalorder %v5776_v6, 0  ;;  %v6580_v46 = vld [vmem:[#allocation15_spill] sm:$0xff] }
 0x1af   : > { %1891 = vst.msk [vmem:[#allocation3 + $0x10] sm:$0xff] %vm1889_vm6, %v1844_v34  ;;  %2558 = vrot.lane.b32.xlu1 %v2509_v1, %s3979_s8  ;;  %v2853_v55 = vsel %vm995_vm12, %v2848_v30, %v2852_v49  ;;  %v2854_v34 = vshrl.u32 %v2728_v25, 16  ;;  %v5875_v58 = vrot.slane %v2431_v33, 7  ;;  %vm5878_vm11 = vcmp.ge.s32.totalorder %v719_v45, 1  ;;  %v2897_v30 = vld [vmem:[#allocation3 + $0x18] sm:$0xff] }
 0x1b0   : > { %2122 = vst.msk [vmem:[#allocation3 + $0x10] sm:$0xff] %vm2120_vm5, %v5713_v26  ;;  %2092 = vrot.lane.b32.xlu0 %v2031_v36, %s3978_s25  ;;  %v2498_v26 = vshll.u32 %v5674_v62, 16  ;;  %v2055_v36 = vsel %vm1157_vm9, %v2043_v17, %v2054_v13  ;;  %v2729_v25 = vsel %vm1691_vm10, %v2712_v15, 0  ;;  %v1245_v56 = vrot.slane %v1243_v35, 7  ;;  %vm913_vm7 = vmpackc.low %vm5878_vm11, %vm5878_vm11 }
 0x1b1   : > { %v5867_v14 = vpop.permute.xlu1 %2647  ;;  %2892 = vst.msk [vmem:[#allocation3 + $0xe8] sm:$0xff] %vm635_vm1, %v2853_v55  ;;  %v2434_v8 = vshll.u32 %v2389_v51, 16  ;;  %v2856_v33 = vor.u32 %v2854_v34, %v2852_v49  ;;  %v2858_v45 = vshll.u32 %v2729_v25, 16  ;;  %v2044_v51 = vshll.u32 %v5800_v48, 16  ;;  %v6579_v34 = vld [vmem:[#allocation40_spill] sm:$0xff] }
 0x1b2   : > { %v5869_v47 = vpop.permute.xlu0 %2633  ;;  %v2894_v62 = vld [vmem:[#allocation3] sm:$0xff]  ;;  %v1257_v43 = vsel %vm1157_vm9, %v1245_v56, %v1256_v31  ;;  %v945_v15 = vsel %vm913_vm7, 65537, %v6500_v21  ;;  %vm6578_vm11 = vcmp.ne.s16.totalorder %v5461_v52, 0  ;;  %v2271_v21 = vshrl.u32 %v5669_v29, 16 }
 0x1b3   : > { %2098 = vrot.lane.b32.xlu1 %v2055_v36, %s3978_s25  ;;  %3086 = vmatmul.mubr.bf16.vlgmr.msra.gmra.mrb[32].mxu0 %v2894_v62  ;;  %v2436_v35 = vor.u32 %v2434_v8, %v5875_v58  ;;  %v2860_v49 = vrot.slane %v2858_v45, 1  ;;  %v2046_v36 = vor.u32 %v2044_v51, %v2043_v17  ;;  %v5920_v52 = vcombine.low %v945_v15, %v4128_v28  ;;  %v6581_v17 = vld [vmem:[#allocation33_spill] sm:$0xff] }
 0x1b4   : > { %2078 = vrot.lane.b32.xlu0 %v1975_v10, %s3978_s25  ;;  %3569 = vmatprep.mubr.msk.bf16.mxu0 %vm635_vm1, %v2897_v30  ;;  %v2500_v10 = vor.u32 %v2498_v26, %v2497_v38  ;;  %v5907_v38 = vsel %vm6578_vm11, %v5400_v59, 0  ;;  %v1198_v62 = vshll.u32 %v6580_v46, 16  ;;  %vm6582_vm7 = vcmp.ne.s16.totalorder %v6581_v17, 0  ;;  %v6586_v46 = vld [vmem:[#allocation22_spill] sm:$0xff] }
 0x1b5   : > { %v824_v1 = vpop.permute.xlu1 %823  ;;  %v2861_v48 = vsel %vm995_vm12, %v2856_v33, %v2860_v49  ;;  %v2275_v25 = vshll.u32 %v5907_v38, 16  ;;  %v5929_v29 = vsel %vm6582_vm7, %v5579_v32, 0  ;;  %v5934_v8 = vsel %vm1689_vm2, %v5400_v59, 0 }
 0x1b6   : > { %v1361_v13 = vpop.permute.xlu0 %1360  ;;  %861 = vst.msk [vmem:[#allocation3 + $0xb0] sm:$0xff] %vm849_vm4, %v824_v1  ;;  %v2501_v26 = vsel %vm1157_vm9, %v5637_v39, %v2500_v10  ;;  %v1200_v28 = vor.u32 %v1198_v62, %v5581_v2  ;;  %v6583_v1 = vld [vmem:[#allocation10_spill] sm:$0xff]  ;;  %v2273_v33 = vor.u32 %v2271_v21, %v5743_v9  ;;  %v1246_v45 = vshll.u32 %v5849_v12, 16 }
 0x1b7   : > { %1406 = vst.msk [vmem:[#allocation3 + $0x30] sm:$0xff] %vm1402_vm8, %v1361_v13  ;;  %2659 = vrot.lane.b32.xlu1 %v5774_v42, %s3976_s6  ;;  %v2047_v13 = vsel %vm1157_vm9, %v6583_v1, %v2046_v36  ;;  %v1112_v59 = vshrl.u32 %v5624_v0, 16  ;;  %v1116_v32 = vshll.u32 %v5920_v52, 16  ;;  %v2277_v10 = vrot.slane %v2275_v25, 1  ;;  %v880_v36 = vld [vmem:[#allocation2 + $0x70] sm:$0xff]  ;;  %v6587_v25 = vld [vmem:[#allocation19_spill] sm:$0xff] }
 0x1b8   : > { %1317 = vst.msk [vmem:[#allocation3 + $0xb0] sm:$0xff] %vm635_vm1, %v1257_v43  ;;  %2309 = vrot.lane.b32.xlu0 %v5601_v57, %s3980_s16  ;;  %v2437_v57 = vsel %vm1157_vm9, %v6579_v34, %v2436_v35  ;;  %2893 = vst.msk [vmem:[#allocation3 + $0xf8] sm:$0xff] %vm635_vm1, %v2861_v48  ;;  %v1817_v43 = vshrl.u32 %v5718_v3, 16  ;;  %v5950_v2 = vsel %vm1157_vm9, %v5560_v44, %v1200_v28  ;;  %v1235_v9 = vshrl.u32 %v5929_v29, 16  ;;  %v6585_v34 = vld [vmem:[#allocation29_spill] sm:$0xff] }
 0x1b9   : > { %v5902_v31 = vpop.permute.xlu1 %2544  ;;  %v1222_v12 = vshll.u32 %v5708_v5, 16  ;;  %v1821_v3 = vshll.u32 %v5934_v8, 16  ;;  %v1248_v0 = vor.u32 %v1246_v45, %v1245_v56  ;;  %v6584_v5 = vld [vmem:[#allocation18_spill] sm:$0xff]  ;;  %v1114_v15 = vor.u32 %v1112_v59, %v5687_v20 }
 0x1ba   : > { %v2306_v55 = vpop.permute.xlu0 %2305  ;;  %v1819_v44 = vor.u32 %v1817_v43, %v5769_v37  ;;  %v5967_v48 = vrot.slane %v1235_v9, 7  ;;  %v1745_v56 = vshrl.u32 %v6585_v34, 16  ;;  %v1120_v21 = vshrl.u32 %v5920_v52, 16  ;;  %v6591_v9 = vld [vmem:[#allocation34_spill] sm:$0xff] }
 0x1bb   : > { %2353 = vst.msk [vmem:[#allocation3 + $0x10] sm:$0xff] %vm2351_vm13, %v2306_v55  ;;  %2556 = vrot.lane.b32.xlu1 %v2501_v26, %s3979_s8  ;;  %v1224_v49 = vor.u32 %v1222_v12, %v5764_v24  ;;  %v1118_v55 = vrot.slane %v1116_v32, 1  ;;  %v1823_v26 = vrot.slane %v1821_v3, 1  ;;  %v1980_v62 = vshll.u32 %v6586_v46, 16 }
 0x1bc   : > { %2540 = vrot.lane.b32.xlu0 %v2437_v57, %s3979_s8  ;;  %v1249_v37 = vsel %vm1157_vm9, %v5967_v48, %v1248_v0  ;;  %v2279_v43 = vshrl.u32 %v5907_v38, 16  ;;  %v1154_v11 = vsel %vm1137_vm15, %v880_v36, 0  ;;  %v2442_v12 = vshll.u32 %v6591_v9, 16 }
 0x1bd   : > { %v5924_v39 = vpop.permute.xlu1 %2315  ;;  %v1824_v20 = vsel %vm995_vm12, %v1819_v44, %v1823_v26  ;;  %v5991_v52 = vsel %vm995_vm12, %v1114_v15, %v1118_v55  ;;  %v6012_v32 = vor.u32 %v1120_v21, %v1118_v55  ;;  %v1825_v0 = vshrl.u32 %v5934_v8, 16  ;;  %v879_v44 = vld [vmem:[#allocation2 + $0x68] sm:$0xff]  ;;  %v6592_v8 = vld [vmem:[#allocation30_spill] sm:$0xff] }
 0x1be   : > { %v1846_v30 = vpop.permute.xlu0 %1845  ;;  %v2281_v15 = vor.u32 %v2279_v43, %v2277_v10 }
 0x1bf   : > { %1892 = vst.msk [vmem:[#allocation3 + $0x20] sm:$0xff] %vm1889_vm6, %v1846_v30  ;;  %2096 = vrot.lane.b32.xlu1 %v2047_v13, %s3978_s25  ;;  %v6588_v30 = vld [vmem:[#allocation24_spill] sm:$0xff]  ;;  %v6589_v13 = vld [vmem:[#allocation27_spill] sm:$0xff]  ;;  %vm1139_vm11 = vcmp.ne.s16.totalorder %v6012_v32, 0 }
 0x1c0   : > { %2637 = vrot.lane.b32.xlu0 %v5456_v27, %s3976_s6  ;;  %v2278_v27 = vsel %vm995_vm12, %v2273_v33, %v2277_v10  ;;  %v5988_v17 = vsel %vm1689_vm2, %v6588_v30, 0  ;;  %v6590_v33 = vld [vmem:[#allocation25_spill] sm:$0xff]  ;;  %vm1138_vm2 = vcmp.ne.s16.totalorder %v5991_v52, 0  ;;  %v6055_v21 = vsel %vm1137_vm15, %v6588_v30, 0 }
 0x1c1   : > { %v5955_v35 = vpop.permute.xlu1 %1372  ;;  %v1982_v45 = vor.u32 %v1980_v62, %v6590_v33  ;;  %v2283_v59 = vshll.u32 %v5988_v17, 16  ;;  %v2400_v38 = vsel %vm1138_vm2, %v5774_v42, 0  ;;  %v6593_v10 = vld [vmem:[#allocation37_spill] sm:$0xff] }
 0x1c2   : > { %v1367_v51 = vpop.permute.xlu0 %1366  ;;  %v2519_v34 = vshrl.u32 %v2400_v38, 16  ;;  %v2522_v62 = vshll.u32 %v2400_v38, 16 }
 0x1c3   : > { %1409 = vst.msk [vmem:[#allocation3 + $0x60] sm:$0xff] %vm1402_vm8, %v1367_v51  ;;  %2327 = vrot.lane.b32.xlu1 %v2278_v27, %s3980_s16  ;;  %v1983_v27 = vsel %vm1157_vm9, %v5802_v53, %v1982_v45  ;;  %v6028_v55 = vrot.slane %v2283_v59, 1  ;;  %v1939_v53 = vsel %vm1139_vm11, %v5774_v42, 0  ;;  %v6082_v59 = vsel %vm1138_vm2, %v6588_v30, 0 }
 0x1c4   : > { %1896 = vst.msk [vmem:[#allocation3 + $0x60] sm:$0xff] %vm1889_vm6, %v5814_v40  ;;  %809 = vrot.lane.b32.xlu0 %v6584_v5, %s3975_s30  ;;  %v1225_v40 = vsel %vm1157_vm9, %v5613_v50, %v1224_v49  ;;  %v1747_v50 = vor.u32 %v1745_v56, %v6587_v25  ;;  %v1267_v5 = vshrl.u32 %v1154_v11, 16  ;;  %v2444_v56 = vor.u32 %v2442_v12, %v6593_v10 }
 0x1c5   : > { %v822_v57 = vpop.permute.xlu1 %821  ;;  %v2286_v54 = vsel %vm995_vm12, %v2281_v15, %v6028_v55  ;;  %v6060_v46 = vrot.slane %v2519_v34, 7  ;;  %v2065_v25 = vshrl.u32 %v1939_v53, 16  ;;  %v2068_v38 = vshll.u32 %v1939_v53, 16  ;;  %v2603_v15 = vld [vmem:[#allocation2 + $0x38] sm:$0xff] }
 0x1c6   : > { %v816_v24 = vpop.permute.xlu0 %815  ;;  %860 = vst.msk [vmem:[#allocation3 + $0xa0] sm:$0xff] %vm849_vm4, %v822_v57  ;;  %v6044_v57 = vsel %vm1136_vm3, %v879_v44, 0  ;;  %v6050_v36 = vrot.slane %v1267_v5, 7  ;;  %vm6594_vm3 = vcmask 1048448   ;;  %v2445_v43 = vsel %vm1157_vm9, %v5875_v58, %v2444_v56  ;;  %v6596_v56 = vld [vmem:[#allocation7_spill] sm:$0xff] }
 0x1c7   : > { %857 = vst.msk [vmem:[#allocation3 + $0x70] sm:$0xff] %vm849_vm4, %v816_v24  ;;  %1867 = vrot.lane.b32.xlu1 %v1824_v20, %s3977_s15  ;;  %v1270_v24 = vshll.u32 %v1154_v11, 16  ;;  %v1259_v23 = vshrl.u32 %v6044_v57, 16  ;;  %v2067_v61 = vrot.slane %v2065_v25, 7  ;;  %vm6597_vm15 = vmmov %vm6594_vm3  ;;  %v2514_v25 = vshll.u32 %v6055_v21, 16 }
 0x1c8   : > { %1316 = vst.msk [vmem:[#allocation3 + $0xa0] sm:$0xff] %vm635_vm1, %v1249_v37  ;;  %1313 = vst.msk [vmem:[#allocation3 + $0x70] sm:$0xff] %vm635_vm1, %v1225_v40  ;;  %1362 = vrot.lane.b32.xlu0 %v5493_v60, %s3973_s23  ;;  %v1752_v60 = vsel %vm995_vm12, %v1747_v50, %v6589_v13  ;;  %v1827_v40 = vor.u32 %v1825_v0, %v1823_v26  ;;  %v6595_v26 = vld [vmem:[#allocation8_spill] sm:$0xff]  ;;  %v2169_v50 = vsel %vm1690_vm14, %v5774_v42, 0  ;;  %v2511_v13 = vshrl.u32 %v6055_v21, 16 }
 0x1c9   : > { %1410 = vst.msk [vmem:[#allocation3 + $0x70] sm:$0xff] %vm1402_vm8, %v5748_v63  ;;  %v5995_v28 = vpop.permute.xlu1 %1857  ;;  %v6009_v63 = vsel %vm1690_vm14, %v6588_v30, 0  ;;  %v1272_v11 = vor.u32 %v1270_v24, %v6050_v36  ;;  %v2524_v42 = vor.u32 %v2522_v62, %v6060_v46  ;;  %v2291_v9 = vshll.u32 %v2169_v50, 16  ;;  %v2899_v24 = vld [vmem:[#allocation3 + $0x28] sm:$0xff]  ;;  %vm6598_vm14 = vmmov %vm6594_vm3 }
 0x1ca   : > { %v5997_v1 = vpop.permute.xlu0 %2538  ;;  %v1829_v49 = vshll.u32 %v6009_v63, 16  ;;  %v1261_v12 = vrot.slane %v1259_v23, 7  ;;  %v2295_v44 = vshrl.u32 %v2169_v50, 16  ;;  %v2070_v53 = vor.u32 %v2068_v38, %v2067_v61  ;;  %vm6602_vm7 = vmmov %vm6594_vm3 }
 0x1cb   : > { %2657 = vrot.lane.b32.xlu1 %v6588_v30, %s3976_s6  ;;  %v1238_v62 = vshll.u32 %v5929_v29, 16 }
 0x1cc   : > { %1849 = vrot.lane.b32.xlu0 %v1752_v60, %s3977_s15  ;;  %v6048_v20 = vrot.slane %v1829_v49, 1  ;;  %v2153_v60 = vld [vmem:[#allocation2 + $0x90] sm:$0x1] }
 0x1cd   : > { %v6021_v3 = vpop.permute.xlu1 %2090  ;;  %v2170_v58 = vsel %vm1691_vm10, %v2153_v60, 0  ;;  %v1240_v60 = vor.u32 %v1238_v62, %v5967_v48  ;;  %v2901_v48 = vld [vmem:[#allocation3 + $0x38] sm:$0xff] }
 0x1ce   : > { %v1365_v51 = vpop.permute.xlu0 %1364  ;;  %v2299_v10 = vshll.u32 %v2170_v58, 16 }
 0x1cf   : > { %1408 = vst.msk [vmem:[#allocation3 + $0x50] sm:$0xff] %vm1402_vm8, %v1365_v51  ;;  %1384 = vrot.lane.b32.xlu1 %v6588_v30, %s3973_s23  ;;  %v2513_v51 = vrot.slane %v2511_v13, 7  ;;  %v1273_v30 = vsel %vm1157_vm9, %v1261_v12, %v1272_v11  ;;  %v2401_v11 = vsel %vm1139_vm11, %v5824_v7, 0  ;;  %v1241_v61 = vsel %vm1157_vm9, %v5766_v41, %v1240_v60  ;;  %v1435_v41 = vld [vmem:[#allocation2 + $0x88] sm:$0x1] }
 0x1d0   : > { %1895 = vst.msk [vmem:[#allocation3 + $0x50] sm:$0xff] %vm1889_vm6, %v5711_v4  ;;  %2080 = vrot.lane.b32.xlu0 %v1983_v27, %s3978_s25  ;;  %v2057_v27 = vshrl.u32 %v6082_v59, 16  ;;  %v2301_v23 = vrot.slane %v2299_v10, 1  ;;  %v2527_v58 = vshrl.u32 %v2401_v11, 16 }
 0x1d1   : > { %2126 = vst.msk [vmem:[#allocation3 + $0x50] sm:$0xff] %vm2120_vm5, %v6592_v8  ;;  %v6046_v4 = vpop.permute.xlu1 %2651  ;;  %v2525_v5 = vsel %vm1157_vm9, %v2513_v51, %v2524_v42  ;;  %v6095_v8 = vrot.slane %v2291_v9, 1  ;;  %v2516_v21 = vor.u32 %v2514_v25, %v2513_v51 }
 0x1d2   : > { %v2537_v37 = vpop.permute.xlu0 %2536 }
 0x1d3   : > { %2584 = vst.msk [vmem:[#allocation3 + $0x10] sm:$0xff] %vm2582_vm0, %v2537_v37  ;;  %2329 = vrot.lane.b32.xlu1 %v2286_v54, %s3980_s16  ;;  %v2059_v37 = vrot.slane %v2057_v27, 7 }
 0x1d4   : > { %2681 = vst.msk [vmem:[#allocation3 + $0x10] sm:$0xff] %vm6594_vm3, %v5869_v47  ;;  %2311 = vrot.lane.b32.xlu0 %v6595_v26, %s3980_s16  ;;  %v1832_v47 = vsel %vm995_vm12, %v1827_v40, %v6048_v20  ;;  %v2297_v26 = vor.u32 %v2295_v44, %v6095_v8 }
 0x1d5   : > { %v6072_v33 = vpop.permute.xlu1 %1378 }
 0x1d6   : > { %v2077_v45 = vpop.permute.xlu0 %2076  ;;  %v2302_v29 = vsel %vm995_vm12, %v2297_v26, %v2301_v23  ;;  %v6599_v23 = vld [vmem:[#allocation23_spill] sm:$0xff] }
 0x1d7   : > { %2123 = vst.msk [vmem:[#allocation3 + $0x20] sm:$0xff] %vm2120_vm5, %v2077_v45  ;;  %1869 = vrot.lane.b32.xlu1 %v1832_v47, %s3977_s15  ;;  %v2060_v45 = vshll.u32 %v6082_v59, 16  ;;  %v1262_v47 = vshll.u32 %v6044_v57, 16  ;;  %v2287_v59 = vshrl.u32 %v5988_v17, 16 }
 0x1d8   : > { %2542 = vrot.lane.b32.xlu0 %v2445_v43, %s3979_s8 }
 0x1d9   : > { %v828_v0 = vpop.permute.xlu1 %827  ;;  %v1264_v57 = vor.u32 %v1262_v47, %v1261_v12  ;;  %v2062_v9 = vor.u32 %v2060_v45, %v2059_v37  ;;  %v2289_v27 = vor.u32 %v2287_v59, %v6028_v55  ;;  %v2529_v12 = vrot.slane %v2527_v58, 7 }
 0x1da   : > { %v2308_v49 = vpop.permute.xlu0 %2307  ;;  %863 = vst.msk [vmem:[#allocation3 + $0xd0] sm:$0xff] %vm849_vm4, %v828_v0  ;;  %v2530_v0 = vshll.u32 %v2401_v11, 16  ;;  %v2909_v11 = vld [vmem:[#allocation3 + $0x78] sm:$0xff] }
 0x1db   : > { %2354 = vst.msk [vmem:[#allocation3 + $0x20] sm:$0xff] %vm2351_vm13, %v2308_v49  ;;  %v2896_v34 = vld [vmem:[#allocation3 + $0x10] sm:$0xff]  ;;  %2562 = vrot.lane.b32.xlu1 %v2525_v5, %s3979_s8 }
 0x1dc   : > { %1319 = vst.msk [vmem:[#allocation3 + $0xd0] sm:$0xff] %vm635_vm1, %v1273_v30  ;;  %2639 = vrot.lane.b32.xlu0 %v2603_v15, %s3976_s6  ;;  %3094 = vmatmul.mubr.bf16.gmra.mrb[36].mxu0 %v2896_v34  ;;  %v1265_v30 = vsel %vm1157_vm9, %v5854_v19, %v1264_v57  ;;  %v1833_v19 = vshrl.u32 %v6009_v63, 16  ;;  %v2532_v44 = vor.u32 %v2530_v0, %v2529_v12  ;;  %v2915_v0 = vld [vmem:[#allocation3 + $0xa8] sm:$0xff] }
 0x1dd   : > { %2585 = vst.msk [vmem:[#allocation3 + $0x20] sm:$0xff] %vm2582_vm0, %v5997_v1  ;;  %3570 = vmatprep.mubr.msk.bf16.mxu0 %vm635_vm1, %v2899_v24  ;;  %v6105_v40 = vpop.permute.xlu1 %2548  ;;  %v2071_v1 = vsel %vm1157_vm9, %v2059_v37, %v2070_v53  ;;  %v3907_v53 = vld [vmem:[#allocation2 + $0x80] sm:$0xff]  ;;  %v881_v24 = vld [vmem:[#allocation2 + $0x78] sm:$0xff] }
 0x1de   : > { %2682 = vst.msk [vmem:[#allocation3 + $0x20] sm:$0xff] %vm6597_vm15, %v6596_v56  ;;  %v1848_v54 = vpop.permute.xlu0 %1847  ;;  %v2533_v15 = vsel %vm1157_vm9, %v6060_v46, %v2532_v44  ;;  %v1835_v63 = vor.u32 %v1833_v19, %v6048_v20  ;;  %v2907_v46 = vld [vmem:[#allocation3 + $0x68] sm:$0xff]  ;;  %v1155_v62 = vsel %vm1138_vm2, %v881_v24, 0  ;;  %vm6604_vm2 = vmmov %vm6594_vm3 }
 0x1df   : > { %1893 = vst.msk [vmem:[#allocation3 + $0x30] sm:$0xff] %vm1889_vm6, %v1848_v54  ;;  %2102 = vrot.lane.b32.xlu1 %v2071_v1, %s3978_s25  ;;  %v1275_v26 = vshrl.u32 %v1155_v62, 16  ;;  %vm6607_vm15 = vmmov %vm6604_vm2  ;;  %v2903_v24 = vld [vmem:[#allocation3 + $0x48] sm:$0xff] }
 0x1e1   : > { %v6113_v50 = vpop.permute.xlu1 %2319  ;;  %v1277_v45 = vrot.slane %v1275_v26, 7 }
 0x1e2   : > { %v1371_v13 = vpop.permute.xlu0 %1370 }
 0x1e3   : > { %1411 = vst.msk [vmem:[#allocation3 + $0x80] sm:$0xff] %vm1402_vm8, %v1371_v13  ;;  %2333 = vrot.lane.b32.xlu1 %v2302_v29, %s3980_s16 }
 0x1e4   : > { %1898 = vst.msk [vmem:[#allocation3 + $0x80] sm:$0xff] %vm1889_vm6, %v5995_v28  ;;  %v2517_v28 = vsel %vm1157_vm9, %v5772_v18, %v2516_v21  ;;  %v2063_v18 = vsel %vm1157_vm9, %v5821_v16, %v2062_v9  ;;  %v2294_v16 = vsel %vm995_vm12, %v2289_v27, %v6095_v8  ;;  %v1156_v8 = vsel %vm1139_vm11, %v3907_v53, 0  ;;  %v2913_v27 = vld [vmem:[#allocation3 + $0x98] sm:$0xff]  ;;  %vm6605_vm11 = vmmov %vm6604_vm2  ;;  %v2919_v53 = vld [vmem:[#allocation3 + $0xc8] sm:$0xff] }
 0x1e5   : > { %v2898_v43 = vld [vmem:[#allocation3 + $0x20] sm:$0xff]  ;;  %v1377_v42 = vpop.permute.xlu1 %1376  ;;  %v1283_v37 = vshrl.u32 %v1156_v8, 16  ;;  %v1286_v1 = vshll.u32 %v1156_v8, 16 }
 0x1e6   : > { %3102 = vmatmul.mubr.bf16.gmra.mrb[40].mxu0 %v2898_v43  ;;  %v820_v38 = vpop.permute.xlu0 %819  ;;  %1414 = vst.msk [vmem:[#allocation3 + $0xb0] sm:$0xff] %vm1402_vm8, %v1377_v42 }
 0x1e7   : > { %3571 = vmatprep.mubr.msk.bf16.mxu0 %vm635_vm1, %v2901_v48  ;;  %859 = vst.msk [vmem:[#allocation3 + $0x90] sm:$0xff] %vm849_vm4, %v820_v38  ;;  %2560 = vrot.lane.b32.xlu1 %v2517_v28, %s3979_s8  ;;  %v1285_v25 = vrot.slane %v1283_v37, 7 }
 0x1e8   : > { %1315 = vst.msk [vmem:[#allocation3 + $0x90] sm:$0xff] %vm635_vm1, %v1241_v61  ;;  %v1278_v61 = vshll.u32 %v1155_v62, 16 }
 0x1e9   : > { %1412 = vst.msk [vmem:[#allocation3 + $0x90] sm:$0xff] %vm1402_vm8, %v5955_v35  ;;  %v826_v17 = vpop.permute.xlu1 %825  ;;  %v1708_v35 = vsel %vm1691_vm10, %v1435_v41, 0  ;;  %v1288_v52 = vor.u32 %v1286_v1, %v1285_v25  ;;  %vm6601_vm10 = vmmov %vm6594_vm3 }
 0x1ea   : > { %v2642_v51 = vpop.permute.xlu0 %2641  ;;  %862 = vst.msk [vmem:[#allocation3 + $0xc0] sm:$0xff] %vm849_vm4, %v826_v17  ;;  %v1837_v5 = vshll.u32 %v1708_v35, 16  ;;  %v1280_v9 = vor.u32 %v1278_v61, %v1277_v45 }
 0x1eb   : > { %1318 = vst.msk [vmem:[#allocation3 + $0xc0] sm:$0xff] %vm635_vm1, %v1265_v30  ;;  %2100 = vrot.lane.b32.xlu1 %v2063_v18, %s3978_s25  ;;  %v1289_v21 = vsel %vm1157_vm9, %v1277_v45, %v1288_v52 }
 0x1ec   : > { %1415 = vst.msk [vmem:[#allocation3 + $0xc0] sm:$0xff] %vm1402_vm8, %v6072_v33  ;;  %v1839_v34 = vrot.slane %v1837_v5, 1  ;;  %v1281_v41 = vsel %vm1157_vm9, %v6050_v36, %v1280_v9  ;;  %vm6603_vm9 = vmmov %vm6594_vm3 }
 0x1ed   : > { %v1862_v55 = vpop.permute.xlu1 %1861 }
 0x1ee   : > { %v2314_v49 = vpop.permute.xlu0 %2313  ;;  %v1840_v56 = vsel %vm995_vm12, %v1835_v63, %v1839_v34  ;;  %vm6600_vm12 = vmmov %vm6594_vm3 }
 0x1ef   : > { %2357 = vst.msk [vmem:[#allocation3 + $0x50] sm:$0xff] %vm2351_vm13, %v2314_v49  ;;  %2331 = vrot.lane.b32.xlu1 %v2294_v16, %s3980_s16  ;;  %vm6606_vm3 = vmmov %vm6604_vm2 }
 0x1f0   : > { %2588 = vst.msk [vmem:[#allocation3 + $0x50] sm:$0xff] %vm2582_vm0, %v5902_v31 }
 0x1f1   : > { %2685 = vst.msk [vmem:[#allocation3 + $0x50] sm:$0xff] %vm6598_vm14, %v2642_v51  ;;  %v2095_v6 = vpop.permute.xlu1 %2094  ;;  %vm6610_vm14 = vmmov %vm6604_vm2 }
 0x1f2   : > { %v2547_v33 = vpop.permute.xlu0 %2546 }
 0x1f3   : > { %2564 = vrot.lane.b32.xlu1 %v2533_v15, %s3979_s8 }
 0x1f5   : > { %v6164_v10 = vpop.permute.xlu1 %2655 }
 0x1f6   : > { %v1375_v31 = vpop.permute.xlu0 %1374 }
 0x1f7   : > { %1413 = vst.msk [vmem:[#allocation3 + $0xa0] sm:$0xff] %vm1402_vm8, %v1375_v31  ;;  %1871 = vrot.lane.b32.xlu1 %v1840_v56, %s3977_s15  ;;  %s215_s15 = sand.u32 1, %s3962_s19  }
 0x1f8   : > { %1900 = vst.msk [vmem:[#allocation3 + $0xa0] sm:$0xff] %vm1889_vm6, %v1862_v55  ;;  %v2904_v20 = vld [vmem:[#allocation3 + $0x50] sm:$0xff]  ;;  %s3486_s17 = sshll.u32 %s215_s15, 7  ;;  %s6336_s11 = scalar_lea.sflag [#allocation5], %s215_s15 }
 0x1f9   : > { %3126 = vmatmul.mubr.bf16.vlgmr.msra.gmra.mrb[0].mxu1 %v2904_v20  ;;  %v1383_v54 = vpop.permute.xlu1 %1382  ;;  %v2921_v20 = vld [vmem:[#allocation3 + $0xd8] sm:$0xff]  ;;  %s6277_s25 = scalar_lea.vmem [#allocation4], %s3486_s17 }
 0x1fa   : > { %3574 = vmatprep.mubr.msk.bf16.mxu1 %vm635_vm1, %v2907_v46  ;;  %v2085_v32 = vpop.permute.xlu0 %2084  ;;  %s3420_s7 = sshll.u32 %s6277_s25, 4  ;;  %s6331_s7 = int_to_ptr.vmem [resolvable:$true] %s3420_s7 }
 0x1fb   : > { %2127 = vst.msk [vmem:[#allocation3 + $0x60] sm:$0xff] %vm2120_vm5, %v2085_v32  ;;  %2661 = vrot.lane.b32.xlu1 %v5824_v7, %s3976_s6  ;;  %s3908_s12 = scalar_lea.vmem %s6331_s7, 2048  ;;  %p3915_p0 = scmp.lt.s32.totalorder %s6331_s7, %s3913_s13 }
 0x1fc   : > { %2358 = vst.msk [vmem:[#allocation3 + $0x60] sm:$0xff] %vm2351_vm13, %v5924_v39  ;;  %p3909_p11 = scmp.ne.s32.totalorder %s6331_s7, %s3908_s12  ;;  %p3916_p1 = scmp.lt.s32.totalorder %s3914_s14, %s3908_s12 }
 0x1fd   : > { %2589 = vst.msk [vmem:[#allocation3 + $0x60] sm:$0xff] %vm2582_vm0, %v2547_v33  ;;  %v2553_v13 = vpop.permute.xlu1 %2552 }
 0x1fe   : > { %2686 = vst.msk [vmem:[#allocation3 + $0x60] sm:$0xff] %vm6600_vm12, %v6599_v23  ;;  %v1856_v60 = vpop.permute.xlu0 %1855  ;;  %vm6611_vm12 = vmmov %vm6604_vm2  ;;  %p3910_p12 = pnand %p3909_p11, %p4051_p5  ;;  %p3917_p2 = por %p3916_p1, %p3915_p0 }
 0x1ff   : > { %1897 = vst.msk [vmem:[#allocation3 + $0x70] sm:$0xff] %vm1889_vm6, %v1856_v60 }
 0x200   : > { %2128 = vst.msk [vmem:[#allocation3 + $0x70] sm:$0xff] %vm2120_vm5, %v5852_v22  ;;  %p3911_p13 = pneg %p3910_p12 }
 0x201   : > { %v832_v29 = vpop.permute.xlu1 %831 }
 0x202   : > { %v2646_v39 = vpop.permute.xlu0 %2645  ;;  %865 = vst.msk [vmem:[#allocation3 + $0xf0] sm:$0xff] %vm849_vm4, %v832_v29  ;;  %p3918_p3 = pnand %p3917_p2, %p3911_p13 }
 0x203   : > { %1321 = vst.msk [vmem:[#allocation3 + $0xf0] sm:$0xff] %vm635_vm1, %v1289_v21 }
 0x205   : > { %v2906_v7 = vld [vmem:[#allocation3 + $0x60] sm:$0xff]  ;;  %v2324_v47 = vpop.permute.xlu1 %2323 }
 0x206   : > { %3134 = vmatmul.mubr.bf16.gmra.mrb[4].mxu1 %v2906_v7  ;;  %v2318_v43 = vpop.permute.xlu0 %2317  ;;  %v2923_v7 = vld [vmem:[#allocation3 + $0xe8] sm:$0xff] }
 0x207   : > { %2359 = vst.msk [vmem:[#allocation3 + $0x70] sm:$0xff] %vm2351_vm13, %v2318_v43  ;;  %3575 = vmatprep.mubr.msk.bf16.mxu1 %vm635_vm1, %v2909_v11  ;;  %v2925_v11 = vld [vmem:[#allocation3 + $0xf8] sm:$0xff] }
 0x208   : > { %2590 = vst.msk [vmem:[#allocation3 + $0x70] sm:$0xff] %vm2582_vm0, %v6105_v40  ;;  %v2911_v40 = vld [vmem:[#allocation3 + $0x88] sm:$0xff] }
 0x209   : > { %2687 = vst.msk [vmem:[#allocation3 + $0x70] sm:$0xff] %vm6601_vm10, %v2646_v39  ;;  %v1864_v22 = vpop.permute.xlu1 %1863 }
 0x20a   : > { %v2551_v48 = vpop.permute.xlu0 %2550  ;;  %1901 = vst.msk [vmem:[#allocation3 + $0xb0] sm:$0xff] %vm1889_vm6, %v1864_v22 }
 0x20b   : > { %2132 = vst.msk [vmem:[#allocation3 + $0xb0] sm:$0xff] %vm2120_vm5, %v2095_v6  ;;  %v2917_v6 = vld [vmem:[#allocation3 + $0xb8] sm:$0xff] }
 0x20d   : > { %v2654_v59 = vpop.permute.xlu1 %2653 }
 0x20e   : > { %v2089_v42 = vpop.permute.xlu0 %2088 }
 0x20f   : > { %2129 = vst.msk [vmem:[#allocation3 + $0x80] sm:$0xff] %vm2120_vm5, %v2089_v42  ;;  %v6270_v42 = vld [vmem:[%s6383_s4] ss:$0 sm:$0xff] }
 0x210   : > { %2360 = vst.msk [vmem:[#allocation3 + $0x80] sm:$0xff] %vm2351_vm13, %v6113_v50  ;;  %v2908_v38 = vld [vmem:[#allocation3 + $0x70] sm:$0xff] }
 0x211   : > { %2591 = vst.msk [vmem:[#allocation3 + $0x80] sm:$0xff] %vm2582_vm0, %v2551_v48  ;;  %3142 = vmatmul.mubr.bf16.gmra.mrb[8].mxu1 %v2908_v38  ;;  %v1381_v28 = vpop.permute.xlu1 %1380 }
 0x212   : > { %2688 = vst.msk [vmem:[#allocation3 + $0x80] sm:$0xff] %vm6602_vm7, %v5867_v14  ;;  %3576 = vmatprep.mubr.msk.bf16.mxu1 %vm635_vm1, %v2911_v40  ;;  %v1860_v57 = vpop.permute.xlu0 %1859 }
 0x213   : > { %1416 = vst.msk [vmem:[#allocation3 + $0xd0] sm:$0xff] %vm1402_vm8, %v1381_v28 }
 0x214   : > { %1899 = vst.msk [vmem:[#allocation3 + $0x90] sm:$0xff] %vm1889_vm6, %v1860_v57 }
 0x215   : > { %2130 = vst.msk [vmem:[#allocation3 + $0x90] sm:$0xff] %vm2120_vm5, %v6021_v3  ;;  %v830_v50 = vpop.permute.xlu1 %829 }
 0x216   : > { %v2650_v58 = vpop.permute.xlu0 %2649  ;;  %864 = vst.msk [vmem:[#allocation3 + $0xe0] sm:$0xff] %vm849_vm4, %v830_v50 }
 0x217   : > { %1320 = vst.msk [vmem:[#allocation3 + $0xe0] sm:$0xff] %vm635_vm1, %v1281_v41 }
 0x218   : > { %1417 = vst.msk [vmem:[#allocation3 + $0xe0] sm:$0xff] %vm1402_vm8, %v1383_v54 }
 0x219   : > { %v2910_v14 = vld [vmem:[#allocation3 + $0x80] sm:$0xff]  ;;  %v2326_v17 = vpop.permute.xlu1 %2325 }
 0x21a   : > { %3150 = vmatmul.mubr.bf16.gmra.mrb[12].mxu1 %v2910_v14  ;;  %v2322_v51 = vpop.permute.xlu0 %2321  ;;  %2363 = vst.msk [vmem:[#allocation3 + $0xb0] sm:$0xff] %vm2351_vm13, %v2326_v17 }
 0x21b   : > { %2361 = vst.msk [vmem:[#allocation3 + $0x90] sm:$0xff] %vm2351_vm13, %v2322_v51  ;;  %3577 = vmatprep.mubr.msk.bf16.mxu1 %vm635_vm1, %v2913_v27 }
 0x21c   : > { %2592 = vst.msk [vmem:[#allocation3 + $0x90] sm:$0xff] %vm2582_vm0, %v2553_v13 }
 0x21d   : > { %2689 = vst.msk [vmem:[#allocation3 + $0x90] sm:$0xff] %vm6603_vm9, %v2650_v58  ;;  %v1866_v3 = vpop.permute.xlu1 %1865 }
 0x21e   : > { %v2555_v36 = vpop.permute.xlu0 %2554  ;;  %1902 = vst.msk [vmem:[#allocation3 + $0xc0] sm:$0xff] %vm1889_vm6, %v1866_v3 }
 0x221   : > { %v2559_v30 = vpop.permute.xlu1 %2558 }
 0x222   : > { %v2093_v18 = vpop.permute.xlu0 %2092 }
 0x223   : > { %2131 = vst.msk [vmem:[#allocation3 + $0xa0] sm:$0xff] %vm2120_vm5, %v2093_v18 }
 0x224   : > { %2362 = vst.msk [vmem:[#allocation3 + $0xa0] sm:$0xff] %vm2351_vm13, %v2324_v47  ;;  %v2912_v12 = vld [vmem:[#allocation3 + $0x90] sm:$0xff] }
 0x225   : > { %2593 = vst.msk [vmem:[#allocation3 + $0xa0] sm:$0xff] %vm2582_vm0, %v2555_v36  ;;  %3158 = vmatmul.mubr.bf16.gmra.mrb[16].mxu1 %v2912_v12  ;;  %v2099_v35 = vpop.permute.xlu1 %2098 }
 0x226   : > { %2690 = vst.msk [vmem:[#allocation3 + $0xa0] sm:$0xff] %vm6604_vm2, %v6046_v4  ;;  %3578 = vmatprep.mubr.msk.bf16.mxu1 %vm635_vm1, %v2915_v0  ;;  %v2079_v55 = vpop.permute.xlu0 %2078 }
 0x227   : > { %2124 = vst.msk [vmem:[#allocation3 + $0x30] sm:$0xff] %vm2120_vm5, %v2079_v55 }
 0x229   : > { %v6223_v49 = vpop.permute.xlu1 %2659 }
 0x22a   : > { %v2310_v19 = vpop.permute.xlu0 %2309 }
 0x22b   : > { %2355 = vst.msk [vmem:[#allocation3 + $0x30] sm:$0xff] %vm2351_vm13, %v2310_v19 }
 0x22d   : > { %v2914_v16 = vld [vmem:[#allocation3 + $0xa0] sm:$0xff]  ;;  %v2557_v44 = vpop.permute.xlu1 %2556 }
 0x22e   : > { %3166 = vmatmul.mubr.bf16.gmra.mrb[20].mxu1 %v2914_v16  ;;  %v2541_v5 = vpop.permute.xlu0 %2540  ;;  %2594 = vst.msk [vmem:[#allocation3 + $0xb0] sm:$0xff] %vm2582_vm0, %v2557_v44 }
 0x22f   : > { %2586 = vst.msk [vmem:[#allocation3 + $0x30] sm:$0xff] %vm2582_vm0, %v2541_v5  ;;  %3579 = vmatprep.mubr.msk.bf16.mxu1 %vm635_vm1, %v2917_v6 }
 0x230   : > { %2691 = vst.msk [vmem:[#allocation3 + $0xb0] sm:$0xff] %vm6605_vm11, %v2654_v59 }
 0x231   : > { %v2097_v4 = vpop.permute.xlu1 %2096 }
 0x232   : > { %v2638_v33 = vpop.permute.xlu0 %2637  ;;  %2133 = vst.msk [vmem:[#allocation3 + $0xc0] sm:$0xff] %vm2120_vm5, %v2097_v4 }
 0x233   : > { %2683 = vst.msk [vmem:[#allocation3 + $0x30] sm:$0xff] %vm6606_vm3, %v2638_v33 }
 0x235   : > { %v2328_v15 = vpop.permute.xlu1 %2327 }
 0x236   : > { %v810_v63 = vpop.permute.xlu0 %809  ;;  %2364 = vst.msk [vmem:[#allocation3 + $0xc0] sm:$0xff] %vm2351_vm13, %v2328_v15 }
 0x237   : > { %854 = vst.msk [vmem:[#allocation3 + $0x40] sm:$0xff] %vm849_vm4, %v810_v63  ;;  %v2916_v34 = vld [vmem:[#allocation3 + $0xb0] sm:$0xff]  ;;  %vm6608_vm4 = vmmov %vm6604_vm2 }
 0x238   : > { %2595 = vst.msk [vmem:[#allocation3 + $0xc0] sm:$0xff] %vm2582_vm0, %v2559_v30  ;;  %3174 = vmatmul.mubr.bf16.gmra.mrb[24].mxu1 %v2916_v34 }
 0x239   : > { %1310 = vst.msk [vmem:[#allocation3 + $0x40] sm:$0xff] %vm635_vm1, %v5950_v2  ;;  %3580 = vmatprep.mubr.msk.bf16.mxu1 %vm635_vm1, %v2919_v53  ;;  %v1868_v8 = vpop.permute.xlu1 %1867 }
 0x23a   : > { %2692 = vst.msk [vmem:[#allocation3 + $0xc0] sm:$0xff] %vm6607_vm15, %v6164_v10  ;;  %v1363_v31 = vpop.permute.xlu0 %1362  ;;  %v2900_v56 = vld [vmem:[#allocation3 + $0x30] sm:$0xff] }
 0x23b   : > { %1903 = vst.msk [vmem:[#allocation3 + $0xd0] sm:$0xff] %vm1889_vm6, %v1868_v8  ;;  %3110 = vmatmul.mubr.bf16.gmra.mrb[44].mxu0 %v2900_v56 }
 0x23c   : > { %1407 = vst.msk [vmem:[#allocation3 + $0x40] sm:$0xff] %vm1402_vm8, %v1363_v31  ;;  %3572 = vmatprep.mubr.msk.bf16.mxu0 %vm635_vm1, %v2903_v24 }
 0x23d   : > { %2134 = vst.msk [vmem:[#allocation3 + $0xd0] sm:$0xff] %vm2120_vm5, %v2099_v35  ;;  %v2658_v2 = vpop.permute.xlu1 %2657 }
 0x23e   : > { %v1850_v37 = vpop.permute.xlu0 %1849 }
 0x23f   : > { %1894 = vst.msk [vmem:[#allocation3 + $0x40] sm:$0xff] %vm1889_vm6, %v1850_v37 }
 0x241   : > { %v2918_v10 = vld [vmem:[#allocation3 + $0xc0] sm:$0xff]  ;;  %v1385_v46 = vpop.permute.xlu1 %1384 }
 0x242   : > { %3182 = vmatmul.mubr.bf16.gmra.mrb[28].mxu1 %v2918_v10  ;;  %v2081_v54 = vpop.permute.xlu0 %2080  ;;  %1418 = vst.msk [vmem:[#allocation3 + $0xf0] sm:$0xff] %vm1402_vm8, %v1385_v46  ;;  %vm6609_vm8 = vmmov %vm6604_vm2 }
 0x243   : > { %3581 = vmatprep.mubr.msk.bf16.mxu1 %vm635_vm1, %v2921_v20  ;;  %2125 = vst.msk [vmem:[#allocation3 + $0x40] sm:$0xff] %vm2120_vm5, %v2081_v54 }
 0x245   : > { %v2330_v32 = vpop.permute.xlu1 %2329 }
 0x246   : > { %v2312_v62 = vpop.permute.xlu0 %2311  ;;  %2365 = vst.msk [vmem:[#allocation3 + $0xd0] sm:$0xff] %vm2351_vm13, %v2330_v32 }
 0x247   : > { %2356 = vst.msk [vmem:[#allocation3 + $0x40] sm:$0xff] %vm2351_vm13, %v2312_v62 }
 0x249   : > { %v1870_v25 = vpop.permute.xlu1 %1869 }
 0x24a   : > { %v2543_v1 = vpop.permute.xlu0 %2542  ;;  %1904 = vst.msk [vmem:[#allocation3 + $0xe0] sm:$0xff] %vm1889_vm6, %v1870_v25 }
 0x24b   : > { %2587 = vst.msk [vmem:[#allocation3 + $0x40] sm:$0xff] %vm2582_vm0, %v2543_v1 }
 0x24d   : > { %v2563_v26 = vpop.permute.xlu1 %2562 }
 0x24e   : > { %v2640_v23 = vpop.permute.xlu0 %2639 }
 0x24f   : > { %2684 = vst.msk [vmem:[#allocation3 + $0x40] sm:$0xff] %vm6608_vm4, %v2640_v23 }
 0x251   : > { %v2103_v13 = vpop.permute.xlu1 %2102 }
 0x255   : > { %v2334_v60 = vpop.permute.xlu1 %2333 }
 0x256   : > { %v2902_v52 = vld [vmem:[#allocation3 + $0x40] sm:$0xff] }
 0x257   : > { %3118 = vmatmul.mubr.bf16.gmra.mrb[48].mxu0 %v2902_v52 }
 0x259   : > { %v2561_v45 = vpop.permute.xlu1 %2560 }
 0x25a   : > { %2596 = vst.msk [vmem:[#allocation3 + $0xd0] sm:$0xff] %vm2582_vm0, %v2561_v45 }
 0x25b   : > { %2693 = vst.msk [vmem:[#allocation3 + $0xd0] sm:$0xff] %vm6609_vm8, %v2658_v2 }
 0x25d   : > { %v2101_v29 = vpop.permute.xlu1 %2100 }
 0x25e   : > { %2135 = vst.msk [vmem:[#allocation3 + $0xe0] sm:$0xff] %vm2120_vm5, %v2101_v29 }
 0x261   : > { %v2332_v39 = vpop.permute.xlu1 %2331 }
 0x262   : > { %2366 = vst.msk [vmem:[#allocation3 + $0xe0] sm:$0xff] %vm2351_vm13, %v2332_v39  ;;  %v2920_v21 = vld [vmem:[#allocation3 + $0xd0] sm:$0xff] }
 0x263   : > { %2597 = vst.msk [vmem:[#allocation3 + $0xe0] sm:$0xff] %vm2582_vm0, %v2563_v26  ;;  %3190 = vmatmul.mubr.bf16.gmra.mrb[32].mxu1 %v2920_v21 }
 0x264   : > { %2694 = vst.msk [vmem:[#allocation3 + $0xe0] sm:$0xff] %vm6610_vm14, %v6223_v49  ;;  %3582 = vmatprep.mubr.msk.bf16.mxu1 %vm635_vm1, %v2923_v7 }
 0x265   : > { %v2565_v47 = vpop.permute.xlu1 %2564 }
 0x269   : > { %v1872_v43 = vpop.permute.xlu1 %1871 }
 0x26a   : > { %1905 = vst.msk [vmem:[#allocation3 + $0xf0] sm:$0xff] %vm1889_vm6, %v1872_v43 }
 0x26b   : > { %2136 = vst.msk [vmem:[#allocation3 + $0xf0] sm:$0xff] %vm2120_vm5, %v2103_v13  ;;  %v2922_v22 = vld [vmem:[#allocation3 + $0xe0] sm:$0xff] }
 0x26c   : > { %2367 = vst.msk [vmem:[#allocation3 + $0xf0] sm:$0xff] %vm2351_vm13, %v2334_v60  ;;  %3198 = vmatmul.mubr.bf16.gmra.mrb[36].mxu1 %v2922_v22 }
 0x26d   : > { %2598 = vst.msk [vmem:[#allocation3 + $0xf0] sm:$0xff] %vm2582_vm0, %v2565_v47  ;;  %v2662_v48 = vpop.permute.xlu1 %2661  ;;  %3583 = vmatprep.mubr.msk.bf16.mxu1 %vm635_vm1, %v2925_v11 }
 0x26e   : > { %2695 = vst.msk [vmem:[#allocation3 + $0xf0] sm:$0xff] %vm6611_vm12, %v2662_v48 }
 0x275   : > { %v2924_v59 = vld [vmem:[#allocation3 + $0xf0] sm:$0xff] }
 0x276   : > { %3206 = vmatmul.mubr.bf16.gmra.mrb[40].mxu1 %v2924_v59 }
 0x286   : > { %v3087_v61 = vpop.f32.mrb[32].mxu0 }
 0x287   : > { %v3088_v38 = vadd.f32 %v6270_v42, %v3087_v61  ;;  %v3089_v40 = vpop.f32.mrb[33].mxu0 }
 0x288   : > { %v3090_v28 = vpop.f32.mrb[34].mxu0 }
 0x289   : > { %v3091_v57 = vadd.f32 %v6270_v42, %v3090_v28  ;;  %v3092_v9 = vpop.f32.mrb[35].mxu0  ;;  %v3214_v50 = vmax.f32 %v3088_v38, 0.0 }
 0x28b   : > { %v3215_v58 = vmax.f32 %v3091_v57, 0.0 }
 0x28d   : > { %v3658_v41 = vpack.c.bf16 %v3215_v58, %v3214_v50 }
 0x28f   : > { %3659 = vst [vmem:[%s6277_s25] sm:$0xff] %v3658_v41  }
 0x2af   : > { %v3095_v14 = vpop.f32.mrb[36].mxu0 }
 0x2b0   : > { %v3096_v17 = vadd.f32 %v6270_v42, %v3095_v14  ;;  %v3097_v51 = vpop.f32.mrb[37].mxu0 }
 0x2b1   : > { %v3098_v27 = vpop.f32.mrb[38].mxu0 }
 0x2b2   : > { %v3099_v3 = vadd.f32 %v6270_v42, %v3098_v27  ;;  %v3100_v36 = vpop.f32.mrb[39].mxu0  ;;  %v3216_v30 = vmax.f32 %v3096_v17, 0.0 }
 0x2b4   : > { %v3217_v18 = vmax.f32 %v3099_v3, 0.0 }
 0x2b6   : > { %v3663_v12 = vpack.c.bf16 %v3217_v18, %v3216_v30 }
 0x2b8   : > { %3735 = vst [vmem:[%s6277_s25 + $0x8] sm:$0xff] %v3663_v12  }
 0x2b9   : > { %v3103_v0 = vpop.f32.mrb[40].mxu0 }
 0x2ba   : > { %v3104_v35 = vadd.f32 %v6270_v42, %v3103_v0  ;;  %v3105_v55 = vpop.f32.mrb[41].mxu0 }
 0x2bb   : > { %v3106_v49 = vpop.f32.mrb[42].mxu0 }
 0x2bc   : > { %v3107_v19 = vadd.f32 %v6270_v42, %v3106_v49  ;;  %v3108_v16 = vpop.f32.mrb[43].mxu0  ;;  %v3218_v44 = vmax.f32 %v3104_v35, 0.0 }
 0x2be   : > { %v3219_v5 = vmax.f32 %v3107_v19, 0.0 }
 0x2c0   : > { %v3668_v6 = vpack.c.bf16 %v3219_v5, %v3218_v44 }
 0x2c2   : > { %3736 = vst [vmem:[%s6277_s25 + $0x10] sm:$0xff] %v3668_v6  }
 0x2cc   : > { %v3127_v4 = vpop.f32.mrb[0].mxu1 }
 0x2cd   : > { %v3128_v33 = vadd.f32 %v6270_v42, %v3127_v4  ;;  %v3129_v15 = vpop.f32.mrb[1].mxu1 }
 0x2ce   : > { %v3130_v63 = vpop.f32.mrb[2].mxu1 }
 0x2cf   : > { %v3131_v34 = vadd.f32 %v6270_v42, %v3130_v63  ;;  %v3132_v53 = vpop.f32.mrb[3].mxu1  ;;  %v3224_v8 = vmax.f32 %v3128_v33, 0.0 }
 0x2d1   : > { %v3225_v31 = vmax.f32 %v3131_v34, 0.0 }
 0x2d3   : > { %v3683_v56 = vpack.c.bf16 %v3225_v31, %v3224_v8 }
 0x2d5   : > { %3739 = vst [vmem:[%s6277_s25 + $0x28] sm:$0xff] %v3683_v56  }
 0x2d9   : > { %v3135_v24 = vpop.f32.mrb[4].mxu1 }
 0x2da   : > { %v3136_v2 = vadd.f32 %v6270_v42, %v3135_v24  ;;  %v3137_v37 = vpop.f32.mrb[5].mxu1 }
 0x2db   : > { %v3138_v10 = vpop.f32.mrb[6].mxu1 }
 0x2dc   : > { %v3139_v20 = vadd.f32 %v6270_v42, %v3138_v10  ;;  %v3140_v46 = vpop.f32.mrb[7].mxu1  ;;  %v3226_v54 = vmax.f32 %v3136_v2, 0.0 }
 0x2de   : > { %v3227_v32 = vmax.f32 %v3139_v20, 0.0 }
 0x2e0   : > { %v3688_v62 = vpack.c.bf16 %v3227_v32, %v3226_v54 }
 0x2e2   : > { %3740 = vst [vmem:[%s6277_s25 + $0x30] sm:$0xff] %v3688_v62  }
 0x2e4   : > { %v3143_v25 = vpop.f32.mrb[8].mxu1 }
 0x2e5   : > { %v3144_v1 = vadd.f32 %v6270_v42, %v3143_v25  ;;  %v3145_v26 = vpop.f32.mrb[9].mxu1 }
 0x2e6   : > { %v3146_v23 = vpop.f32.mrb[10].mxu1 }
 0x2e7   : > { %v3147_v13 = vadd.f32 %v6270_v42, %v3146_v23  ;;  %v3148_v60 = vpop.f32.mrb[11].mxu1  ;;  %v3228_v52 = vmax.f32 %v3144_v1, 0.0 }
 0x2e9   : > { %v3229_v45 = vmax.f32 %v3147_v13, 0.0 }
 0x2eb   : > { %v3693_v29 = vpack.c.bf16 %v3229_v45, %v3228_v52 }
 0x2ed   : > { %3741 = vst [vmem:[%s6277_s25 + $0x38] sm:$0xff] %v3693_v29   ;;  %v3151_v39 = vpop.f32.mrb[12].mxu1 }
 0x2ee   : > { %v3152_v21 = vadd.f32 %v6270_v42, %v3151_v39  ;;  %v3153_v7 = vpop.f32.mrb[13].mxu1 }
 0x2ef   : > { %v3154_v47 = vpop.f32.mrb[14].mxu1 }
 0x2f0   : > { %v3155_v43 = vadd.f32 %v6270_v42, %v3154_v47  ;;  %v3156_v11 = vpop.f32.mrb[15].mxu1  ;;  %v3230_v22 = vmax.f32 %v3152_v21, 0.0 }
 0x2f2   : > { %v3231_v48 = vmax.f32 %v3155_v43, 0.0 }
 0x2f4   : > { %v3698_v59 = vpack.c.bf16 %v3231_v48, %v3230_v22 }
 0x2f6   : > { %3742 = vst [vmem:[%s6277_s25 + $0x40] sm:$0xff] %v3698_v59  }
 0x2f8   : > { %v3159_v61 = vpop.f32.mrb[16].mxu1 }
 0x2f9   : > { %v3160_v38 = vadd.f32 %v6270_v42, %v3159_v61  ;;  %v3161_v40 = vpop.f32.mrb[17].mxu1 }
 0x2fa   : > { %v3162_v28 = vpop.f32.mrb[18].mxu1 }
 0x2fb   : > { %v3163_v57 = vadd.f32 %v6270_v42, %v3162_v28  ;;  %v3164_v9 = vpop.f32.mrb[19].mxu1  ;;  %v3232_v50 = vmax.f32 %v3160_v38, 0.0 }
 0x2fd   : > { %v3233_v58 = vmax.f32 %v3163_v57, 0.0 }
 0x2ff   : > { %v3703_v41 = vpack.c.bf16 %v3233_v58, %v3232_v50 }
 0x301   : > { %3743 = vst [vmem:[%s6277_s25 + $0x48] sm:$0xff] %v3703_v41   ;;  %v3167_v14 = vpop.f32.mrb[20].mxu1 }
 0x302   : > { %v3168_v17 = vadd.f32 %v6270_v42, %v3167_v14  ;;  %v3169_v51 = vpop.f32.mrb[21].mxu1 }
 0x303   : > { %v3170_v27 = vpop.f32.mrb[22].mxu1 }
 0x304   : > { %v3171_v3 = vadd.f32 %v6270_v42, %v3170_v27  ;;  %v3172_v36 = vpop.f32.mrb[23].mxu1  ;;  %v3234_v30 = vmax.f32 %v3168_v17, 0.0 }
 0x306   : > { %v3235_v18 = vmax.f32 %v3171_v3, 0.0 }
 0x308   : > { %v3708_v12 = vpack.c.bf16 %v3235_v18, %v3234_v30 }
 0x30a   : > { %3744 = vst [vmem:[%s6277_s25 + $0x50] sm:$0xff] %v3708_v12  }
 0x30b   : > { %v3175_v0 = vpop.f32.mrb[24].mxu1 }
 0x30c   : > { %v3176_v35 = vadd.f32 %v6270_v42, %v3175_v0  ;;  %v3177_v55 = vpop.f32.mrb[25].mxu1 }
 0x30d   : > { %v3178_v49 = vpop.f32.mrb[26].mxu1 }
 0x30e   : > { %v3179_v19 = vadd.f32 %v6270_v42, %v3178_v49  ;;  %v3111_v16 = vpop.f32.mrb[44].mxu0  ;;  %v3180_v44 = vpop.f32.mrb[27].mxu1  ;;  %v3236_v4 = vmax.f32 %v3176_v35, 0.0 }
 0x30f   : > { %v3112_v5 = vadd.f32 %v6270_v42, %v3111_v16  ;;  %v3113_v6 = vpop.f32.mrb[45].mxu0 }
 0x310   : > { %v3237_v33 = vmax.f32 %v3179_v19, 0.0  ;;  %v3114_v15 = vpop.f32.mrb[46].mxu0 }
 0x311   : > { %v3115_v63 = vadd.f32 %v6270_v42, %v3114_v15  ;;  %v3116_v34 = vpop.f32.mrb[47].mxu0  ;;  %v3220_v8 = vmax.f32 %v3112_v5, 0.0 }
 0x312   : > { %v3713_v53 = vpack.c.bf16 %v3237_v33, %v3236_v4 }
 0x313   : > { %v3221_v31 = vmax.f32 %v3115_v63, 0.0 }
 0x314   : > { %3745 = vst [vmem:[%s6277_s25 + $0x58] sm:$0xff] %v3713_v53  }
 0x315   : > { %v3183_v56 = vpop.f32.mrb[28].mxu1  ;;  %v3673_v24 = vpack.c.bf16 %v3221_v31, %v3220_v8 }
 0x316   : > { %v3184_v2 = vadd.f32 %v6270_v42, %v3183_v56  ;;  %v3185_v37 = vpop.f32.mrb[29].mxu1 }
 0x317   : > { %v3186_v10 = vpop.f32.mrb[30].mxu1  ;;  %3737 = vst [vmem:[%s6277_s25 + $0x18] sm:$0xff] %v3673_v24  }
 0x318   : > { %v3187_v20 = vadd.f32 %v6270_v42, %v3186_v10  ;;  %v3188_v46 = vpop.f32.mrb[31].mxu1  ;;  %v3238_v54 = vmax.f32 %v3184_v2, 0.0 }
 0x31a   : > { %v3239_v32 = vmax.f32 %v3187_v20, 0.0 }
 0x31c   : > { %v3718_v62 = vpack.c.bf16 %v3239_v32, %v3238_v54 }
 0x31e   : > { %3746 = vst [vmem:[%s6277_s25 + $0x60] sm:$0xff] %v3718_v62  }
 0x32a   : > { %v3119_v25 = vpop.f32.mrb[48].mxu0 }
 0x32b   : > { %v3120_v1 = vadd.f32 %v6270_v42, %v3119_v25  ;;  %v3121_v26 = vpop.f32.mrb[49].mxu0 }
 0x32c   : > { %v3122_v23 = vpop.f32.mrb[50].mxu0 }
 0x32d   : > { %v3123_v13 = vadd.f32 %v6270_v42, %v3122_v23  ;;  %v3124_v60 = vpop.f32.mrb[51].mxu0  ;;  %v3222_v52 = vmax.f32 %v3120_v1, 0.0 }
 0x32f   : > { %v3223_v45 = vmax.f32 %v3123_v13, 0.0 }
 0x331   : > { %v3678_v29 = vpack.c.bf16 %v3223_v45, %v3222_v52 }
 0x333   : > { %3738 = vst [vmem:[%s6277_s25 + $0x20] sm:$0xff] %v3678_v29  }
 0x336   : > { %v3191_v39 = vpop.f32.mrb[32].mxu1 }
 0x337   : > { %v3192_v21 = vadd.f32 %v6270_v42, %v3191_v39  ;;  %v3193_v7 = vpop.f32.mrb[33].mxu1 }
 0x338   : > { %v3194_v47 = vpop.f32.mrb[34].mxu1 }
 0x339   : > { %v3195_v43 = vadd.f32 %v6270_v42, %v3194_v47  ;;  %v3196_v11 = vpop.f32.mrb[35].mxu1  ;;  %v3240_v22 = vmax.f32 %v3192_v21, 0.0 }
 0x33b   : > { %v3241_v48 = vmax.f32 %v3195_v43, 0.0 }
 0x33d   : > { %v3723_v59 = vpack.c.bf16 %v3241_v48, %v3240_v22 }
 0x33f   : > { %3747 = vst [vmem:[%s6277_s25 + $0x68] sm:$0xff] %v3723_v59   ;;  %v3199_v61 = vpop.f32.mrb[36].mxu1 }
 0x340   : > { %v3200_v38 = vadd.f32 %v6270_v42, %v3199_v61  ;;  %v3201_v40 = vpop.f32.mrb[37].mxu1 }
 0x341   : > { %v3202_v28 = vpop.f32.mrb[38].mxu1 }
 0x342   : > { %v3203_v57 = vadd.f32 %v6270_v42, %v3202_v28  ;;  %v3204_v9 = vpop.f32.mrb[39].mxu1  ;;  %v3242_v50 = vmax.f32 %v3200_v38, 0.0 }
 0x344   : > { %v3243_v58 = vmax.f32 %v3203_v57, 0.0 }
 0x346   : > { %v3728_v41 = vpack.c.bf16 %v3243_v58, %v3242_v50 }
 0x348   : > { %3748 = vst [vmem:[%s6277_s25 + $0x70] sm:$0xff] %v3728_v41  }
 0x349   : > { %v3207_v14 = vpop.f32.mrb[40].mxu1 }
 0x34a   : > { %v3208_v17 = vadd.f32 %v6270_v42, %v3207_v14  ;;  %v3209_v51 = vpop.f32.mrb[41].mxu1 }
 0x34b   : > { %v3210_v27 = vpop.f32.mrb[42].mxu1 }
 0x34c   : > { %v3211_v3 = vadd.f32 %v6270_v42, %v3210_v27  ;;  %v3212_v36 = vpop.f32.mrb[43].mxu1  ;;  %v3244_v30 = vmax.f32 %v3208_v17, 0.0 }
 0x34e   : > { %v3245_v18 = vmax.f32 %v3211_v3, 0.0 }
 0x350   : > { %v3733_v12 = vpack.c.bf16 %v3245_v18, %v3244_v30 }
 0x352   : > { %3749 = vst [vmem:[%s6277_s25 + $0x78] sm:$0xff] %v3733_v12  }
 0x353   : > { %3921 = shalt.err (!%p3918_p3)
}
 0x354   : > { %s3922_s16 = scalar_lea.hbm %s6329_s10, 2048  ;;  %s3926_s15 = scalar_lea.hbm %s6384_s5, 4096 }
 0x355   : > { %p3923_p4 = scmp.ne.s32.totalorder %s6329_s10, %s3922_s16  ;;  %p3927_p9 = scmp.lt.u32.totalorder %s6329_s10, %s6384_s5 }
 0x356   : > { %p3928_p10 = scmp.lt.u32.totalorder %s3926_s15, %s3922_s16  ;;  %p3930_p12 = scmp.lt.u32.totalorder %s3922_s16, %s6329_s10 }
 0x357   : > { %p3924_p7 = pnand %p3923_p4, %p4051_p5 }
 0x358   : > { %p3929_p11 = por %p3928_p10, %p3927_p9 }
 0x359   : > { %p3925_p8 = pneg %p3924_p7 }
 0x35a   : > { %p3931_p13 = por %p3930_p12, %p3929_p11 }
 0x35c   : > { %p3932_p0 = pnand %p3931_p13, %p3925_p8 }
 0x35e   : > { %3935 = shalt.err (!%p3932_p0)
}
 0x35f   : > { %s3982_s26 = smov 4  }
 0x360   : > { %3828 = dma.vmem_to_hbm [thread:$0]  (%p4051_p5), %s6331_s7, 2048, %s6329_s10, %s6336_s11, %s3975_s30, %s3975_s30, %s3982_s26  }
 0x361 PF: > { %p3834_p1 = scmp.ge.s32.totalorder %s3970_s21, 2  ;;  %s3435_s8 = sand.u32 1, %s3958_s18  }
 0x362   : > { %s3436_s9 = scalar_lea.sflag [#allocation5], %s3435_s8 }
 0x363   : > { %p3831_p2 = pnand %p3834_p1, %p4055_p6 }
 0x365   : > { %3953 = dma.done.wait (!%p3831_p2), %s3436_s9, 2048  }
 0x366   : > { %3955 = vsyncadd (!%p3831_p2), %s3436_s9, 4294965248  ;;  %p15_p3 = scmp.ge.s32.totalorder %s4038_s24, 4   ;;  %s6612_s18 = smov %s3962_s19 }
 0x367   : > { %s6613_s19 = smov %s3966_s20  ;;  %s6614_s20 = smov %s4049_s27 }
 0x368   : > { %s6615_s21 = smov %s4038_s24  ;;  %17 = sbr.rel (!%p15_p3) target bundleno = 3 (0x3), region = 75 }
 0x36f   :  { %3441 = vsyncpa [#allocation5], 1 }
 0x370   :  { %3443 = vsyncpa [#allocation5 + $0x1], 1 }

</bundles_post_ra>
